<compile_context>
chip_gen: v7x
topology: tpu7x:2x2x1
jax: 0.10.0
libtpu: 0.0.40
codegen_flags: <defaults>
</compile_context>

<pallas_src>
import math
from functools import partial

import jax
import jax.numpy as jnp
from jax.experimental import pallas as pl
from jax.experimental.pallas import tpu as pltpu

DTYPE_MM = jnp.bfloat16          # MXU operand dtype (f32 accumulation everywhere)
VMEM_LIMIT = 32 * 1024 * 1024    # safe on v5e/v6e/v7x; raises v5e's 16 MiB scoped default


# ----------------------------- in-kernel helpers -----------------------------

def _ln(z, g, b):
    """LayerNorm (eps=1e-5), f32 math."""
    mean = jnp.mean(z, axis=-1, keepdims=True)
    var = jnp.mean((z - mean) ** 2, axis=-1, keepdims=True)
    return (z - mean) * jax.lax.rsqrt(var + 1e-5) * g + b


def _mha_heads(q, kv, wo, H, Dh, scale, causal):
    """Multi-head softmax attention for one batch element.

    q:  (Lq, D)  f32 (post Q-projection, bias included)
    kv: (Lk, 2D) f32 (post fused K|V projection, bias included)
    wo: (D, D)   bf16 output-projection weight
    Heads are unrolled; the head-concat is folded into the output projection via
    sublane-sliced Wo so only one (Lq, Lk) score tensor is live at a time.
    Returns (Lq, D) f32 = concat_h(softmax(q_h k_h^T) v_h) @ Wo  (bias not added).
    """
    D = H * Dh
    Lq, Lk = q.shape[0], kv.shape[0]
    qb = (q * scale).astype(DTYPE_MM)       # fold 1/sqrt(Dh) into Q once
    kvb = kv.astype(DTYPE_MM)

    if causal:
        row = jax.lax.broadcasted_iota(jnp.int32, (Lq, Lk), 0)
        col = jax.lax.broadcasted_iota(jnp.int32, (Lq, Lk), 1)
        causal_mask = col > row             # strictly-upper-triangular masked

    acc = jnp.zeros((Lq, D), jnp.float32)
    for h in range(H):
        qh = qb[:, h * Dh:(h + 1) * Dh]                 # (Lq, Dh)
        kh = kvb[:, h * Dh:(h + 1) * Dh]                # (Lk, Dh)
        vh = kvb[:, D + h * Dh:D + (h + 1) * Dh]        # (Lk, Dh)
        s = jax.lax.dot_general(qh, kh, (((1,), (1,)), ((), ())),
                                preferred_element_type=jnp.float32)
        if causal:
            # large finite negative (not -inf) avoids inf-inf NaN hazards
            s = jnp.where(causal_mask, jnp.float32(-1e30), s)
        s = s - jnp.max(s, axis=-1, keepdims=True)
        p = jnp.exp(s)
        p = p * pl.reciprocal(jnp.sum(p, axis=-1, keepdims=True), approx=True)
        oh = jnp.dot(p.astype(DTYPE_MM), vh, preferred_element_type=jnp.float32)
        # fold head-concat into the output projection (sublane slice of Wo)
        acc = acc + jnp.dot(oh.astype(DTYPE_MM), wo[h * Dh:(h + 1) * Dh, :],
                            preferred_element_type=jnp.float32)
    return acc


# ----------------------------- Pallas kernels -----------------------------

def _emb_pe_kernel(x_ref, w_ref, b_ref, pe_ref, o_ref):
    # value embedding (Linear, bf16 operands) + positional encoding add
    x = x_ref[0].astype(DTYPE_MM)                               # (L, Cin)
    o_ref[0] = (jnp.dot(x, w_ref[...], preferred_element_type=jnp.float32)
                + b_ref[...] + pe_ref[...])


def embed(x, w, b, pe):
    """x: (B, L, Cin), w: (Cin, D) bf16, b: (1, D), pe: (L, D) -> (B, L, D) f32."""
    B, L, Cin = x.shape
    D = w.shape[1]
    return pl.pallas_call(
        _emb_pe_kernel,
        out_shape=jax.ShapeDtypeStruct((B, L, D), jnp.float32),
        grid=(B,),
        in_specs=[
            pl.BlockSpec((1, L, Cin), lambda i: (i, 0, 0)),
            pl.BlockSpec((Cin, D), lambda i: (0, 0)),
            pl.BlockSpec((1, D), lambda i: (0, 0)),
            pl.BlockSpec((L, D), lambda i: (0, 0)),    # pe broadcast across batch
        ],
        out_specs=pl.BlockSpec((1, L, D), lambda i: (i, 0, 0)),
        compiler_params=pltpu.CompilerParams(
            dimension_semantics=("parallel",)),
    )(x, w, b, pe)


def _ln_kernel(x_ref, g_ref, bt_ref, o_ref):
    o_ref[0] = _ln(x_ref[0], g_ref[...], bt_ref[...])


def layernorm(x, gamma, beta):
    B, L, D = x.shape
    return pl.pallas_call(
        _ln_kernel,
        out_shape=jax.ShapeDtypeStruct((B, L, D), jnp.float32),
        grid=(B,),
        in_specs=[
            pl.BlockSpec((1, L, D), lambda i: (i, 0, 0)),
            pl.BlockSpec((1, D), lambda i: (0, 0)),
            pl.BlockSpec((1, D), lambda i: (0, 0)),
        ],
        out_specs=pl.BlockSpec((1, L, D), lambda i: (i, 0, 0)),
        compiler_params=pltpu.CompilerParams(
            dimension_semantics=("parallel",)),
    )(x, gamma, beta)


def _ln_proj_kernel(x_ref, g_ref, bt_ref, w_ref, b_ref, o_ref):
    # final decoder LayerNorm + output projection, fused
    n = _ln(x_ref[0], g_ref[...], bt_ref[...])
    o_ref[0] = (jnp.dot(n.astype(DTYPE_MM), w_ref[...],
                        preferred_element_type=jnp.float32) + b_ref[...])


def layernorm_project(x, gamma, beta, w, b):
    B, L, D = x.shape
    Dout = w.shape[1]
    return pl.pallas_call(
        _ln_proj_kernel,
        out_shape=jax.ShapeDtypeStruct((B, L, Dout), jnp.float32),
        grid=(B,),
        in_specs=[
            pl.BlockSpec((1, L, D), lambda i: (i, 0, 0)),
            pl.BlockSpec((1, D), lambda i: (0, 0)),
            pl.BlockSpec((1, D), lambda i: (0, 0)),
            pl.BlockSpec((D, Dout), lambda i: (0, 0)),
            pl.BlockSpec((1, Dout), lambda i: (0, 0)),
        ],
        out_specs=pl.BlockSpec((1, L, Dout), lambda i: (i, 0, 0)),
        compiler_params=pltpu.CompilerParams(
            dimension_semantics=("parallel",)),
    )(x, gamma, beta, w, b)


def _make_encoder_layer_kernel(H, Dh, scale):
    """Fully fused EncoderLayer for one batch element:
    fused QKV matmul -> 8-head attention -> out-proj -> +res -> LN1
    -> conv1(1x1) -> relu -> conv2(1x1) -> +res -> LN2."""
    D = H * Dh

    def kernel(x_ref, wqkv_ref, bqkv_ref, wo_ref, bo_ref, g1_ref, b1_ref,
               w1_ref, bf1_ref, w2_ref, bf2_ref, g2_ref, b2_ref, o_ref):
        x = x_ref[0]                                            # (L, D) f32
        qkv = (jnp.dot(x.astype(DTYPE_MM), wqkv_ref[...],
                       preferred_element_type=jnp.float32) + bqkv_ref[...])
        attn = _mha_heads(qkv[:, :D], qkv[:, D:], wo_ref[...],
                          H, Dh, scale, causal=False)
        z = _ln(x + attn + bo_ref[...], g1_ref[...], b1_ref[...])
        # FFN (1x1 convs == row-wise Linear layers)
        h1 = (jnp.dot(z.astype(DTYPE_MM), w1_ref[...],
                      preferred_element_type=jnp.float32) + bf1_ref[...])
        h1 = jnp.maximum(h1, 0.0)
        y = (jnp.dot(h1.astype(DTYPE_MM), w2_ref[...],
                     preferred_element_type=jnp.float32) + bf2_ref[...])
        o_ref[0] = _ln(z + y, g2_ref[...], b2_ref[...])

    return kernel


def encoder_layer(x, p, n_heads):
    B, L, D = x.shape
    Dh = D // n_heads
    scale = 1.0 / math.sqrt(Dh)
    a = p["attn"]
    d_ff = p["w1"].shape[1]
    rep = lambda i: (0, 0)

    # TODO(synk): for v7x, add an Lq-tile grid axis (grid=(B, L//tq)) to keep both
    # TensorCores busy when B is small; not needed at these toy shapes.
    return pl.pallas_call(
        _make_encoder_layer_kernel(n_heads, Dh, scale),
        out_shape=jax.ShapeDtypeStruct((B, L, D), jnp.float32),
        grid=(B,),
        in_specs=[
            pl.BlockSpec((1, L, D), lambda i: (i, 0, 0)),
            pl.BlockSpec((D, 3 * D), rep), pl.BlockSpec((1, 3 * D), rep),
            pl.BlockSpec((D, D), rep), pl.BlockSpec((1, D), rep),
            pl.BlockSpec((1, D), rep), pl.BlockSpec((1, D), rep),
            pl.BlockSpec((D, d_ff), rep), pl.BlockSpec((1, d_ff), rep),
            pl.BlockSpec((d_ff, D), rep), pl.BlockSpec((1, D), rep),
            pl.BlockSpec((1, D), rep), pl.BlockSpec((1, D), rep),
        ],
        out_specs=pl.BlockSpec((1, L, D), lambda i: (i, 0, 0)),
        compiler_params=pltpu.CompilerParams(
            dimension_semantics=("parallel",),
            vmem_limit_bytes=VMEM_LIMIT),
    )(x, a["wqkv"], a["bqkv"], a["wo"], a["bo"], p["ln1_g"], p["ln1_b"],
      p["w1"], p["b1"], p["w2"], p["b2"], p["ln2_g"], p["ln2_b"])


def _make_decoder_layer_kernel(H, Dh, scale):
    """Fully fused DecoderLayer for one batch element:
    causal self-attn (+res+LN1) -> cross-attn with encoder output (+res+LN2)
    -> FFN (+res+LN3)."""
    D = H * Dh

    def kernel(x_ref, enc_ref,
               s_wqkv_ref, s_bqkv_ref, s_wo_ref, s_bo_ref, g1_ref, b1_ref,
               c_wq_ref, c_bq_ref, c_wkv_ref, c_bkv_ref, c_wo_ref, c_bo_ref,
               g2_ref, b2_ref,
               w1_ref, bf1_ref, w2_ref, bf2_ref, g3_ref, b3_ref, o_ref):
        x = x_ref[0]                                            # (Ld, D) f32
        enc = enc_ref[0]                                        # (Le, D) f32

        # --- causal self-attention + residual + LN1 ---
        qkv = (jnp.dot(x.astype(DTYPE_MM), s_wqkv_ref[...],
                       preferred_element_type=jnp.float32) + s_bqkv_ref[...])
        attn = _mha_heads(qkv[:, :D], qkv[:, D:], s_wo_ref[...],
                          H, Dh, scale, causal=True)
        z = _ln(x + attn + s_bo_ref[...], g1_ref[...], b1_ref[...])

        # --- cross-attention (enc output as K/V) + residual + LN2 ---
        q = (jnp.dot(z.astype(DTYPE_MM), c_wq_ref[...],
                     preferred_element_type=jnp.float32) + c_bq_ref[...])
        kv = (jnp.dot(enc.astype(DTYPE_MM), c_wkv_ref[...],
                      preferred_element_type=jnp.float32) + c_bkv_ref[...])
        attn2 = _mha_heads(q, kv, c_wo_ref[...], H, Dh, scale, causal=False)
        z2 = _ln(z + attn2 + c_bo_ref[...], g2_ref[...], b2_ref[...])

        # --- FFN + residual + LN3 ---
        h1 = (jnp.dot(z2.astype(DTYPE_MM), w1_ref[...],
                      preferred_element_type=jnp.float32) + bf1_ref[...])
        h1 = jnp.maximum(h1, 0.0)
        y = (jnp.dot(h1.astype(DTYPE_MM), w2_ref[...],
                     preferred_element_type=jnp.float32) + bf2_ref[...])
        o_ref[0] = _ln(z2 + y, g3_ref[...], b3_ref[...])

    return kernel


def decoder_layer(x, enc, p, n_heads):
    B, Ld, D = x.shape
    Le = enc.shape[1]
    Dh = D // n_heads
    scale = 1.0 / math.sqrt(Dh)
    sa, ca = p["self_attn"], p["cross_attn"]
    d_ff = p["w1"].shape[1]
    rep = lambda i: (0, 0)

    return pl.pallas_call(
        _make_decoder_layer_kernel(n_heads, Dh, scale),
        out_shape=jax.ShapeDtypeStruct((B, Ld, D), jnp.float32),
        grid=(B,),
        in_specs=[
            pl.BlockSpec((1, Ld, D), lambda i: (i, 0, 0)),
            pl.BlockSpec((1, Le, D), lambda i: (i, 0, 0)),
            pl.BlockSpec((D, 3 * D), rep), pl.BlockSpec((1, 3 * D), rep),
            pl.BlockSpec((D, D), rep), pl.BlockSpec((1, D), rep),
            pl.BlockSpec((1, D), rep), pl.BlockSpec((1, D), rep),
            pl.BlockSpec((D, D), rep), pl.BlockSpec((1, D), rep),
            pl.BlockSpec((D, 2 * D), rep), pl.BlockSpec((1, 2 * D), rep),
            pl.BlockSpec((D, D), rep), pl.BlockSpec((1, D), rep),
            pl.BlockSpec((1, D), rep), pl.BlockSpec((1, D), rep),
            pl.BlockSpec((D, d_ff), rep), pl.BlockSpec((1, d_ff), rep),
            pl.BlockSpec((d_ff, D), rep), pl.BlockSpec((1, D), rep),
            pl.BlockSpec((1, D), rep), pl.BlockSpec((1, D), rep),
        ],
        out_specs=pl.BlockSpec((1, Ld, D), lambda i: (i, 0, 0)),
        compiler_params=pltpu.CompilerParams(
            dimension_semantics=("parallel",),
            vmem_limit_bytes=VMEM_LIMIT),
    )(x, enc,
      sa["wqkv"], sa["bqkv"], sa["wo"], sa["bo"], p["ln1_g"], p["ln1_b"],
      ca["wq"], ca["bq"], ca["wkv"], ca["bkv"], ca["wo"], ca["bo"],
      p["ln2_g"], p["ln2_b"],
      p["w1"], p["b1"], p["w2"], p["b2"], p["ln3_g"], p["ln3_b"])


# ----------------------------- model glue (plain JAX) -----------------------------

def positional_encoding(L, d_model):
    pos = jnp.arange(L, dtype=jnp.float32)[:, None]
    div = jnp.exp(jnp.arange(0, d_model, 2, dtype=jnp.float32)
                  * (-math.log(10000.0) / d_model))
    pe = jnp.zeros((L, d_model), jnp.float32)
    pe = pe.at[:, 0::2].set(jnp.sin(pos * div))
    pe = pe.at[:, 1::2].set(jnp.cos(pos * div))
    return pe


def informer_forward(params, x_enc, x_dec, n_heads=8):
    B, Le, _ = x_enc.shape
    Ld = x_dec.shape[1]
    D = params["enc_emb_w"].shape[1]

    # ---- encoder ----
    enc = embed(x_enc, params["enc_emb_w"], params["enc_emb_b"],
                positional_encoding(Le, D))
    for lp in params["enc_layers"]:
        enc = encoder_layer(enc, lp, n_heads)
    enc = layernorm(enc, params["enc_norm_g"], params["enc_norm_b"])

    # ---- decoder ----
    dec = embed(x_dec, params["dec_emb_w"], params["dec_emb_b"],
                positional_encoding(Ld, D))
    for lp in params["dec_layers"]:
        dec = decoder_layer(dec, enc, lp, n_heads)

    return layernorm_project(dec, params["dec_norm_g"], params["dec_norm_b"],
                             params["proj_w"], params["proj_b"])


# ----------------------------- deterministic parameter init -----------------------------

def _init_linear(key, din, dout, scale=0.05):
    kw, kb = jax.random.split(key)
    w = scale * jax.random.normal(kw, (din, dout), jnp.float32)
    b = scale * jax.random.normal(kb, (dout,), jnp.float32)
    return w, b


def _init_self_attn(key, d_model):
    # Q, K, V fused into one (D, 3D) matmul; weights stored bf16, biases f32.
    ks = jax.random.split(key, 4)
    wq, bq = _init_linear(ks[0], d_model, d_model)
    wk, bk = _init_linear(ks[1], d_model, d_model)
    wv, bv = _init_linear(ks[2], d_model, d_model)
    wo, bo = _init_linear(ks[3], d_model, d_model)
    return dict(wqkv=jnp.concatenate([wq, wk, wv], axis=1).astype(DTYPE_MM),
                bqkv=jnp.concatenate([bq, bk, bv]).reshape(1, -1),
                wo=wo.astype(DTYPE_MM), bo=bo.reshape(1, -1))


def _init_cross_attn(key, d_model):
    # Q separate (queries come from the decoder stream); K|V fused (from encoder).
    ks = jax.random.split(key, 4)
    wq, bq = _init_linear(ks[0], d_model, d_model)
    wk, bk = _init_linear(ks[1], d_model, d_model)
    wv, bv = _init_linear(ks[2], d_model, d_model)
    wo, bo = _init_linear(ks[3], d_model, d_model)
    return dict(wq=wq.astype(DTYPE_MM), bq=bq.reshape(1, -1),
                wkv=jnp.concatenate([wk, wv], axis=1).astype(DTYPE_MM),
                bkv=jnp.concatenate([bk, bv]).reshape(1, -1),
                wo=wo.astype(DTYPE_MM), bo=bo.reshape(1, -1))


def _init_enc_layer(key, d_model, d_ff):
    ks = jax.random.split(key, 3)
    p = dict(attn=_init_self_attn(ks[0], d_model))
    w1, b1 = _init_linear(ks[1], d_model, d_ff)
    w2, b2 = _init_linear(ks[2], d_ff, d_model)
    p["w1"], p["b1"] = w1.astype(DTYPE_MM), b1.reshape(1, -1)
    p["w2"], p["b2"] = w2.astype(DTYPE_MM), b2.reshape(1, -1)
    for i in (1, 2):
        p[f"ln{i}_g"] = jnp.ones((1, d_model), jnp.float32)
        p[f"ln{i}_b"] = jnp.zeros((1, d_model), jnp.float32)
    return p


def _init_dec_layer(key, d_model, d_ff):
    ks = jax.random.split(key, 4)
    p = dict(self_attn=_init_self_attn(ks[0], d_model),
             cross_attn=_init_cross_attn(ks[1], d_model))
    w1, b1 = _init_linear(ks[2], d_model, d_ff)
    w2, b2 = _init_linear(ks[3], d_ff, d_model)
    p["w1"], p["b1"] = w1.astype(DTYPE_MM), b1.reshape(1, -1)
    p["w2"], p["b2"] = w2.astype(DTYPE_MM), b2.reshape(1, -1)
    for i in (1, 2, 3):
        p[f"ln{i}_g"] = jnp.ones((1, d_model), jnp.float32)
        p[f"ln{i}_b"] = jnp.zeros((1, d_model), jnp.float32)
    return p


def init_informer(key, enc_in, dec_in, c_out, d_model, d_ff, e_layers, d_layers):
    keys = jax.random.split(key, 3 + e_layers + d_layers)
    params = {}
    w, b = _init_linear(keys[0], enc_in, d_model)
    params["enc_emb_w"], params["enc_emb_b"] = w.astype(DTYPE_MM), b.reshape(1, -1)
    w, b = _init_linear(keys[1], dec_in, d_model)
    params["dec_emb_w"], params["dec_emb_b"] = w.astype(DTYPE_MM), b.reshape(1, -1)
    w, b = _init_linear(keys[2], d_model, c_out)
    params["proj_w"], params["proj_b"] = w.astype(DTYPE_MM), b.reshape(1, -1)
    params["enc_layers"] = [_init_enc_layer(keys[3 + i], d_model, d_ff)
                            for i in range(e_layers)]
    params["dec_layers"] = [_init_dec_layer(keys[3 + e_layers + i], d_model, d_ff)
                            for i in range(d_layers)]
    params["enc_norm_g"] = jnp.ones((1, d_model), jnp.float32)
    params["enc_norm_b"] = jnp.zeros((1, d_model), jnp.float32)
    params["dec_norm_g"] = jnp.ones((1, d_model), jnp.float32)
    params["dec_norm_b"] = jnp.zeros((1, d_model), jnp.float32)
    return params


# ----------------------------- main -----------------------------

if __name__ == "__main__":
    # Small config consistent with Informer.__init__ (d_model divisible by n_heads=8).
    enc_in, dec_in, c_out = 4, 4, 1
    seq_len, label_len, out_len = 16, 8, 4
    d_model, d_ff, n_heads = 64, 128, 8
    e_layers, d_layers = 2, 1

    key = jax.random.PRNGKey(0)
    k_par, k_enc, k_dec = jax.random.split(key, 3)

    params = init_informer(k_par, enc_in, dec_in, c_out, d_model, d_ff,
                           e_layers, d_layers)

    B = 2
    x_enc = jax.random.normal(k_enc, (B, seq_len, enc_in), jnp.float32)
    x_dec = jax.random.normal(k_dec, (B, label_len + out_len, dec_in), jnp.float32)

    fwd = jax.jit(partial(informer_forward, n_heads=n_heads))
    out = fwd(params, x_enc, x_dec)
    out = jax.block_until_ready(out)
    assert out.shape == (B, label_len + out_len, c_out), out.shape
    assert bool(jnp.all(jnp.isfinite(out)))
    print("KERNEL_OK")
</pallas_src>

<mosaic_0001>
module attributes {stable_mosaic.version = 11 : i64} {
  func.func @_emb_pe_kernel(%arg0: i32, %arg1: memref<1x16x4xf32, #tpu.memory_space<vmem>>, %arg2: memref<4x64xbf16, #tpu.memory_space<vmem>>, %arg3: memref<1x64xf32, #tpu.memory_space<vmem>>, %arg4: memref<16x64xf32, #tpu.memory_space<vmem>>, %arg5: memref<1x16x64xf32, #tpu.memory_space<vmem>>) attributes {dimension_semantics = [#tpu.dimension_semantics<parallel>], iteration_bounds = array<i64: 2>, scalar_prefetch = 0 : i64, scratch_operands = 0 : i64, tpu.core_type = #tpu.core_type<tc>, window_params = [{transform_indices = @transform_0, window_bounds = array<i64: 1, 16, 4>}, {pipeline_mode = #tpu.pipeline_mode<synchronous>, transform_indices = @transform_1, window_bounds = array<i64: 4, 64>}, {pipeline_mode = #tpu.pipeline_mode<synchronous>, transform_indices = @transform_2, window_bounds = array<i64: 1, 64>}, {pipeline_mode = #tpu.pipeline_mode<synchronous>, transform_indices = @transform_3, window_bounds = array<i64: 16, 64>}, {transform_indices = @transform_4, window_bounds = array<i64: 1, 16, 64>}]} {
    %c0 = arith.constant 0 : index
    %c0_0 = arith.constant 0 : index
    %c0_1 = arith.constant 0 : index
    %0 = vector.load %arg1[%c0, %c0_0, %c0_1] : memref<1x16x4xf32, #tpu.memory_space<vmem>>, vector<1x16x4xf32>
    %1 = vector.shape_cast %0 : vector<1x16x4xf32> to vector<16x4xf32>
    %2 = arith.truncf %1 : vector<16x4xf32> to vector<16x4xbf16>
    %c0_2 = arith.constant 0 : index
    %c0_3 = arith.constant 0 : index
    %3 = vector.load %arg2[%c0_2, %c0_3] : memref<4x64xbf16, #tpu.memory_space<vmem>>, vector<4x64xbf16>
    %cst = arith.constant dense<0.000000e+00> : vector<16x64xf32>
    %4 = tpu.matmul %2, %3, %cst {dimension_numbers = #tpu.dot_dimension_numbers<[1], [0], [0], [1], [0, 0, 1, 1], [], []>} : vector<16x4xbf16>, vector<4x64xbf16>, vector<16x64xf32> -> vector<16x64xf32>
    %c0_4 = arith.constant 0 : index
    %c0_5 = arith.constant 0 : index
    %5 = vector.load %arg3[%c0_4, %c0_5] : memref<1x64xf32, #tpu.memory_space<vmem>>, vector<1x64xf32>
    %6 = vector.broadcast %5 : vector<1x64xf32> to vector<16x64xf32>
    %7 = arith.addf %4, %6 : vector<16x64xf32>
    %c0_6 = arith.constant 0 : index
    %c0_7 = arith.constant 0 : index
    %8 = vector.load %arg4[%c0_6, %c0_7] : memref<16x64xf32, #tpu.memory_space<vmem>>, vector<16x64xf32>
    %9 = arith.addf %7, %8 : vector<16x64xf32>
    %c0_8 = arith.constant 0 : index
    %c0_9 = arith.constant 0 : index
    %c0_10 = arith.constant 0 : index
    %10 = vector.load %arg5[%c0_8, %c0_9, %c0_10] : memref<1x16x64xf32, #tpu.memory_space<vmem>>, vector<1x16x64xf32>
    %11 = vector.shape_cast %10 : vector<1x16x64xf32> to vector<16x64xf32>
    %12 = vector.shape_cast %9 : vector<16x64xf32> to vector<1x16x64xf32>
    tpu.vector_store %arg5[%c0_8, %c0_9, %c0_10], %12 {strides = array<i32>} : memref<1x16x64xf32, #tpu.memory_space<vmem>>, vector<1x16x64xf32>,
    return
  }
  func.func @transform_0(%arg0: i32) -> (i32, i32, i32) {
    %c0_i32 = arith.constant 0 : i32
    %c0_i32_0 = arith.constant 0 : i32
    %c0_i32_1 = arith.constant 0 : i32
    return %arg0, %c0_i32, %c0_i32_0 : i32, i32, i32
  }
  func.func @transform_1(%arg0: i32) -> (i32, i32) {
    %c0_i32 = arith.constant 0 : i32
    %c0_i32_0 = arith.constant 0 : i32
    %c0_i32_1 = arith.constant 0 : i32
    return %c0_i32, %c0_i32_0 : i32, i32
  }
  func.func @transform_2(%arg0: i32) -> (i32, i32) {
    %c0_i32 = arith.constant 0 : i32
    %c0_i32_0 = arith.constant 0 : i32
    %c0_i32_1 = arith.constant 0 : i32
    return %c0_i32, %c0_i32_0 : i32, i32
  }
  func.func @transform_3(%arg0: i32) -> (i32, i32) {
    %c0_i32 = arith.constant 0 : i32
    %c0_i32_0 = arith.constant 0 : i32
    %c0_i32_1 = arith.constant 0 : i32
    return %c0_i32, %c0_i32_0 : i32, i32
  }
  func.func @transform_4(%arg0: i32) -> (i32, i32, i32) {
    %c0_i32 = arith.constant 0 : i32
    %c0_i32_0 = arith.constant 0 : i32
    %c0_i32_1 = arith.constant 0 : i32
    return %arg0, %c0_i32, %c0_i32_0 : i32, i32, i32
  }
}

module attributes {stable_mosaic.version = 11 : i64} {
  func.func @_ln_kernel(%arg0: i32, %arg1: memref<1x16x64xf32, #tpu.memory_space<vmem>>, %arg2: memref<1x64xf32, #tpu.memory_space<vmem>>, %arg3: memref<1x64xf32, #tpu.memory_space<vmem>>, %arg4: memref<1x16x64xf32, #tpu.memory_space<vmem>>) attributes {dimension_semantics = [#tpu.dimension_semantics<parallel>], iteration_bounds = array<i64: 2>, scalar_prefetch = 0 : i64, scratch_operands = 0 : i64, tpu.core_type = #tpu.core_type<tc>, window_params = [{transform_indices = @transform_0, window_bounds = array<i64: 1, 16, 64>}, {pipeline_mode = #tpu.pipeline_mode<synchronous>, transform_indices = @transform_1, window_bounds = array<i64: 1, 64>}, {pipeline_mode = #tpu.pipeline_mode<synchronous>, transform_indices = @transform_2, window_bounds = array<i64: 1, 64>}, {transform_indices = @transform_3, window_bounds = array<i64: 1, 16, 64>}]} {
    %c0 = arith.constant 0 : index
    %c0_0 = arith.constant 0 : index
    %c0_1 = arith.constant 0 : index
    %0 = vector.load %arg1[%c0, %c0_0, %c0_1] : memref<1x16x64xf32, #tpu.memory_space<vmem>>, vector<1x16x64xf32>
    %1 = vector.shape_cast %0 : vector<1x16x64xf32> to vector<16x64xf32>
    %c0_2 = arith.constant 0 : index
    %c0_3 = arith.constant 0 : index
    %2 = vector.load %arg2[%c0_2, %c0_3] : memref<1x64xf32, #tpu.memory_space<vmem>>, vector<1x64xf32>
    %c0_4 = arith.constant 0 : index
    %c0_5 = arith.constant 0 : index
    %3 = vector.load %arg3[%c0_4, %c0_5] : memref<1x64xf32, #tpu.memory_space<vmem>>, vector<1x64xf32>
    %cst = arith.constant dense<0.000000e+00> : vector<16xf32>
    %4 = vector.multi_reduction <add>, %1, %cst [1] : vector<16x64xf32> to vector<16xf32>
    %5 = vector.shape_cast %4 : vector<16xf32> to vector<16x1xf32>
    %cst_6 = arith.constant 6.400000e+01 : f32
    %6 = vector.broadcast %cst_6 : f32 to vector<16x1xf32>
    %7 = arith.divf %5, %6 : vector<16x1xf32>
    %8 = vector.broadcast %7 : vector<16x1xf32> to vector<16x64xf32>
    %9 = arith.subf %1, %8 : vector<16x64xf32>
    %10 = arith.mulf %9, %9 : vector<16x64xf32>
    %cst_7 = arith.constant dense<0.000000e+00> : vector<16xf32>
    %11 = vector.multi_reduction <add>, %10, %cst_7 [1] : vector<16x64xf32> to vector<16xf32>
    %12 = vector.shape_cast %11 : vector<16xf32> to vector<16x1xf32>
    %cst_8 = arith.constant 6.400000e+01 : f32
    %13 = vector.broadcast %cst_8 : f32 to vector<16x1xf32>
    %14 = arith.divf %12, %13 : vector<16x1xf32>
    %15 = vector.broadcast %7 : vector<16x1xf32> to vector<16x64xf32>
    %16 = arith.subf %1, %15 : vector<16x64xf32>
    %cst_9 = arith.constant 9.99999974E-6 : f32
    %17 = vector.broadcast %cst_9 : f32 to vector<16x1xf32>
    %18 = arith.addf %14, %17 : vector<16x1xf32>
    %19 = math.rsqrt %18 : vector<16x1xf32>
    %20 = vector.broadcast %19 : vector<16x1xf32> to vector<16x64xf32>
    %21 = arith.mulf %16, %20 : vector<16x64xf32>
    %22 = vector.broadcast %2 : vector<1x64xf32> to vector<16x64xf32>
    %23 = arith.mulf %21, %22 : vector<16x64xf32>
    %24 = vector.broadcast %3 : vector<1x64xf32> to vector<16x64xf32>
    %25 = arith.addf %23, %24 : vector<16x64xf32>
    %c0_10 = arith.constant 0 : index
    %c0_11 = arith.constant 0 : index
    %c0_12 = arith.constant 0 : index
    %26 = vector.load %arg4[%c0_10, %c0_11, %c0_12] : memref<1x16x64xf32, #tpu.memory_space<vmem>>, vector<1x16x64xf32>
    %27 = vector.shape_cast %26 : vector<1x16x64xf32> to vector<16x64xf32>
    %28 = vector.shape_cast %25 : vector<16x64xf32> to vector<1x16x64xf32>
    tpu.vector_store %arg4[%c0_10, %c0_11, %c0_12], %28 {strides = array<i32>} : memref<1x16x64xf32, #tpu.memory_space<vmem>>, vector<1x16x64xf32>,
    return
  }
  func.func @transform_0(%arg0: i32) -> (i32, i32, i32) {
    %c0_i32 = arith.constant 0 : i32
    %c0_i32_0 = arith.constant 0 : i32
    %c0_i32_1 = arith.constant 0 : i32
    return %arg0, %c0_i32, %c0_i32_0 : i32, i32, i32
  }
  func.func @transform_1(%arg0: i32) -> (i32, i32) {
    %c0_i32 = arith.constant 0 : i32
    %c0_i32_0 = arith.constant 0 : i32
    %c0_i32_1 = arith.constant 0 : i32
    return %c0_i32, %c0_i32_0 : i32, i32
  }
  func.func @transform_2(%arg0: i32) -> (i32, i32) {
    %c0_i32 = arith.constant 0 : i32
    %c0_i32_0 = arith.constant 0 : i32
    %c0_i32_1 = arith.constant 0 : i32
    return %c0_i32, %c0_i32_0 : i32, i32
  }
  func.func @transform_3(%arg0: i32) -> (i32, i32, i32) {
    %c0_i32 = arith.constant 0 : i32
    %c0_i32_0 = arith.constant 0 : i32
    %c0_i32_1 = arith.constant 0 : i32
    return %arg0, %c0_i32, %c0_i32_0 : i32, i32, i32
  }
}

module attributes {stable_mosaic.version = 11 : i64} {
  func.func @kernel(%arg0: i32, %arg1: memref<1x16x64xf32, #tpu.memory_space<vmem>>, %arg2: memref<64x192xbf16, #tpu.memory_space<vmem>>, %arg3: memref<1x192xf32, #tpu.memory_space<vmem>>, %arg4: memref<64x64xbf16, #tpu.memory_space<vmem>>, %arg5: memref<1x64xf32, #tpu.memory_space<vmem>>, %arg6: memref<1x64xf32, #tpu.memory_space<vmem>>, %arg7: memref<1x64xf32, #tpu.memory_space<vmem>>, %arg8: memref<64x128xbf16, #tpu.memory_space<vmem>>, %arg9: memref<1x128xf32, #tpu.memory_space<vmem>>, %arg10: memref<128x64xbf16, #tpu.memory_space<vmem>>, %arg11: memref<1x64xf32, #tpu.memory_space<vmem>>, %arg12: memref<1x64xf32, #tpu.memory_space<vmem>>, %arg13: memref<1x64xf32, #tpu.memory_space<vmem>>, %arg14: memref<1x16x64xf32, #tpu.memory_space<vmem>>) attributes {dimension_semantics = [#tpu.dimension_semantics<parallel>], iteration_bounds = array<i64: 2>, scalar_prefetch = 0 : i64, scratch_operands = 0 : i64, tpu.core_type = #tpu.core_type<tc>, window_params = [{transform_indices = @transform_0, window_bounds = array<i64: 1, 16, 64>}, {pipeline_mode = #tpu.pipeline_mode<synchronous>, transform_indices = @transform_1, window_bounds = array<i64: 64, 192>}, {pipeline_mode = #tpu.pipeline_mode<synchronous>, transform_indices = @transform_2, window_bounds = array<i64: 1, 192>}, {pipeline_mode = #tpu.pipeline_mode<synchronous>, transform_indices = @transform_3, window_bounds = array<i64: 64, 64>}, {pipeline_mode = #tpu.pipeline_mode<synchronous>, transform_indices = @transform_4, window_bounds = array<i64: 1, 64>}, {pipeline_mode = #tpu.pipeline_mode<synchronous>, transform_indices = @transform_5, window_bounds = array<i64: 1, 64>}, {pipeline_mode = #tpu.pipeline_mode<synchronous>, transform_indices = @transform_6, window_bounds = array<i64: 1, 64>}, {pipeline_mode = #tpu.pipeline_mode<synchronous>, transform_indices = @transform_7, window_bounds = array<i64: 64, 128>}, {pipeline_mode = #tpu.pipeline_mode<synchronous>, transform_indices = @transform_8, window_bounds = array<i64: 1, 128>}, {pipeline_mode = #tpu.pipeline_mode<synchronous>, transform_indices = @transform_9, window_bounds = array<i64: 128, 64>}, {pipeline_mode = #tpu.pipeline_mode<synchronous>, transform_indices = @transform_10, window_bounds = array<i64: 1, 64>}, {pipeline_mode = #tpu.pipeline_mode<synchronous>, transform_indices = @transform_11, window_bounds = array<i64: 1, 64>}, {pipeline_mode = #tpu.pipeline_mode<synchronous>, transform_indices = @transform_12, window_bounds = array<i64: 1, 64>}, {transform_indices = @transform_13, window_bounds = array<i64: 1, 16, 64>}]} {
    %c0 = arith.constant 0 : index
    %c0_0 = arith.constant 0 : index
    %c0_1 = arith.constant 0 : index
    %0 = vector.load %arg1[%c0, %c0_0, %c0_1] : memref<1x16x64xf32, #tpu.memory_space<vmem>>, vector<1x16x64xf32>
    %1 = vector.shape_cast %0 : vector<1x16x64xf32> to vector<16x64xf32>
    %2 = arith.truncf %1 : vector<16x64xf32> to vector<16x64xbf16>
    %c0_2 = arith.constant 0 : index
    %c0_3 = arith.constant 0 : index
    %3 = vector.load %arg2[%c0_2, %c0_3] : memref<64x192xbf16, #tpu.memory_space<vmem>>, vector<64x192xbf16>
    %cst = arith.constant dense<0.000000e+00> : vector<16x192xf32>
    %4 = tpu.matmul %2, %3, %cst {dimension_numbers = #tpu.dot_dimension_numbers<[1], [0], [0], [1], [0, 0, 1, 1], [], []>} : vector<16x64xbf16>, vector<64x192xbf16>, vector<16x192xf32> -> vector<16x192xf32>
    %c0_4 = arith.constant 0 : index
    %c0_5 = arith.constant 0 : index
    %5 = vector.load %arg3[%c0_4, %c0_5] : memref<1x192xf32, #tpu.memory_space<vmem>>, vector<1x192xf32>
    %6 = vector.broadcast %5 : vector<1x192xf32> to vector<16x192xf32>
    %7 = arith.addf %4, %6 : vector<16x192xf32>
    %8 = vector.extract_strided_slice %7 {offsets = [0, 0], sizes = [16, 64], strides = [1, 1]} : vector<16x192xf32> to vector<16x64xf32>
    %9 = vector.extract_strided_slice %7 {offsets = [0, 64], sizes = [16, 128], strides = [1, 1]} : vector<16x192xf32> to vector<16x128xf32>
    %c0_6 = arith.constant 0 : index
    %c0_7 = arith.constant 0 : index
    %10 = vector.load %arg4[%c0_6, %c0_7] : memref<64x64xbf16, #tpu.memory_space<vmem>>, vector<64x64xbf16>
    %cst_8 = arith.constant 0.353553385 : f32
    %11 = vector.broadcast %cst_8 : f32 to vector<16x64xf32>
    %12 = arith.mulf %8, %11 : vector<16x64xf32>
    %13 = arith.truncf %12 : vector<16x64xf32> to vector<16x64xbf16>
    %14 = arith.truncf %9 : vector<16x128xf32> to vector<16x128xbf16>
    %cst_9 = arith.constant 0.000000e+00 : f32
    %15 = vector.broadcast %cst_9 : f32 to vector<16x64xf32>
    %16 = vector.extract_strided_slice %13 {offsets = [0, 0], sizes = [16, 8], strides = [1, 1]} : vector<16x64xbf16> to vector<16x8xbf16>
    %17 = vector.extract_strided_slice %14 {offsets = [0, 0], sizes = [16, 8], strides = [1, 1]} : vector<16x128xbf16> to vector<16x8xbf16>
    %18 = vector.extract_strided_slice %14 {offsets = [0, 64], sizes = [16, 8], strides = [1, 1]} : vector<16x128xbf16> to vector<16x8xbf16>
    %cst_10 = arith.constant dense<0.000000e+00> : vector<16x16xf32>
    %19 = tpu.matmul %16, %17, %cst_10 {dimension_numbers = #tpu.dot_dimension_numbers<[1], [1], [0], [0], [0, 0, 1, 0], [], []>} : vector<16x8xbf16>, vector<16x8xbf16>, vector<16x16xf32> -> vector<16x16xf32>
    %cst_11 = arith.constant dense<0xFF800000> : vector<16xf32>
    %20 = vector.multi_reduction <maximumf>, %19, %cst_11 [1] : vector<16x16xf32> to vector<16xf32>
    %21 = vector.shape_cast %20 : vector<16xf32> to vector<16x1xf32>
    %22 = vector.broadcast %21 : vector<16x1xf32> to vector<16x16xf32>
    %23 = arith.subf %19, %22 : vector<16x16xf32>
    %24 = math.exp %23 : vector<16x16xf32>
    %cst_12 = arith.constant dense<0.000000e+00> : vector<16xf32>
    %25 = vector.multi_reduction <add>, %24, %cst_12 [1] : vector<16x16xf32> to vector<16xf32>
    %26 = vector.shape_cast %25 : vector<16xf32> to vector<16x1xf32>
    %27 = tpu.reciprocal %26 {approx = true} : vector<16x1xf32> -> vector<16x1xf32>
    %28 = vector.broadcast %27 : vector<16x1xf32> to vector<16x16xf32>
    %29 = arith.mulf %24, %28 : vector<16x16xf32>
    %30 = arith.truncf %29 : vector<16x16xf32> to vector<16x16xbf16>
    %cst_13 = arith.constant dense<0.000000e+00> : vector<16x8xf32>
    %31 = tpu.matmul %30, %18, %cst_13 {dimension_numbers = #tpu.dot_dimension_numbers<[1], [0], [0], [1], [0, 0, 1, 1], [], []>} : vector<16x16xbf16>, vector<16x8xbf16>, vector<16x8xf32> -> vector<16x8xf32>
    %32 = arith.truncf %31 : vector<16x8xf32> to vector<16x8xbf16>
    %33 = vector.extract_strided_slice %10 {offsets = [0, 0], sizes = [8, 64], strides = [1, 1]} : vector<64x64xbf16> to vector<8x64xbf16>
    %cst_14 = arith.constant dense<0.000000e+00> : vector<16x64xf32>
    %34 = tpu.matmul %32, %33, %cst_14 {dimension_numbers = #tpu.dot_dimension_numbers<[1], [0], [0], [1], [0, 0, 1, 1], [], []>} : vector<16x8xbf16>, vector<8x64xbf16>, vector<16x64xf32> -> vector<16x64xf32>
    %35 = arith.addf %15, %34 : vector<16x64xf32>
    %36 = vector.extract_strided_slice %13 {offsets = [0, 8], sizes = [16, 8], strides = [1, 1]} : vector<16x64xbf16> to vector<16x8xbf16>
    %37 = vector.extract_strided_slice %14 {offsets = [0, 8], sizes = [16, 8], strides = [1, 1]} : vector<16x128xbf16> to vector<16x8xbf16>
    %38 = vector.extract_strided_slice %14 {offsets = [0, 72], sizes = [16, 8], strides = [1, 1]} : vector<16x128xbf16> to vector<16x8xbf16>
    %cst_15 = arith.constant dense<0.000000e+00> : vector<16x16xf32>
    %39 = tpu.matmul %36, %37, %cst_15 {dimension_numbers = #tpu.dot_dimension_numbers<[1], [1], [0], [0], [0, 0, 1, 0], [], []>} : vector<16x8xbf16>, vector<16x8xbf16>, vector<16x16xf32> -> vector<16x16xf32>
    %cst_16 = arith.constant dense<0xFF800000> : vector<16xf32>
    %40 = vector.multi_reduction <maximumf>, %39, %cst_16 [1] : vector<16x16xf32> to vector<16xf32>
    %41 = vector.shape_cast %40 : vector<16xf32> to vector<16x1xf32>
    %42 = vector.broadcast %41 : vector<16x1xf32> to vector<16x16xf32>
    %43 = arith.subf %39, %42 : vector<16x16xf32>
    %44 = math.exp %43 : vector<16x16xf32>
    %cst_17 = arith.constant dense<0.000000e+00> : vector<16xf32>
    %45 = vector.multi_reduction <add>, %44, %cst_17 [1] : vector<16x16xf32> to vector<16xf32>
    %46 = vector.shape_cast %45 : vector<16xf32> to vector<16x1xf32>
    %47 = tpu.reciprocal %46 {approx = true} : vector<16x1xf32> -> vector<16x1xf32>
    %48 = vector.broadcast %47 : vector<16x1xf32> to vector<16x16xf32>
    %49 = arith.mulf %44, %48 : vector<16x16xf32>
    %50 = arith.truncf %49 : vector<16x16xf32> to vector<16x16xbf16>
    %cst_18 = arith.constant dense<0.000000e+00> : vector<16x8xf32>
    %51 = tpu.matmul %50, %38, %cst_18 {dimension_numbers = #tpu.dot_dimension_numbers<[1], [0], [0], [1], [0, 0, 1, 1], [], []>} : vector<16x16xbf16>, vector<16x8xbf16>, vector<16x8xf32> -> vector<16x8xf32>
    %52 = arith.truncf %51 : vector<16x8xf32> to vector<16x8xbf16>
    %53 = vector.extract_strided_slice %10 {offsets = [8, 0], sizes = [8, 64], strides = [1, 1]} : vector<64x64xbf16> to vector<8x64xbf16>
    %cst_19 = arith.constant dense<0.000000e+00> : vector<16x64xf32>
    %54 = tpu.matmul %52, %53, %cst_19 {dimension_numbers = #tpu.dot_dimension_numbers<[1], [0], [0], [1], [0, 0, 1, 1], [], []>} : vector<16x8xbf16>, vector<8x64xbf16>, vector<16x64xf32> -> vector<16x64xf32>
    %55 = arith.addf %35, %54 : vector<16x64xf32>
    %56 = vector.extract_strided_slice %13 {offsets = [0, 16], sizes = [16, 8], strides = [1, 1]} : vector<16x64xbf16> to vector<16x8xbf16>
    %57 = vector.extract_strided_slice %14 {offsets = [0, 16], sizes = [16, 8], strides = [1, 1]} : vector<16x128xbf16> to vector<16x8xbf16>
    %58 = vector.extract_strided_slice %14 {offsets = [0, 80], sizes = [16, 8], strides = [1, 1]} : vector<16x128xbf16> to vector<16x8xbf16>
    %cst_20 = arith.constant dense<0.000000e+00> : vector<16x16xf32>
    %59 = tpu.matmul %56, %57, %cst_20 {dimension_numbers = #tpu.dot_dimension_numbers<[1], [1], [0], [0], [0, 0, 1, 0], [], []>} : vector<16x8xbf16>, vector<16x8xbf16>, vector<16x16xf32> -> vector<16x16xf32>
    %cst_21 = arith.constant dense<0xFF800000> : vector<16xf32>
    %60 = vector.multi_reduction <maximumf>, %59, %cst_21 [1] : vector<16x16xf32> to vector<16xf32>
    %61 = vector.shape_cast %60 : vector<16xf32> to vector<16x1xf32>
    %62 = vector.broadcast %61 : vector<16x1xf32> to vector<16x16xf32>
    %63 = arith.subf %59, %62 : vector<16x16xf32>
    %64 = math.exp %63 : vector<16x16xf32>
    %cst_22 = arith.constant dense<0.000000e+00> : vector<16xf32>
    %65 = vector.multi_reduction <add>, %64, %cst_22 [1] : vector<16x16xf32> to vector<16xf32>
    %66 = vector.shape_cast %65 : vector<16xf32> to vector<16x1xf32>
    %67 = tpu.reciprocal %66 {approx = true} : vector<16x1xf32> -> vector<16x1xf32>
    %68 = vector.broadcast %67 : vector<16x1xf32> to vector<16x16xf32>
    %69 = arith.mulf %64, %68 : vector<16x16xf32>
    %70 = arith.truncf %69 : vector<16x16xf32> to vector<16x16xbf16>
    %cst_23 = arith.constant dense<0.000000e+00> : vector<16x8xf32>
    %71 = tpu.matmul %70, %58, %cst_23 {dimension_numbers = #tpu.dot_dimension_numbers<[1], [0], [0], [1], [0, 0, 1, 1], [], []>} : vector<16x16xbf16>, vector<16x8xbf16>, vector<16x8xf32> -> vector<16x8xf32>
    %72 = arith.truncf %71 : vector<16x8xf32> to vector<16x8xbf16>
    %73 = vector.extract_strided_slice %10 {offsets = [16, 0], sizes = [8, 64], strides = [1, 1]} : vector<64x64xbf16> to vector<8x64xbf16>
    %cst_24 = arith.constant dense<0.000000e+00> : vector<16x64xf32>
    %74 = tpu.matmul %72, %73, %cst_24 {dimension_numbers = #tpu.dot_dimension_numbers<[1], [0], [0], [1], [0, 0, 1, 1], [], []>} : vector<16x8xbf16>, vector<8x64xbf16>, vector<16x64xf32> -> vector<16x64xf32>
    %75 = arith.addf %55, %74 : vector<16x64xf32>
    %76 = vector.extract_strided_slice %13 {offsets = [0, 24], sizes = [16, 8], strides = [1, 1]} : vector<16x64xbf16> to vector<16x8xbf16>
    %77 = vector.extract_strided_slice %14 {offsets = [0, 24], sizes = [16, 8], strides = [1, 1]} : vector<16x128xbf16> to vector<16x8xbf16>
    %78 = vector.extract_strided_slice %14 {offsets = [0, 88], sizes = [16, 8], strides = [1, 1]} : vector<16x128xbf16> to vector<16x8xbf16>
    %cst_25 = arith.constant dense<0.000000e+00> : vector<16x16xf32>
    %79 = tpu.matmul %76, %77, %cst_25 {dimension_numbers = #tpu.dot_dimension_numbers<[1], [1], [0], [0], [0, 0, 1, 0], [], []>} : vector<16x8xbf16>, vector<16x8xbf16>, vector<16x16xf32> -> vector<16x16xf32>
    %cst_26 = arith.constant dense<0xFF800000> : vector<16xf32>
    %80 = vector.multi_reduction <maximumf>, %79, %cst_26 [1] : vector<16x16xf32> to vector<16xf32>
    %81 = vector.shape_cast %80 : vector<16xf32> to vector<16x1xf32>
    %82 = vector.broadcast %81 : vector<16x1xf32> to vector<16x16xf32>
    %83 = arith.subf %79, %82 : vector<16x16xf32>
    %84 = math.exp %83 : vector<16x16xf32>
    %cst_27 = arith.constant dense<0.000000e+00> : vector<16xf32>
    %85 = vector.multi_reduction <add>, %84, %cst_27 [1] : vector<16x16xf32> to vector<16xf32>
    %86 = vector.shape_cast %85 : vector<16xf32> to vector<16x1xf32>
    %87 = tpu.reciprocal %86 {approx = true} : vector<16x1xf32> -> vector<16x1xf32>
    %88 = vector.broadcast %87 : vector<16x1xf32> to vector<16x16xf32>
    %89 = arith.mulf %84, %88 : vector<16x16xf32>
    %90 = arith.truncf %89 : vector<16x16xf32> to vector<16x16xbf16>
    %cst_28 = arith.constant dense<0.000000e+00> : vector<16x8xf32>
    %91 = tpu.matmul %90, %78, %cst_28 {dimension_numbers = #tpu.dot_dimension_numbers<[1], [0], [0], [1], [0, 0, 1, 1], [], []>} : vector<16x16xbf16>, vector<16x8xbf16>, vector<16x8xf32> -> vector<16x8xf32>
    %92 = arith.truncf %91 : vector<16x8xf32> to vector<16x8xbf16>
    %93 = vector.extract_strided_slice %10 {offsets = [24, 0], sizes = [8, 64], strides = [1, 1]} : vector<64x64xbf16> to vector<8x64xbf16>
    %cst_29 = arith.constant dense<0.000000e+00> : vector<16x64xf32>
    %94 = tpu.matmul %92, %93, %cst_29 {dimension_numbers = #tpu.dot_dimension_numbers<[1], [0], [0], [1], [0, 0, 1, 1], [], []>} : vector<16x8xbf16>, vector<8x64xbf16>, vector<16x64xf32> -> vector<16x64xf32>
    %95 = arith.addf %75, %94 : vector<16x64xf32>
    %96 = vector.extract_strided_slice %13 {offsets = [0, 32], sizes = [16, 8], strides = [1, 1]} : vector<16x64xbf16> to vector<16x8xbf16>
    %97 = vector.extract_strided_slice %14 {offsets = [0, 32], sizes = [16, 8], strides = [1, 1]} : vector<16x128xbf16> to vector<16x8xbf16>
    %98 = vector.extract_strided_slice %14 {offsets = [0, 96], sizes = [16, 8], strides = [1, 1]} : vector<16x128xbf16> to vector<16x8xbf16>
    %cst_30 = arith.constant dense<0.000000e+00> : vector<16x16xf32>
    %99 = tpu.matmul %96, %97, %cst_30 {dimension_numbers = #tpu.dot_dimension_numbers<[1], [1], [0], [0], [0, 0, 1, 0], [], []>} : vector<16x8xbf16>, vector<16x8xbf16>, vector<16x16xf32> -> vector<16x16xf32>
    %cst_31 = arith.constant dense<0xFF800000> : vector<16xf32>
    %100 = vector.multi_reduction <maximumf>, %99, %cst_31 [1] : vector<16x16xf32> to vector<16xf32>
    %101 = vector.shape_cast %100 : vector<16xf32> to vector<16x1xf32>
    %102 = vector.broadcast %101 : vector<16x1xf32> to vector<16x16xf32>
    %103 = arith.subf %99, %102 : vector<16x16xf32>
    %104 = math.exp %103 : vector<16x16xf32>
    %cst_32 = arith.constant dense<0.000000e+00> : vector<16xf32>
    %105 = vector.multi_reduction <add>, %104, %cst_32 [1] : vector<16x16xf32> to vector<16xf32>
    %106 = vector.shape_cast %105 : vector<16xf32> to vector<16x1xf32>
    %107 = tpu.reciprocal %106 {approx = true} : vector<16x1xf32> -> vector<16x1xf32>
    %108 = vector.broadcast %107 : vector<16x1xf32> to vector<16x16xf32>
    %109 = arith.mulf %104, %108 : vector<16x16xf32>
    %110 = arith.truncf %109 : vector<16x16xf32> to vector<16x16xbf16>
    %cst_33 = arith.constant dense<0.000000e+00> : vector<16x8xf32>
    %111 = tpu.matmul %110, %98, %cst_33 {dimension_numbers = #tpu.dot_dimension_numbers<[1], [0], [0], [1], [0, 0, 1, 1], [], []>} : vector<16x16xbf16>, vector<16x8xbf16>, vector<16x8xf32> -> vector<16x8xf32>
    %112 = arith.truncf %111 : vector<16x8xf32> to vector<16x8xbf16>
    %113 = vector.extract_strided_slice %10 {offsets = [32, 0], sizes = [8, 64], strides = [1, 1]} : vector<64x64xbf16> to vector<8x64xbf16>
    %cst_34 = arith.constant dense<0.000000e+00> : vector<16x64xf32>
    %114 = tpu.matmul %112, %113, %cst_34 {dimension_numbers = #tpu.dot_dimension_numbers<[1], [0], [0], [1], [0, 0, 1, 1], [], []>} : vector<16x8xbf16>, vector<8x64xbf16>, vector<16x64xf32> -> vector<16x64xf32>
    %115 = arith.addf %95, %114 : vector<16x64xf32>
    %116 = vector.extract_strided_slice %13 {offsets = [0, 40], sizes = [16, 8], strides = [1, 1]} : vector<16x64xbf16> to vector<16x8xbf16>
    %117 = vector.extract_strided_slice %14 {offsets = [0, 40], sizes = [16, 8], strides = [1, 1]} : vector<16x128xbf16> to vector<16x8xbf16>
    %118 = vector.extract_strided_slice %14 {offsets = [0, 104], sizes = [16, 8], strides = [1, 1]} : vector<16x128xbf16> to vector<16x8xbf16>
    %cst_35 = arith.constant dense<0.000000e+00> : vector<16x16xf32>
    %119 = tpu.matmul %116, %117, %cst_35 {dimension_numbers = #tpu.dot_dimension_numbers<[1], [1], [0], [0], [0, 0, 1, 0], [], []>} : vector<16x8xbf16>, vector<16x8xbf16>, vector<16x16xf32> -> vector<16x16xf32>
    %cst_36 = arith.constant dense<0xFF800000> : vector<16xf32>
    %120 = vector.multi_reduction <maximumf>, %119, %cst_36 [1] : vector<16x16xf32> to vector<16xf32>
    %121 = vector.shape_cast %120 : vector<16xf32> to vector<16x1xf32>
    %122 = vector.broadcast %121 : vector<16x1xf32> to vector<16x16xf32>
    %123 = arith.subf %119, %122 : vector<16x16xf32>
    %124 = math.exp %123 : vector<16x16xf32>
    %cst_37 = arith.constant dense<0.000000e+00> : vector<16xf32>
    %125 = vector.multi_reduction <add>, %124, %cst_37 [1] : vector<16x16xf32> to vector<16xf32>
    %126 = vector.shape_cast %125 : vector<16xf32> to vector<16x1xf32>
    %127 = tpu.reciprocal %126 {approx = true} : vector<16x1xf32> -> vector<16x1xf32>
    %128 = vector.broadcast %127 : vector<16x1xf32> to vector<16x16xf32>
    %129 = arith.mulf %124, %128 : vector<16x16xf32>
    %130 = arith.truncf %129 : vector<16x16xf32> to vector<16x16xbf16>
    %cst_38 = arith.constant dense<0.000000e+00> : vector<16x8xf32>
    %131 = tpu.matmul %130, %118, %cst_38 {dimension_numbers = #tpu.dot_dimension_numbers<[1], [0], [0], [1], [0, 0, 1, 1], [], []>} : vector<16x16xbf16>, vector<16x8xbf16>, vector<16x8xf32> -> vector<16x8xf32>
    %132 = arith.truncf %131 : vector<16x8xf32> to vector<16x8xbf16>
    %133 = vector.extract_strided_slice %10 {offsets = [40, 0], sizes = [8, 64], strides = [1, 1]} : vector<64x64xbf16> to vector<8x64xbf16>
    %cst_39 = arith.constant dense<0.000000e+00> : vector<16x64xf32>
    %134 = tpu.matmul %132, %133, %cst_39 {dimension_numbers = #tpu.dot_dimension_numbers<[1], [0], [0], [1], [0, 0, 1, 1], [], []>} : vector<16x8xbf16>, vector<8x64xbf16>, vector<16x64xf32> -> vector<16x64xf32>
    %135 = arith.addf %115, %134 : vector<16x64xf32>
    %136 = vector.extract_strided_slice %13 {offsets = [0, 48], sizes = [16, 8], strides = [1, 1]} : vector<16x64xbf16> to vector<16x8xbf16>
    %137 = vector.extract_strided_slice %14 {offsets = [0, 48], sizes = [16, 8], strides = [1, 1]} : vector<16x128xbf16> to vector<16x8xbf16>
    %138 = vector.extract_strided_slice %14 {offsets = [0, 112], sizes = [16, 8], strides = [1, 1]} : vector<16x128xbf16> to vector<16x8xbf16>
    %cst_40 = arith.constant dense<0.000000e+00> : vector<16x16xf32>
    %139 = tpu.matmul %136, %137, %cst_40 {dimension_numbers = #tpu.dot_dimension_numbers<[1], [1], [0], [0], [0, 0, 1, 0], [], []>} : vector<16x8xbf16>, vector<16x8xbf16>, vector<16x16xf32> -> vector<16x16xf32>
    %cst_41 = arith.constant dense<0xFF800000> : vector<16xf32>
    %140 = vector.multi_reduction <maximumf>, %139, %cst_41 [1] : vector<16x16xf32> to vector<16xf32>
    %141 = vector.shape_cast %140 : vector<16xf32> to vector<16x1xf32>
    %142 = vector.broadcast %141 : vector<16x1xf32> to vector<16x16xf32>
    %143 = arith.subf %139, %142 : vector<16x16xf32>
    %144 = math.exp %143 : vector<16x16xf32>
    %cst_42 = arith.constant dense<0.000000e+00> : vector<16xf32>
    %145 = vector.multi_reduction <add>, %144, %cst_42 [1] : vector<16x16xf32> to vector<16xf32>
    %146 = vector.shape_cast %145 : vector<16xf32> to vector<16x1xf32>
    %147 = tpu.reciprocal %146 {approx = true} : vector<16x1xf32> -> vector<16x1xf32>
    %148 = vector.broadcast %147 : vector<16x1xf32> to vector<16x16xf32>
    %149 = arith.mulf %144, %148 : vector<16x16xf32>
    %150 = arith.truncf %149 : vector<16x16xf32> to vector<16x16xbf16>
    %cst_43 = arith.constant dense<0.000000e+00> : vector<16x8xf32>
    %151 = tpu.matmul %150, %138, %cst_43 {dimension_numbers = #tpu.dot_dimension_numbers<[1], [0], [0], [1], [0, 0, 1, 1], [], []>} : vector<16x16xbf16>, vector<16x8xbf16>, vector<16x8xf32> -> vector<16x8xf32>
    %152 = arith.truncf %151 : vector<16x8xf32> to vector<16x8xbf16>
    %153 = vector.extract_strided_slice %10 {offsets = [48, 0], sizes = [8, 64], strides = [1, 1]} : vector<64x64xbf16> to vector<8x64xbf16>
    %cst_44 = arith.constant dense<0.000000e+00> : vector<16x64xf32>
    %154 = tpu.matmul %152, %153, %cst_44 {dimension_numbers = #tpu.dot_dimension_numbers<[1], [0], [0], [1], [0, 0, 1, 1], [], []>} : vector<16x8xbf16>, vector<8x64xbf16>, vector<16x64xf32> -> vector<16x64xf32>
    %155 = arith.addf %135, %154 : vector<16x64xf32>
    %156 = vector.extract_strided_slice %13 {offsets = [0, 56], sizes = [16, 8], strides = [1, 1]} : vector<16x64xbf16> to vector<16x8xbf16>
    %157 = vector.extract_strided_slice %14 {offsets = [0, 56], sizes = [16, 8], strides = [1, 1]} : vector<16x128xbf16> to vector<16x8xbf16>
    %158 = vector.extract_strided_slice %14 {offsets = [0, 120], sizes = [16, 8], strides = [1, 1]} : vector<16x128xbf16> to vector<16x8xbf16>
    %cst_45 = arith.constant dense<0.000000e+00> : vector<16x16xf32>
    %159 = tpu.matmul %156, %157, %cst_45 {dimension_numbers = #tpu.dot_dimension_numbers<[1], [1], [0], [0], [0, 0, 1, 0], [], []>} : vector<16x8xbf16>, vector<16x8xbf16>, vector<16x16xf32> -> vector<16x16xf32>
    %cst_46 = arith.constant dense<0xFF800000> : vector<16xf32>
    %160 = vector.multi_reduction <maximumf>, %159, %cst_46 [1] : vector<16x16xf32> to vector<16xf32>
    %161 = vector.shape_cast %160 : vector<16xf32> to vector<16x1xf32>
    %162 = vector.broadcast %161 : vector<16x1xf32> to vector<16x16xf32>
    %163 = arith.subf %159, %162 : vector<16x16xf32>
    %164 = math.exp %163 : vector<16x16xf32>
    %cst_47 = arith.constant dense<0.000000e+00> : vector<16xf32>
    %165 = vector.multi_reduction <add>, %164, %cst_47 [1] : vector<16x16xf32> to vector<16xf32>
    %166 = vector.shape_cast %165 : vector<16xf32> to vector<16x1xf32>
    %167 = tpu.reciprocal %166 {approx = true} : vector<16x1xf32> -> vector<16x1xf32>
    %168 = vector.broadcast %167 : vector<16x1xf32> to vector<16x16xf32>
    %169 = arith.mulf %164, %168 : vector<16x16xf32>
    %170 = arith.truncf %169 : vector<16x16xf32> to vector<16x16xbf16>
    %cst_48 = arith.constant dense<0.000000e+00> : vector<16x8xf32>
    %171 = tpu.matmul %170, %158, %cst_48 {dimension_numbers = #tpu.dot_dimension_numbers<[1], [0], [0], [1], [0, 0, 1, 1], [], []>} : vector<16x16xbf16>, vector<16x8xbf16>, vector<16x8xf32> -> vector<16x8xf32>
    %172 = arith.truncf %171 : vector<16x8xf32> to vector<16x8xbf16>
    %173 = vector.extract_strided_slice %10 {offsets = [56, 0], sizes = [8, 64], strides = [1, 1]} : vector<64x64xbf16> to vector<8x64xbf16>
    %cst_49 = arith.constant dense<0.000000e+00> : vector<16x64xf32>
    %174 = tpu.matmul %172, %173, %cst_49 {dimension_numbers = #tpu.dot_dimension_numbers<[1], [0], [0], [1], [0, 0, 1, 1], [], []>} : vector<16x8xbf16>, vector<8x64xbf16>, vector<16x64xf32> -> vector<16x64xf32>
    %175 = arith.addf %155, %174 : vector<16x64xf32>
    %176 = arith.addf %1, %175 : vector<16x64xf32>
    %c0_50 = arith.constant 0 : index
    %c0_51 = arith.constant 0 : index
    %177 = vector.load %arg5[%c0_50, %c0_51] : memref<1x64xf32, #tpu.memory_space<vmem>>, vector<1x64xf32>
    %178 = vector.broadcast %177 : vector<1x64xf32> to vector<16x64xf32>
    %179 = arith.addf %176, %178 : vector<16x64xf32>
    %c0_52 = arith.constant 0 : index
    %c0_53 = arith.constant 0 : index
    %180 = vector.load %arg6[%c0_52, %c0_53] : memref<1x64xf32, #tpu.memory_space<vmem>>, vector<1x64xf32>
    %c0_54 = arith.constant 0 : index
    %c0_55 = arith.constant 0 : index
    %181 = vector.load %arg7[%c0_54, %c0_55] : memref<1x64xf32, #tpu.memory_space<vmem>>, vector<1x64xf32>
    %cst_56 = arith.constant dense<0.000000e+00> : vector<16xf32>
    %182 = vector.multi_reduction <add>, %179, %cst_56 [1] : vector<16x64xf32> to vector<16xf32>
    %183 = vector.shape_cast %182 : vector<16xf32> to vector<16x1xf32>
    %cst_57 = arith.constant 6.400000e+01 : f32
    %184 = vector.broadcast %cst_57 : f32 to vector<16x1xf32>
    %185 = arith.divf %183, %184 : vector<16x1xf32>
    %186 = vector.broadcast %185 : vector<16x1xf32> to vector<16x64xf32>
    %187 = arith.subf %179, %186 : vector<16x64xf32>
    %188 = arith.mulf %187, %187 : vector<16x64xf32>
    %cst_58 = arith.constant dense<0.000000e+00> : vector<16xf32>
    %189 = vector.multi_reduction <add>, %188, %cst_58 [1] : vector<16x64xf32> to vector<16xf32>
    %190 = vector.shape_cast %189 : vector<16xf32> to vector<16x1xf32>
    %cst_59 = arith.constant 6.400000e+01 : f32
    %191 = vector.broadcast %cst_59 : f32 to vector<16x1xf32>
    %192 = arith.divf %190, %191 : vector<16x1xf32>
    %193 = vector.broadcast %185 : vector<16x1xf32> to vector<16x64xf32>
    %194 = arith.subf %179, %193 : vector<16x64xf32>
    %cst_60 = arith.constant 9.99999974E-6 : f32
    %195 = vector.broadcast %cst_60 : f32 to vector<16x1xf32>
    %196 = arith.addf %192, %195 : vector<16x1xf32>
    %197 = math.rsqrt %196 : vector<16x1xf32>
    %198 = vector.broadcast %197 : vector<16x1xf32> to vector<16x64xf32>
    %199 = arith.mulf %194, %198 : vector<16x64xf32>
    %200 = vector.broadcast %180 : vector<1x64xf32> to vector<16x64xf32>
    %201 = arith.mulf %199, %200 : vector<16x64xf32>
    %202 = vector.broadcast %181 : vector<1x64xf32> to vector<16x64xf32>
    %203 = arith.addf %201, %202 : vector<16x64xf32>
    %204 = arith.truncf %203 : vector<16x64xf32> to vector<16x64xbf16>
    %c0_61 = arith.constant 0 : index
    %c0_62 = arith.constant 0 : index
    %205 = vector.load %arg8[%c0_61, %c0_62] : memref<64x128xbf16, #tpu.memory_space<vmem>>, vector<64x128xbf16>
    %cst_63 = arith.constant dense<0.000000e+00> : vector<16x128xf32>
    %206 = tpu.matmul %204, %205, %cst_63 {dimension_numbers = #tpu.dot_dimension_numbers<[1], [0], [0], [1], [0, 0, 1, 1], [], []>} : vector<16x64xbf16>, vector<64x128xbf16>, vector<16x128xf32> -> vector<16x128xf32>
    %c0_64 = arith.constant 0 : index
    %c0_65 = arith.constant 0 : index
    %207 = vector.load %arg9[%c0_64, %c0_65] : memref<1x128xf32, #tpu.memory_space<vmem>>, vector<1x128xf32>
    %208 = vector.broadcast %207 : vector<1x128xf32> to vector<16x128xf32>
    %209 = arith.addf %206, %208 : vector<16x128xf32>
    %cst_66 = arith.constant 0.000000e+00 : f32
    %210 = vector.broadcast %cst_66 : f32 to vector<16x128xf32>
    %211 = arith.maximumf %209, %210 : vector<16x128xf32>
    %212 = arith.truncf %211 : vector<16x128xf32> to vector<16x128xbf16>
    %c0_67 = arith.constant 0 : index
    %c0_68 = arith.constant 0 : index
    %213 = vector.load %arg10[%c0_67, %c0_68] : memref<128x64xbf16, #tpu.memory_space<vmem>>, vector<128x64xbf16>
    %cst_69 = arith.constant dense<0.000000e+00> : vector<16x64xf32>
    %214 = tpu.matmul %212, %213, %cst_69 {dimension_numbers = #tpu.dot_dimension_numbers<[1], [0], [0], [1], [0, 0, 1, 1], [], []>} : vector<16x128xbf16>, vector<128x64xbf16>, vector<16x64xf32> -> vector<16x64xf32>
    %c0_70 = arith.constant 0 : index
    %c0_71 = arith.constant 0 : index
    %215 = vector.load %arg11[%c0_70, %c0_71] : memref<1x64xf32, #tpu.memory_space<vmem>>, vector<1x64xf32>
    %216 = vector.broadcast %215 : vector<1x64xf32> to vector<16x64xf32>
    %217 = arith.addf %214, %216 : vector<16x64xf32>
    %218 = arith.addf %203, %217 : vector<16x64xf32>
    %c0_72 = arith.constant 0 : index
    %c0_73 = arith.constant 0 : index
    %219 = vector.load %arg12[%c0_72, %c0_73] : memref<1x64xf32, #tpu.memory_space<vmem>>, vector<1x64xf32>
    %c0_74 = arith.constant 0 : index
    %c0_75 = arith.constant 0 : index
    %220 = vector.load %arg13[%c0_74, %c0_75] : memref<1x64xf32, #tpu.memory_space<vmem>>, vector<1x64xf32>
    %cst_76 = arith.constant dense<0.000000e+00> : vector<16xf32>
    %221 = vector.multi_reduction <add>, %218, %cst_76 [1] : vector<16x64xf32> to vector<16xf32>
    %222 = vector.shape_cast %221 : vector<16xf32> to vector<16x1xf32>
    %cst_77 = arith.constant 6.400000e+01 : f32
    %223 = vector.broadcast %cst_77 : f32 to vector<16x1xf32>
    %224 = arith.divf %222, %223 : vector<16x1xf32>
    %225 = vector.broadcast %224 : vector<16x1xf32> to vector<16x64xf32>
    %226 = arith.subf %218, %225 : vector<16x64xf32>
    %227 = arith.mulf %226, %226 : vector<16x64xf32>
    %cst_78 = arith.constant dense<0.000000e+00> : vector<16xf32>
    %228 = vector.multi_reduction <add>, %227, %cst_78 [1] : vector<16x64xf32> to vector<16xf32>
    %229 = vector.shape_cast %228 : vector<16xf32> to vector<16x1xf32>
    %cst_79 = arith.constant 6.400000e+01 : f32
    %230 = vector.broadcast %cst_79 : f32 to vector<16x1xf32>
    %231 = arith.divf %229, %230 : vector<16x1xf32>
    %232 = vector.broadcast %224 : vector<16x1xf32> to vector<16x64xf32>
    %233 = arith.subf %218, %232 : vector<16x64xf32>
    %cst_80 = arith.constant 9.99999974E-6 : f32
    %234 = vector.broadcast %cst_80 : f32 to vector<16x1xf32>
    %235 = arith.addf %231, %234 : vector<16x1xf32>
    %236 = math.rsqrt %235 : vector<16x1xf32>
    %237 = vector.broadcast %236 : vector<16x1xf32> to vector<16x64xf32>
    %238 = arith.mulf %233, %237 : vector<16x64xf32>
    %239 = vector.broadcast %219 : vector<1x64xf32> to vector<16x64xf32>
    %240 = arith.mulf %238, %239 : vector<16x64xf32>
    %241 = vector.broadcast %220 : vector<1x64xf32> to vector<16x64xf32>
    %242 = arith.addf %240, %241 : vector<16x64xf32>
    %c0_81 = arith.constant 0 : index
    %c0_82 = arith.constant 0 : index
    %c0_83 = arith.constant 0 : index
    %243 = vector.load %arg14[%c0_81, %c0_82, %c0_83] : memref<1x16x64xf32, #tpu.memory_space<vmem>>, vector<1x16x64xf32>
    %244 = vector.shape_cast %243 : vector<1x16x64xf32> to vector<16x64xf32>
    %245 = vector.shape_cast %242 : vector<16x64xf32> to vector<1x16x64xf32>
    tpu.vector_store %arg14[%c0_81, %c0_82, %c0_83], %245 {strides = array<i32>} : memref<1x16x64xf32, #tpu.memory_space<vmem>>, vector<1x16x64xf32>,
    return
  }
  func.func @transform_0(%arg0: i32) -> (i32, i32, i32) {
    %c0_i32 = arith.constant 0 : i32
    %c0_i32_0 = arith.constant 0 : i32
    %c0_i32_1 = arith.constant 0 : i32
    return %arg0, %c0_i32, %c0_i32_0 : i32, i32, i32
  }
  func.func @transform_1(%arg0: i32) -> (i32, i32) {
    %c0_i32 = arith.constant 0 : i32
    %c0_i32_0 = arith.constant 0 : i32
    %c0_i32_1 = arith.constant 0 : i32
    return %c0_i32, %c0_i32_0 : i32, i32
  }
  func.func @transform_2(%arg0: i32) -> (i32, i32) {
    %c0_i32 = arith.constant 0 : i32
    %c0_i32_0 = arith.constant 0 : i32
    %c0_i32_1 = arith.constant 0 : i32
    return %c0_i32, %c0_i32_0 : i32, i32
  }
  func.func @transform_3(%arg0: i32) -> (i32, i32) {
    %c0_i32 = arith.constant 0 : i32
    %c0_i32_0 = arith.constant 0 : i32
    %c0_i32_1 = arith.constant 0 : i32
    return %c0_i32, %c0_i32_0 : i32, i32
  }
  func.func @transform_4(%arg0: i32) -> (i32, i32) {
    %c0_i32 = arith.constant 0 : i32
    %c0_i32_0 = arith.constant 0 : i32
    %c0_i32_1 = arith.constant 0 : i32
    return %c0_i32, %c0_i32_0 : i32, i32
  }
  func.func @transform_5(%arg0: i32) -> (i32, i32) {
    %c0_i32 = arith.constant 0 : i32
    %c0_i32_0 = arith.constant 0 : i32
    %c0_i32_1 = arith.constant 0 : i32
    return %c0_i32, %c0_i32_0 : i32, i32
  }
  func.func @transform_6(%arg0: i32) -> (i32, i32) {
    %c0_i32 = arith.constant 0 : i32
    %c0_i32_0 = arith.constant 0 : i32
    %c0_i32_1 = arith.constant 0 : i32
    return %c0_i32, %c0_i32_0 : i32, i32
  }
  func.func @transform_7(%arg0: i32) -> (i32, i32) {
    %c0_i32 = arith.constant 0 : i32
    %c0_i32_0 = arith.constant 0 : i32
    %c0_i32_1 = arith.constant 0 : i32
    return %c0_i32, %c0_i32_0 : i32, i32
  }
  func.func @transform_8(%arg0: i32) -> (i32, i32) {
    %c0_i32 = arith.constant 0 : i32
    %c0_i32_0 = arith.constant 0 : i32
    %c0_i32_1 = arith.constant 0 : i32
    return %c0_i32, %c0_i32_0 : i32, i32
  }
  func.func @transform_9(%arg0: i32) -> (i32, i32) {
    %c0_i32 = arith.constant 0 : i32
    %c0_i32_0 = arith.constant 0 : i32
    %c0_i32_1 = arith.constant 0 : i32
    return %c0_i32, %c0_i32_0 : i32, i32
  }
  func.func @transform_10(%arg0: i32) -> (i32, i32) {
    %c0_i32 = arith.constant 0 : i32
    %c0_i32_0 = arith.constant 0 : i32
    %c0_i32_1 = arith.constant 0 : i32
    return %c0_i32, %c0_i32_0 : i32, i32
  }
  func.func @transform_11(%arg0: i32) -> (i32, i32) {
    %c0_i32 = arith.constant 0 : i32
    %c0_i32_0 = arith.constant 0 : i32
    %c0_i32_1 = arith.constant 0 : i32
    return %c0_i32, %c0_i32_0 : i32, i32
  }
  func.func @transform_12(%arg0: i32) -> (i32, i32) {
    %c0_i32 = arith.constant 0 : i32
    %c0_i32_0 = arith.constant 0 : i32
    %c0_i32_1 = arith.constant 0 : i32
    return %c0_i32, %c0_i32_0 : i32, i32
  }
  func.func @transform_13(%arg0: i32) -> (i32, i32, i32) {
    %c0_i32 = arith.constant 0 : i32
    %c0_i32_0 = arith.constant 0 : i32
    %c0_i32_1 = arith.constant 0 : i32
    return %arg0, %c0_i32, %c0_i32_0 : i32, i32, i32
  }
}

module attributes {stable_mosaic.version = 11 : i64} {
  func.func @_emb_pe_kernel(%arg0: i32, %arg1: memref<1x12x4xf32, #tpu.memory_space<vmem>>, %arg2: memref<4x64xbf16, #tpu.memory_space<vmem>>, %arg3: memref<1x64xf32, #tpu.memory_space<vmem>>, %arg4: memref<12x64xf32, #tpu.memory_space<vmem>>, %arg5: memref<1x12x64xf32, #tpu.memory_space<vmem>>) attributes {dimension_semantics = [#tpu.dimension_semantics<parallel>], iteration_bounds = array<i64: 2>, scalar_prefetch = 0 : i64, scratch_operands = 0 : i64, tpu.core_type = #tpu.core_type<tc>, window_params = [{transform_indices = @transform_0, window_bounds = array<i64: 1, 12, 4>}, {pipeline_mode = #tpu.pipeline_mode<synchronous>, transform_indices = @transform_1, window_bounds = array<i64: 4, 64>}, {pipeline_mode = #tpu.pipeline_mode<synchronous>, transform_indices = @transform_2, window_bounds = array<i64: 1, 64>}, {pipeline_mode = #tpu.pipeline_mode<synchronous>, transform_indices = @transform_3, window_bounds = array<i64: 12, 64>}, {transform_indices = @transform_4, window_bounds = array<i64: 1, 12, 64>}]} {
    %c0 = arith.constant 0 : index
    %c0_0 = arith.constant 0 : index
    %c0_1 = arith.constant 0 : index
    %0 = vector.load %arg1[%c0, %c0_0, %c0_1] : memref<1x12x4xf32, #tpu.memory_space<vmem>>, vector<1x12x4xf32>
    %1 = vector.shape_cast %0 : vector<1x12x4xf32> to vector<12x4xf32>
    %2 = arith.truncf %1 : vector<12x4xf32> to vector<12x4xbf16>
    %c0_2 = arith.constant 0 : index
    %c0_3 = arith.constant 0 : index
    %3 = vector.load %arg2[%c0_2, %c0_3] : memref<4x64xbf16, #tpu.memory_space<vmem>>, vector<4x64xbf16>
    %cst = arith.constant dense<0.000000e+00> : vector<12x64xf32>
    %4 = tpu.matmul %2, %3, %cst {dimension_numbers = #tpu.dot_dimension_numbers<[1], [0], [0], [1], [0, 0, 1, 1], [], []>} : vector<12x4xbf16>, vector<4x64xbf16>, vector<12x64xf32> -> vector<12x64xf32>
    %c0_4 = arith.constant 0 : index
    %c0_5 = arith.constant 0 : index
    %5 = vector.load %arg3[%c0_4, %c0_5] : memref<1x64xf32, #tpu.memory_space<vmem>>, vector<1x64xf32>
    %6 = vector.broadcast %5 : vector<1x64xf32> to vector<12x64xf32>
    %7 = arith.addf %4, %6 : vector<12x64xf32>
    %c0_6 = arith.constant 0 : index
    %c0_7 = arith.constant 0 : index
    %8 = vector.load %arg4[%c0_6, %c0_7] : memref<12x64xf32, #tpu.memory_space<vmem>>, vector<12x64xf32>
    %9 = arith.addf %7, %8 : vector<12x64xf32>
    %c0_8 = arith.constant 0 : index
    %c0_9 = arith.constant 0 : index
    %c0_10 = arith.constant 0 : index
    %10 = vector.load %arg5[%c0_8, %c0_9, %c0_10] : memref<1x12x64xf32, #tpu.memory_space<vmem>>, vector<1x12x64xf32>
    %11 = vector.shape_cast %10 : vector<1x12x64xf32> to vector<12x64xf32>
    %12 = vector.shape_cast %9 : vector<12x64xf32> to vector<1x12x64xf32>
    tpu.vector_store %arg5[%c0_8, %c0_9, %c0_10], %12 {strides = array<i32>} : memref<1x12x64xf32, #tpu.memory_space<vmem>>, vector<1x12x64xf32>,
    return
  }
  func.func @transform_0(%arg0: i32) -> (i32, i32, i32) {
    %c0_i32 = arith.constant 0 : i32
    %c0_i32_0 = arith.constant 0 : i32
    %c0_i32_1 = arith.constant 0 : i32
    return %arg0, %c0_i32, %c0_i32_0 : i32, i32, i32
  }
  func.func @transform_1(%arg0: i32) -> (i32, i32) {
    %c0_i32 = arith.constant 0 : i32
    %c0_i32_0 = arith.constant 0 : i32
    %c0_i32_1 = arith.constant 0 : i32
    return %c0_i32, %c0_i32_0 : i32, i32
  }
  func.func @transform_2(%arg0: i32) -> (i32, i32) {
    %c0_i32 = arith.constant 0 : i32
    %c0_i32_0 = arith.constant 0 : i32
    %c0_i32_1 = arith.constant 0 : i32
    return %c0_i32, %c0_i32_0 : i32, i32
  }
  func.func @transform_3(%arg0: i32) -> (i32, i32) {
    %c0_i32 = arith.constant 0 : i32
    %c0_i32_0 = arith.constant 0 : i32
    %c0_i32_1 = arith.constant 0 : i32
    return %c0_i32, %c0_i32_0 : i32, i32
  }
  func.func @transform_4(%arg0: i32) -> (i32, i32, i32) {
    %c0_i32 = arith.constant 0 : i32
    %c0_i32_0 = arith.constant 0 : i32
    %c0_i32_1 = arith.constant 0 : i32
    return %arg0, %c0_i32, %c0_i32_0 : i32, i32, i32
  }
}

module attributes {stable_mosaic.version = 11 : i64} {
  func.func @kernel(%arg0: i32, %arg1: memref<1x12x64xf32, #tpu.memory_space<vmem>>, %arg2: memref<1x16x64xf32, #tpu.memory_space<vmem>>, %arg3: memref<64x192xbf16, #tpu.memory_space<vmem>>, %arg4: memref<1x192xf32, #tpu.memory_space<vmem>>, %arg5: memref<64x64xbf16, #tpu.memory_space<vmem>>, %arg6: memref<1x64xf32, #tpu.memory_space<vmem>>, %arg7: memref<1x64xf32, #tpu.memory_space<vmem>>, %arg8: memref<1x64xf32, #tpu.memory_space<vmem>>, %arg9: memref<64x64xbf16, #tpu.memory_space<vmem>>, %arg10: memref<1x64xf32, #tpu.memory_space<vmem>>, %arg11: memref<64x128xbf16, #tpu.memory_space<vmem>>, %arg12: memref<1x128xf32, #tpu.memory_space<vmem>>, %arg13: memref<64x64xbf16, #tpu.memory_space<vmem>>, %arg14: memref<1x64xf32, #tpu.memory_space<vmem>>, %arg15: memref<1x64xf32, #tpu.memory_space<vmem>>, %arg16: memref<1x64xf32, #tpu.memory_space<vmem>>, %arg17: memref<64x128xbf16, #tpu.memory_space<vmem>>, %arg18: memref<1x128xf32, #tpu.memory_space<vmem>>, %arg19: memref<128x64xbf16, #tpu.memory_space<vmem>>, %arg20: memref<1x64xf32, #tpu.memory_space<vmem>>, %arg21: memref<1x64xf32, #tpu.memory_space<vmem>>, %arg22: memref<1x64xf32, #tpu.memory_space<vmem>>, %arg23: memref<1x12x64xf32, #tpu.memory_space<vmem>>) attributes {dimension_semantics = [#tpu.dimension_semantics<parallel>], iteration_bounds = array<i64: 2>, scalar_prefetch = 0 : i64, scratch_operands = 0 : i64, tpu.core_type = #tpu.core_type<tc>, window_params = [{transform_indices = @transform_0, window_bounds = array<i64: 1, 12, 64>}, {transform_indices = @transform_1, window_bounds = array<i64: 1, 16, 64>}, {pipeline_mode = #tpu.pipeline_mode<synchronous>, transform_indices = @transform_2, window_bounds = array<i64: 64, 192>}, {pipeline_mode = #tpu.pipeline_mode<synchronous>, transform_indices = @transform_3, window_bounds = array<i64: 1, 192>}, {pipeline_mode = #tpu.pipeline_mode<synchronous>, transform_indices = @transform_4, window_bounds = array<i64: 64, 64>}, {pipeline_mode = #tpu.pipeline_mode<synchronous>, transform_indices = @transform_5, window_bounds = array<i64: 1, 64>}, {pipeline_mode = #tpu.pipeline_mode<synchronous>, transform_indices = @transform_6, window_bounds = array<i64: 1, 64>}, {pipeline_mode = #tpu.pipeline_mode<synchronous>, transform_indices = @transform_7, window_bounds = array<i64: 1, 64>}, {pipeline_mode = #tpu.pipeline_mode<synchronous>, transform_indices = @transform_8, window_bounds = array<i64: 64, 64>}, {pipeline_mode = #tpu.pipeline_mode<synchronous>, transform_indices = @transform_9, window_bounds = array<i64: 1, 64>}, {pipeline_mode = #tpu.pipeline_mode<synchronous>, transform_indices = @transform_10, window_bounds = array<i64: 64, 128>}, {pipeline_mode = #tpu.pipeline_mode<synchronous>, transform_indices = @transform_11, window_bounds = array<i64: 1, 128>}, {pipeline_mode = #tpu.pipeline_mode<synchronous>, transform_indices = @transform_12, window_bounds = array<i64: 64, 64>}, {pipeline_mode = #tpu.pipeline_mode<synchronous>, transform_indices = @transform_13, window_bounds = array<i64: 1, 64>}, {pipeline_mode = #tpu.pipeline_mode<synchronous>, transform_indices = @transform_14, window_bounds = array<i64: 1, 64>}, {pipeline_mode = #tpu.pipeline_mode<synchronous>, transform_indices = @transform_15, window_bounds = array<i64: 1, 64>}, {pipeline_mode = #tpu.pipeline_mode<synchronous>, transform_indices = @transform_16, window_bounds = array<i64: 64, 128>}, {pipeline_mode = #tpu.pipeline_mode<synchronous>, transform_indices = @transform_17, window_bounds = array<i64: 1, 128>}, {pipeline_mode = #tpu.pipeline_mode<synchronous>, transform_indices = @transform_18, window_bounds = array<i64: 128, 64>}, {pipeline_mode = #tpu.pipeline_mode<synchronous>, transform_indices = @transform_19, window_bounds = array<i64: 1, 64>}, {pipeline_mode = #tpu.pipeline_mode<synchronous>, transform_indices = @transform_20, window_bounds = array<i64: 1, 64>}, {pipeline_mode = #tpu.pipeline_mode<synchronous>, transform_indices = @transform_21, window_bounds = array<i64: 1, 64>}, {transform_indices = @transform_22, window_bounds = array<i64: 1, 12, 64>}]} {
    %c0 = arith.constant 0 : index
    %c0_0 = arith.constant 0 : index
    %c0_1 = arith.constant 0 : index
    %0 = vector.load %arg1[%c0, %c0_0, %c0_1] : memref<1x12x64xf32, #tpu.memory_space<vmem>>, vector<1x12x64xf32>
    %1 = vector.shape_cast %0 : vector<1x12x64xf32> to vector<12x64xf32>
    %c0_2 = arith.constant 0 : index
    %c0_3 = arith.constant 0 : index
    %c0_4 = arith.constant 0 : index
    %2 = vector.load %arg2[%c0_2, %c0_3, %c0_4] : memref<1x16x64xf32, #tpu.memory_space<vmem>>, vector<1x16x64xf32>
    %3 = vector.shape_cast %2 : vector<1x16x64xf32> to vector<16x64xf32>
    %4 = arith.truncf %1 : vector<12x64xf32> to vector<12x64xbf16>
    %c0_5 = arith.constant 0 : index
    %c0_6 = arith.constant 0 : index
    %5 = vector.load %arg3[%c0_5, %c0_6] : memref<64x192xbf16, #tpu.memory_space<vmem>>, vector<64x192xbf16>
    %cst = arith.constant dense<0.000000e+00> : vector<12x192xf32>
    %6 = tpu.matmul %4, %5, %cst {dimension_numbers = #tpu.dot_dimension_numbers<[1], [0], [0], [1], [0, 0, 1, 1], [], []>} : vector<12x64xbf16>, vector<64x192xbf16>, vector<12x192xf32> -> vector<12x192xf32>
    %c0_7 = arith.constant 0 : index
    %c0_8 = arith.constant 0 : index
    %7 = vector.load %arg4[%c0_7, %c0_8] : memref<1x192xf32, #tpu.memory_space<vmem>>, vector<1x192xf32>
    %8 = vector.broadcast %7 : vector<1x192xf32> to vector<12x192xf32>
    %9 = arith.addf %6, %8 : vector<12x192xf32>
    %10 = vector.extract_strided_slice %9 {offsets = [0, 0], sizes = [12, 64], strides = [1, 1]} : vector<12x192xf32> to vector<12x64xf32>
    %11 = vector.extract_strided_slice %9 {offsets = [0, 64], sizes = [12, 128], strides = [1, 1]} : vector<12x192xf32> to vector<12x128xf32>
    %c0_9 = arith.constant 0 : index
    %c0_10 = arith.constant 0 : index
    %12 = vector.load %arg5[%c0_9, %c0_10] : memref<64x64xbf16, #tpu.memory_space<vmem>>, vector<64x64xbf16>
    %cst_11 = arith.constant 0.353553385 : f32
    %13 = vector.broadcast %cst_11 : f32 to vector<12x64xf32>
    %14 = arith.mulf %10, %13 : vector<12x64xf32>
    %15 = arith.truncf %14 : vector<12x64xf32> to vector<12x64xbf16>
    %16 = arith.truncf %11 : vector<12x128xf32> to vector<12x128xbf16>
    %17 = tpu.iota {dimensions = array<i32: 0>} : vector<12x12xi32>
    %18 = tpu.iota {dimensions = array<i32: 1>} : vector<12x12xi32>
    %19 = arith.cmpi sgt, %18, %17 : vector<12x12xi32>
    %cst_12 = arith.constant 0.000000e+00 : f32
    %20 = vector.broadcast %cst_12 : f32 to vector<12x64xf32>
    %21 = vector.extract_strided_slice %15 {offsets = [0, 0], sizes = [12, 8], strides = [1, 1]} : vector<12x64xbf16> to vector<12x8xbf16>
    %22 = vector.extract_strided_slice %16 {offsets = [0, 0], sizes = [12, 8], strides = [1, 1]} : vector<12x128xbf16> to vector<12x8xbf16>
    %23 = vector.extract_strided_slice %16 {offsets = [0, 64], sizes = [12, 8], strides = [1, 1]} : vector<12x128xbf16> to vector<12x8xbf16>
    %cst_13 = arith.constant dense<0.000000e+00> : vector<12x12xf32>
    %24 = tpu.matmul %21, %22, %cst_13 {dimension_numbers = #tpu.dot_dimension_numbers<[1], [1], [0], [0], [0, 0, 1, 0], [], []>} : vector<12x8xbf16>, vector<12x8xbf16>, vector<12x12xf32> -> vector<12x12xf32>
    %cst_14 = arith.constant -1.000000e+30 : f32
    %25 = vector.broadcast %cst_14 : f32 to vector<12x12xf32>
    %26 = arith.select %19, %25, %24 : vector<12x12xi1>, vector<12x12xf32>
    %cst_15 = arith.constant dense<0xFF800000> : vector<12xf32>
    %27 = vector.multi_reduction <maximumf>, %26, %cst_15 [1] : vector<12x12xf32> to vector<12xf32>
    %28 = vector.shape_cast %27 : vector<12xf32> to vector<12x1xf32>
    %29 = vector.broadcast %28 : vector<12x1xf32> to vector<12x12xf32>
    %30 = arith.subf %26, %29 : vector<12x12xf32>
    %31 = math.exp %30 : vector<12x12xf32>
    %cst_16 = arith.constant dense<0.000000e+00> : vector<12xf32>
    %32 = vector.multi_reduction <add>, %31, %cst_16 [1] : vector<12x12xf32> to vector<12xf32>
    %33 = vector.shape_cast %32 : vector<12xf32> to vector<12x1xf32>
    %34 = tpu.reciprocal %33 {approx = true} : vector<12x1xf32> -> vector<12x1xf32>
    %35 = vector.broadcast %34 : vector<12x1xf32> to vector<12x12xf32>
    %36 = arith.mulf %31, %35 : vector<12x12xf32>
    %37 = arith.truncf %36 : vector<12x12xf32> to vector<12x12xbf16>
    %cst_17 = arith.constant dense<0.000000e+00> : vector<12x8xf32>
    %38 = tpu.matmul %37, %23, %cst_17 {dimension_numbers = #tpu.dot_dimension_numbers<[1], [0], [0], [1], [0, 0, 1, 1], [], []>} : vector<12x12xbf16>, vector<12x8xbf16>, vector<12x8xf32> -> vector<12x8xf32>
    %39 = arith.truncf %38 : vector<12x8xf32> to vector<12x8xbf16>
    %40 = vector.extract_strided_slice %12 {offsets = [0, 0], sizes = [8, 64], strides = [1, 1]} : vector<64x64xbf16> to vector<8x64xbf16>
    %cst_18 = arith.constant dense<0.000000e+00> : vector<12x64xf32>
    %41 = tpu.matmul %39, %40, %cst_18 {dimension_numbers = #tpu.dot_dimension_numbers<[1], [0], [0], [1], [0, 0, 1, 1], [], []>} : vector<12x8xbf16>, vector<8x64xbf16>, vector<12x64xf32> -> vector<12x64xf32>
    %42 = arith.addf %20, %41 : vector<12x64xf32>
    %43 = vector.extract_strided_slice %15 {offsets = [0, 8], sizes = [12, 8], strides = [1, 1]} : vector<12x64xbf16> to vector<12x8xbf16>
    %44 = vector.extract_strided_slice %16 {offsets = [0, 8], sizes = [12, 8], strides = [1, 1]} : vector<12x128xbf16> to vector<12x8xbf16>
    %45 = vector.extract_strided_slice %16 {offsets = [0, 72], sizes = [12, 8], strides = [1, 1]} : vector<12x128xbf16> to vector<12x8xbf16>
    %cst_19 = arith.constant dense<0.000000e+00> : vector<12x12xf32>
    %46 = tpu.matmul %43, %44, %cst_19 {dimension_numbers = #tpu.dot_dimension_numbers<[1], [1], [0], [0], [0, 0, 1, 0], [], []>} : vector<12x8xbf16>, vector<12x8xbf16>, vector<12x12xf32> -> vector<12x12xf32>
    %cst_20 = arith.constant -1.000000e+30 : f32
    %47 = vector.broadcast %cst_20 : f32 to vector<12x12xf32>
    %48 = arith.select %19, %47, %46 : vector<12x12xi1>, vector<12x12xf32>
    %cst_21 = arith.constant dense<0xFF800000> : vector<12xf32>
    %49 = vector.multi_reduction <maximumf>, %48, %cst_21 [1] : vector<12x12xf32> to vector<12xf32>
    %50 = vector.shape_cast %49 : vector<12xf32> to vector<12x1xf32>
    %51 = vector.broadcast %50 : vector<12x1xf32> to vector<12x12xf32>
    %52 = arith.subf %48, %51 : vector<12x12xf32>
    %53 = math.exp %52 : vector<12x12xf32>
    %cst_22 = arith.constant dense<0.000000e+00> : vector<12xf32>
    %54 = vector.multi_reduction <add>, %53, %cst_22 [1] : vector<12x12xf32> to vector<12xf32>
    %55 = vector.shape_cast %54 : vector<12xf32> to vector<12x1xf32>
    %56 = tpu.reciprocal %55 {approx = true} : vector<12x1xf32> -> vector<12x1xf32>
    %57 = vector.broadcast %56 : vector<12x1xf32> to vector<12x12xf32>
    %58 = arith.mulf %53, %57 : vector<12x12xf32>
    %59 = arith.truncf %58 : vector<12x12xf32> to vector<12x12xbf16>
    %cst_23 = arith.constant dense<0.000000e+00> : vector<12x8xf32>
    %60 = tpu.matmul %59, %45, %cst_23 {dimension_numbers = #tpu.dot_dimension_numbers<[1], [0], [0], [1], [0, 0, 1, 1], [], []>} : vector<12x12xbf16>, vector<12x8xbf16>, vector<12x8xf32> -> vector<12x8xf32>
    %61 = arith.truncf %60 : vector<12x8xf32> to vector<12x8xbf16>
    %62 = vector.extract_strided_slice %12 {offsets = [8, 0], sizes = [8, 64], strides = [1, 1]} : vector<64x64xbf16> to vector<8x64xbf16>
    %cst_24 = arith.constant dense<0.000000e+00> : vector<12x64xf32>
    %63 = tpu.matmul %61, %62, %cst_24 {dimension_numbers = #tpu.dot_dimension_numbers<[1], [0], [0], [1], [0, 0, 1, 1], [], []>} : vector<12x8xbf16>, vector<8x64xbf16>, vector<12x64xf32> -> vector<12x64xf32>
    %64 = arith.addf %42, %63 : vector<12x64xf32>
    %65 = vector.extract_strided_slice %15 {offsets = [0, 16], sizes = [12, 8], strides = [1, 1]} : vector<12x64xbf16> to vector<12x8xbf16>
    %66 = vector.extract_strided_slice %16 {offsets = [0, 16], sizes = [12, 8], strides = [1, 1]} : vector<12x128xbf16> to vector<12x8xbf16>
    %67 = vector.extract_strided_slice %16 {offsets = [0, 80], sizes = [12, 8], strides = [1, 1]} : vector<12x128xbf16> to vector<12x8xbf16>
    %cst_25 = arith.constant dense<0.000000e+00> : vector<12x12xf32>
    %68 = tpu.matmul %65, %66, %cst_25 {dimension_numbers = #tpu.dot_dimension_numbers<[1], [1], [0], [0], [0, 0, 1, 0], [], []>} : vector<12x8xbf16>, vector<12x8xbf16>, vector<12x12xf32> -> vector<12x12xf32>
    %cst_26 = arith.constant -1.000000e+30 : f32
    %69 = vector.broadcast %cst_26 : f32 to vector<12x12xf32>
    %70 = arith.select %19, %69, %68 : vector<12x12xi1>, vector<12x12xf32>
    %cst_27 = arith.constant dense<0xFF800000> : vector<12xf32>
    %71 = vector.multi_reduction <maximumf>, %70, %cst_27 [1] : vector<12x12xf32> to vector<12xf32>
    %72 = vector.shape_cast %71 : vector<12xf32> to vector<12x1xf32>
    %73 = vector.broadcast %72 : vector<12x1xf32> to vector<12x12xf32>
    %74 = arith.subf %70, %73 : vector<12x12xf32>
    %75 = math.exp %74 : vector<12x12xf32>
    %cst_28 = arith.constant dense<0.000000e+00> : vector<12xf32>
    %76 = vector.multi_reduction <add>, %75, %cst_28 [1] : vector<12x12xf32> to vector<12xf32>
    %77 = vector.shape_cast %76 : vector<12xf32> to vector<12x1xf32>
    %78 = tpu.reciprocal %77 {approx = true} : vector<12x1xf32> -> vector<12x1xf32>
    %79 = vector.broadcast %78 : vector<12x1xf32> to vector<12x12xf32>
    %80 = arith.mulf %75, %79 : vector<12x12xf32>
    %81 = arith.truncf %80 : vector<12x12xf32> to vector<12x12xbf16>
    %cst_29 = arith.constant dense<0.000000e+00> : vector<12x8xf32>
    %82 = tpu.matmul %81, %67, %cst_29 {dimension_numbers = #tpu.dot_dimension_numbers<[1], [0], [0], [1], [0, 0, 1, 1], [], []>} : vector<12x12xbf16>, vector<12x8xbf16>, vector<12x8xf32> -> vector<12x8xf32>
    %83 = arith.truncf %82 : vector<12x8xf32> to vector<12x8xbf16>
    %84 = vector.extract_strided_slice %12 {offsets = [16, 0], sizes = [8, 64], strides = [1, 1]} : vector<64x64xbf16> to vector<8x64xbf16>
    %cst_30 = arith.constant dense<0.000000e+00> : vector<12x64xf32>
    %85 = tpu.matmul %83, %84, %cst_30 {dimension_numbers = #tpu.dot_dimension_numbers<[1], [0], [0], [1], [0, 0, 1, 1], [], []>} : vector<12x8xbf16>, vector<8x64xbf16>, vector<12x64xf32> -> vector<12x64xf32>
    %86 = arith.addf %64, %85 : vector<12x64xf32>
    %87 = vector.extract_strided_slice %15 {offsets = [0, 24], sizes = [12, 8], strides = [1, 1]} : vector<12x64xbf16> to vector<12x8xbf16>
    %88 = vector.extract_strided_slice %16 {offsets = [0, 24], sizes = [12, 8], strides = [1, 1]} : vector<12x128xbf16> to vector<12x8xbf16>
    %89 = vector.extract_strided_slice %16 {offsets = [0, 88], sizes = [12, 8], strides = [1, 1]} : vector<12x128xbf16> to vector<12x8xbf16>
    %cst_31 = arith.constant dense<0.000000e+00> : vector<12x12xf32>
    %90 = tpu.matmul %87, %88, %cst_31 {dimension_numbers = #tpu.dot_dimension_numbers<[1], [1], [0], [0], [0, 0, 1, 0], [], []>} : vector<12x8xbf16>, vector<12x8xbf16>, vector<12x12xf32> -> vector<12x12xf32>
    %cst_32 = arith.constant -1.000000e+30 : f32
    %91 = vector.broadcast %cst_32 : f32 to vector<12x12xf32>
    %92 = arith.select %19, %91, %90 : vector<12x12xi1>, vector<12x12xf32>
    %cst_33 = arith.constant dense<0xFF800000> : vector<12xf32>
    %93 = vector.multi_reduction <maximumf>, %92, %cst_33 [1] : vector<12x12xf32> to vector<12xf32>
    %94 = vector.shape_cast %93 : vector<12xf32> to vector<12x1xf32>
    %95 = vector.broadcast %94 : vector<12x1xf32> to vector<12x12xf32>
    %96 = arith.subf %92, %95 : vector<12x12xf32>
    %97 = math.exp %96 : vector<12x12xf32>
    %cst_34 = arith.constant dense<0.000000e+00> : vector<12xf32>
    %98 = vector.multi_reduction <add>, %97, %cst_34 [1] : vector<12x12xf32> to vector<12xf32>
    %99 = vector.shape_cast %98 : vector<12xf32> to vector<12x1xf32>
    %100 = tpu.reciprocal %99 {approx = true} : vector<12x1xf32> -> vector<12x1xf32>
    %101 = vector.broadcast %100 : vector<12x1xf32> to vector<12x12xf32>
    %102 = arith.mulf %97, %101 : vector<12x12xf32>
    %103 = arith.truncf %102 : vector<12x12xf32> to vector<12x12xbf16>
    %cst_35 = arith.constant dense<0.000000e+00> : vector<12x8xf32>
    %104 = tpu.matmul %103, %89, %cst_35 {dimension_numbers = #tpu.dot_dimension_numbers<[1], [0], [0], [1], [0, 0, 1, 1], [], []>} : vector<12x12xbf16>, vector<12x8xbf16>, vector<12x8xf32> -> vector<12x8xf32>
    %105 = arith.truncf %104 : vector<12x8xf32> to vector<12x8xbf16>
    %106 = vector.extract_strided_slice %12 {offsets = [24, 0], sizes = [8, 64], strides = [1, 1]} : vector<64x64xbf16> to vector<8x64xbf16>
    %cst_36 = arith.constant dense<0.000000e+00> : vector<12x64xf32>
    %107 = tpu.matmul %105, %106, %cst_36 {dimension_numbers = #tpu.dot_dimension_numbers<[1], [0], [0], [1], [0, 0, 1, 1], [], []>} : vector<12x8xbf16>, vector<8x64xbf16>, vector<12x64xf32> -> vector<12x64xf32>
    %108 = arith.addf %86, %107 : vector<12x64xf32>
    %109 = vector.extract_strided_slice %15 {offsets = [0, 32], sizes = [12, 8], strides = [1, 1]} : vector<12x64xbf16> to vector<12x8xbf16>
    %110 = vector.extract_strided_slice %16 {offsets = [0, 32], sizes = [12, 8], strides = [1, 1]} : vector<12x128xbf16> to vector<12x8xbf16>
    %111 = vector.extract_strided_slice %16 {offsets = [0, 96], sizes = [12, 8], strides = [1, 1]} : vector<12x128xbf16> to vector<12x8xbf16>
    %cst_37 = arith.constant dense<0.000000e+00> : vector<12x12xf32>
    %112 = tpu.matmul %109, %110, %cst_37 {dimension_numbers = #tpu.dot_dimension_numbers<[1], [1], [0], [0], [0, 0, 1, 0], [], []>} : vector<12x8xbf16>, vector<12x8xbf16>, vector<12x12xf32> -> vector<12x12xf32>
    %cst_38 = arith.constant -1.000000e+30 : f32
    %113 = vector.broadcast %cst_38 : f32 to vector<12x12xf32>
    %114 = arith.select %19, %113, %112 : vector<12x12xi1>, vector<12x12xf32>
    %cst_39 = arith.constant dense<0xFF800000> : vector<12xf32>
    %115 = vector.multi_reduction <maximumf>, %114, %cst_39 [1] : vector<12x12xf32> to vector<12xf32>
    %116 = vector.shape_cast %115 : vector<12xf32> to vector<12x1xf32>
    %117 = vector.broadcast %116 : vector<12x1xf32> to vector<12x12xf32>
    %118 = arith.subf %114, %117 : vector<12x12xf32>
    %119 = math.exp %118 : vector<12x12xf32>
    %cst_40 = arith.constant dense<0.000000e+00> : vector<12xf32>
    %120 = vector.multi_reduction <add>, %119, %cst_40 [1] : vector<12x12xf32> to vector<12xf32>
    %121 = vector.shape_cast %120 : vector<12xf32> to vector<12x1xf32>
    %122 = tpu.reciprocal %121 {approx = true} : vector<12x1xf32> -> vector<12x1xf32>
    %123 = vector.broadcast %122 : vector<12x1xf32> to vector<12x12xf32>
    %124 = arith.mulf %119, %123 : vector<12x12xf32>
    %125 = arith.truncf %124 : vector<12x12xf32> to vector<12x12xbf16>
    %cst_41 = arith.constant dense<0.000000e+00> : vector<12x8xf32>
    %126 = tpu.matmul %125, %111, %cst_41 {dimension_numbers = #tpu.dot_dimension_numbers<[1], [0], [0], [1], [0, 0, 1, 1], [], []>} : vector<12x12xbf16>, vector<12x8xbf16>, vector<12x8xf32> -> vector<12x8xf32>
    %127 = arith.truncf %126 : vector<12x8xf32> to vector<12x8xbf16>
    %128 = vector.extract_strided_slice %12 {offsets = [32, 0], sizes = [8, 64], strides = [1, 1]} : vector<64x64xbf16> to vector<8x64xbf16>
    %cst_42 = arith.constant dense<0.000000e+00> : vector<12x64xf32>
    %129 = tpu.matmul %127, %128, %cst_42 {dimension_numbers = #tpu.dot_dimension_numbers<[1], [0], [0], [1], [0, 0, 1, 1], [], []>} : vector<12x8xbf16>, vector<8x64xbf16>, vector<12x64xf32> -> vector<12x64xf32>
    %130 = arith.addf %108, %129 : vector<12x64xf32>
    %131 = vector.extract_strided_slice %15 {offsets = [0, 40], sizes = [12, 8], strides = [1, 1]} : vector<12x64xbf16> to vector<12x8xbf16>
    %132 = vector.extract_strided_slice %16 {offsets = [0, 40], sizes = [12, 8], strides = [1, 1]} : vector<12x128xbf16> to vector<12x8xbf16>
    %133 = vector.extract_strided_slice %16 {offsets = [0, 104], sizes = [12, 8], strides = [1, 1]} : vector<12x128xbf16> to vector<12x8xbf16>
    %cst_43 = arith.constant dense<0.000000e+00> : vector<12x12xf32>
    %134 = tpu.matmul %131, %132, %cst_43 {dimension_numbers = #tpu.dot_dimension_numbers<[1], [1], [0], [0], [0, 0, 1, 0], [], []>} : vector<12x8xbf16>, vector<12x8xbf16>, vector<12x12xf32> -> vector<12x12xf32>
    %cst_44 = arith.constant -1.000000e+30 : f32
    %135 = vector.broadcast %cst_44 : f32 to vector<12x12xf32>
    %136 = arith.select %19, %135, %134 : vector<12x12xi1>, vector<12x12xf32>
    %cst_45 = arith.constant dense<0xFF800000> : vector<12xf32>
    %137 = vector.multi_reduction <maximumf>, %136, %cst_45 [1] : vector<12x12xf32> to vector<12xf32>
    %138 = vector.shape_cast %137 : vector<12xf32> to vector<12x1xf32>
    %139 = vector.broadcast %138 : vector<12x1xf32> to vector<12x12xf32>
    %140 = arith.subf %136, %139 : vector<12x12xf32>
    %141 = math.exp %140 : vector<12x12xf32>
    %cst_46 = arith.constant dense<0.000000e+00> : vector<12xf32>
    %142 = vector.multi_reduction <add>, %141, %cst_46 [1] : vector<12x12xf32> to vector<12xf32>
    %143 = vector.shape_cast %142 : vector<12xf32> to vector<12x1xf32>
    %144 = tpu.reciprocal %143 {approx = true} : vector<12x1xf32> -> vector<12x1xf32>
    %145 = vector.broadcast %144 : vector<12x1xf32> to vector<12x12xf32>
    %146 = arith.mulf %141, %145 : vector<12x12xf32>
    %147 = arith.truncf %146 : vector<12x12xf32> to vector<12x12xbf16>
    %cst_47 = arith.constant dense<0.000000e+00> : vector<12x8xf32>
    %148 = tpu.matmul %147, %133, %cst_47 {dimension_numbers = #tpu.dot_dimension_numbers<[1], [0], [0], [1], [0, 0, 1, 1], [], []>} : vector<12x12xbf16>, vector<12x8xbf16>, vector<12x8xf32> -> vector<12x8xf32>
    %149 = arith.truncf %148 : vector<12x8xf32> to vector<12x8xbf16>
    %150 = vector.extract_strided_slice %12 {offsets = [40, 0], sizes = [8, 64], strides = [1, 1]} : vector<64x64xbf16> to vector<8x64xbf16>
    %cst_48 = arith.constant dense<0.000000e+00> : vector<12x64xf32>
    %151 = tpu.matmul %149, %150, %cst_48 {dimension_numbers = #tpu.dot_dimension_numbers<[1], [0], [0], [1], [0, 0, 1, 1], [], []>} : vector<12x8xbf16>, vector<8x64xbf16>, vector<12x64xf32> -> vector<12x64xf32>
    %152 = arith.addf %130, %151 : vector<12x64xf32>
    %153 = vector.extract_strided_slice %15 {offsets = [0, 48], sizes = [12, 8], strides = [1, 1]} : vector<12x64xbf16> to vector<12x8xbf16>
    %154 = vector.extract_strided_slice %16 {offsets = [0, 48], sizes = [12, 8], strides = [1, 1]} : vector<12x128xbf16> to vector<12x8xbf16>
    %155 = vector.extract_strided_slice %16 {offsets = [0, 112], sizes = [12, 8], strides = [1, 1]} : vector<12x128xbf16> to vector<12x8xbf16>
    %cst_49 = arith.constant dense<0.000000e+00> : vector<12x12xf32>
    %156 = tpu.matmul %153, %154, %cst_49 {dimension_numbers = #tpu.dot_dimension_numbers<[1], [1], [0], [0], [0, 0, 1, 0], [], []>} : vector<12x8xbf16>, vector<12x8xbf16>, vector<12x12xf32> -> vector<12x12xf32>
    %cst_50 = arith.constant -1.000000e+30 : f32
    %157 = vector.broadcast %cst_50 : f32 to vector<12x12xf32>
    %158 = arith.select %19, %157, %156 : vector<12x12xi1>, vector<12x12xf32>
    %cst_51 = arith.constant dense<0xFF800000> : vector<12xf32>
    %159 = vector.multi_reduction <maximumf>, %158, %cst_51 [1] : vector<12x12xf32> to vector<12xf32>
    %160 = vector.shape_cast %159 : vector<12xf32> to vector<12x1xf32>
    %161 = vector.broadcast %160 : vector<12x1xf32> to vector<12x12xf32>
    %162 = arith.subf %158, %161 : vector<12x12xf32>
    %163 = math.exp %162 : vector<12x12xf32>
    %cst_52 = arith.constant dense<0.000000e+00> : vector<12xf32>
    %164 = vector.multi_reduction <add>, %163, %cst_52 [1] : vector<12x12xf32> to vector<12xf32>
    %165 = vector.shape_cast %164 : vector<12xf32> to vector<12x1xf32>
    %166 = tpu.reciprocal %165 {approx = true} : vector<12x1xf32> -> vector<12x1xf32>
    %167 = vector.broadcast %166 : vector<12x1xf32> to vector<12x12xf32>
    %168 = arith.mulf %163, %167 : vector<12x12xf32>
    %169 = arith.truncf %168 : vector<12x12xf32> to vector<12x12xbf16>
    %cst_53 = arith.constant dense<0.000000e+00> : vector<12x8xf32>
    %170 = tpu.matmul %169, %155, %cst_53 {dimension_numbers = #tpu.dot_dimension_numbers<[1], [0], [0], [1], [0, 0, 1, 1], [], []>} : vector<12x12xbf16>, vector<12x8xbf16>, vector<12x8xf32> -> vector<12x8xf32>
    %171 = arith.truncf %170 : vector<12x8xf32> to vector<12x8xbf16>
    %172 = vector.extract_strided_slice %12 {offsets = [48, 0], sizes = [8, 64], strides = [1, 1]} : vector<64x64xbf16> to vector<8x64xbf16>
    %cst_54 = arith.constant dense<0.000000e+00> : vector<12x64xf32>
    %173 = tpu.matmul %171, %172, %cst_54 {dimension_numbers = #tpu.dot_dimension_numbers<[1], [0], [0], [1], [0, 0, 1, 1], [], []>} : vector<12x8xbf16>, vector<8x64xbf16>, vector<12x64xf32> -> vector<12x64xf32>
    %174 = arith.addf %152, %173 : vector<12x64xf32>
    %175 = vector.extract_strided_slice %15 {offsets = [0, 56], sizes = [12, 8], strides = [1, 1]} : vector<12x64xbf16> to vector<12x8xbf16>
    %176 = vector.extract_strided_slice %16 {offsets = [0, 56], sizes = [12, 8], strides = [1, 1]} : vector<12x128xbf16> to vector<12x8xbf16>
    %177 = vector.extract_strided_slice %16 {offsets = [0, 120], sizes = [12, 8], strides = [1, 1]} : vector<12x128xbf16> to vector<12x8xbf16>
    %cst_55 = arith.constant dense<0.000000e+00> : vector<12x12xf32>
    %178 = tpu.matmul %175, %176, %cst_55 {dimension_numbers = #tpu.dot_dimension_numbers<[1], [1], [0], [0], [0, 0, 1, 0], [], []>} : vector<12x8xbf16>, vector<12x8xbf16>, vector<12x12xf32> -> vector<12x12xf32>
    %cst_56 = arith.constant -1.000000e+30 : f32
    %179 = vector.broadcast %cst_56 : f32 to vector<12x12xf32>
    %180 = arith.select %19, %179, %178 : vector<12x12xi1>, vector<12x12xf32>
    %cst_57 = arith.constant dense<0xFF800000> : vector<12xf32>
    %181 = vector.multi_reduction <maximumf>, %180, %cst_57 [1] : vector<12x12xf32> to vector<12xf32>
    %182 = vector.shape_cast %181 : vector<12xf32> to vector<12x1xf32>
    %183 = vector.broadcast %182 : vector<12x1xf32> to vector<12x12xf32>
    %184 = arith.subf %180, %183 : vector<12x12xf32>
    %185 = math.exp %184 : vector<12x12xf32>
    %cst_58 = arith.constant dense<0.000000e+00> : vector<12xf32>
    %186 = vector.multi_reduction <add>, %185, %cst_58 [1] : vector<12x12xf32> to vector<12xf32>
    %187 = vector.shape_cast %186 : vector<12xf32> to vector<12x1xf32>
    %188 = tpu.reciprocal %187 {approx = true} : vector<12x1xf32> -> vector<12x1xf32>
    %189 = vector.broadcast %188 : vector<12x1xf32> to vector<12x12xf32>
    %190 = arith.mulf %185, %189 : vector<12x12xf32>
    %191 = arith.truncf %190 : vector<12x12xf32> to vector<12x12xbf16>
    %cst_59 = arith.constant dense<0.000000e+00> : vector<12x8xf32>
    %192 = tpu.matmul %191, %177, %cst_59 {dimension_numbers = #tpu.dot_dimension_numbers<[1], [0], [0], [1], [0, 0, 1, 1], [], []>} : vector<12x12xbf16>, vector<12x8xbf16>, vector<12x8xf32> -> vector<12x8xf32>
    %193 = arith.truncf %192 : vector<12x8xf32> to vector<12x8xbf16>
    %194 = vector.extract_strided_slice %12 {offsets = [56, 0], sizes = [8, 64], strides = [1, 1]} : vector<64x64xbf16> to vector<8x64xbf16>
    %cst_60 = arith.constant dense<0.000000e+00> : vector<12x64xf32>
    %195 = tpu.matmul %193, %194, %cst_60 {dimension_numbers = #tpu.dot_dimension_numbers<[1], [0], [0], [1], [0, 0, 1, 1], [], []>} : vector<12x8xbf16>, vector<8x64xbf16>, vector<12x64xf32> -> vector<12x64xf32>
    %196 = arith.addf %174, %195 : vector<12x64xf32>
    %197 = arith.addf %1, %196 : vector<12x64xf32>
    %c0_61 = arith.constant 0 : index
    %c0_62 = arith.constant 0 : index
    %198 = vector.load %arg6[%c0_61, %c0_62] : memref<1x64xf32, #tpu.memory_space<vmem>>, vector<1x64xf32>
    %199 = vector.broadcast %198 : vector<1x64xf32> to vector<12x64xf32>
    %200 = arith.addf %197, %199 : vector<12x64xf32>
    %c0_63 = arith.constant 0 : index
    %c0_64 = arith.constant 0 : index
    %201 = vector.load %arg7[%c0_63, %c0_64] : memref<1x64xf32, #tpu.memory_space<vmem>>, vector<1x64xf32>
    %c0_65 = arith.constant 0 : index
    %c0_66 = arith.constant 0 : index
    %202 = vector.load %arg8[%c0_65, %c0_66] : memref<1x64xf32, #tpu.memory_space<vmem>>, vector<1x64xf32>
    %cst_67 = arith.constant dense<0.000000e+00> : vector<12xf32>
    %203 = vector.multi_reduction <add>, %200, %cst_67 [1] : vector<12x64xf32> to vector<12xf32>
    %204 = vector.shape_cast %203 : vector<12xf32> to vector<12x1xf32>
    %cst_68 = arith.constant 6.400000e+01 : f32
    %205 = vector.broadcast %cst_68 : f32 to vector<12x1xf32>
    %206 = arith.divf %204, %205 : vector<12x1xf32>
    %207 = vector.broadcast %206 : vector<12x1xf32> to vector<12x64xf32>
    %208 = arith.subf %200, %207 : vector<12x64xf32>
    %209 = arith.mulf %208, %208 : vector<12x64xf32>
    %cst_69 = arith.constant dense<0.000000e+00> : vector<12xf32>
    %210 = vector.multi_reduction <add>, %209, %cst_69 [1] : vector<12x64xf32> to vector<12xf32>
    %211 = vector.shape_cast %210 : vector<12xf32> to vector<12x1xf32>
    %cst_70 = arith.constant 6.400000e+01 : f32
    %212 = vector.broadcast %cst_70 : f32 to vector<12x1xf32>
    %213 = arith.divf %211, %212 : vector<12x1xf32>
    %214 = vector.broadcast %206 : vector<12x1xf32> to vector<12x64xf32>
    %215 = arith.subf %200, %214 : vector<12x64xf32>
    %cst_71 = arith.constant 9.99999974E-6 : f32
    %216 = vector.broadcast %cst_71 : f32 to vector<12x1xf32>
    %217 = arith.addf %213, %216 : vector<12x1xf32>
    %218 = math.rsqrt %217 : vector<12x1xf32>
    %219 = vector.broadcast %218 : vector<12x1xf32> to vector<12x64xf32>
    %220 = arith.mulf %215, %219 : vector<12x64xf32>
    %221 = vector.broadcast %201 : vector<1x64xf32> to vector<12x64xf32>
    %222 = arith.mulf %220, %221 : vector<12x64xf32>
    %223 = vector.broadcast %202 : vector<1x64xf32> to vector<12x64xf32>
    %224 = arith.addf %222, %223 : vector<12x64xf32>
    %225 = arith.truncf %224 : vector<12x64xf32> to vector<12x64xbf16>
    %c0_72 = arith.constant 0 : index
    %c0_73 = arith.constant 0 : index
    %226 = vector.load %arg9[%c0_72, %c0_73] : memref<64x64xbf16, #tpu.memory_space<vmem>>, vector<64x64xbf16>
    %cst_74 = arith.constant dense<0.000000e+00> : vector<12x64xf32>
    %227 = tpu.matmul %225, %226, %cst_74 {dimension_numbers = #tpu.dot_dimension_numbers<[1], [0], [0], [1], [0, 0, 1, 1], [], []>} : vector<12x64xbf16>, vector<64x64xbf16>, vector<12x64xf32> -> vector<12x64xf32>
    %c0_75 = arith.constant 0 : index
    %c0_76 = arith.constant 0 : index
    %228 = vector.load %arg10[%c0_75, %c0_76] : memref<1x64xf32, #tpu.memory_space<vmem>>, vector<1x64xf32>
    %229 = vector.broadcast %228 : vector<1x64xf32> to vector<12x64xf32>
    %230 = arith.addf %227, %229 : vector<12x64xf32>
    %231 = arith.truncf %3 : vector<16x64xf32> to vector<16x64xbf16>
    %c0_77 = arith.constant 0 : index
    %c0_78 = arith.constant 0 : index
    %232 = vector.load %arg11[%c0_77, %c0_78] : memref<64x128xbf16, #tpu.memory_space<vmem>>, vector<64x128xbf16>
    %cst_79 = arith.constant dense<0.000000e+00> : vector<16x128xf32>
    %233 = tpu.matmul %231, %232, %cst_79 {dimension_numbers = #tpu.dot_dimension_numbers<[1], [0], [0], [1], [0, 0, 1, 1], [], []>} : vector<16x64xbf16>, vector<64x128xbf16>, vector<16x128xf32> -> vector<16x128xf32>
    %c0_80 = arith.constant 0 : index
    %c0_81 = arith.constant 0 : index
    %234 = vector.load %arg12[%c0_80, %c0_81] : memref<1x128xf32, #tpu.memory_space<vmem>>, vector<1x128xf32>
    %235 = vector.broadcast %234 : vector<1x128xf32> to vector<16x128xf32>
    %236 = arith.addf %233, %235 : vector<16x128xf32>
    %c0_82 = arith.constant 0 : index
    %c0_83 = arith.constant 0 : index
    %237 = vector.load %arg13[%c0_82, %c0_83] : memref<64x64xbf16, #tpu.memory_space<vmem>>, vector<64x64xbf16>
    %cst_84 = arith.constant 0.353553385 : f32
    %238 = vector.broadcast %cst_84 : f32 to vector<12x64xf32>
    %239 = arith.mulf %230, %238 : vector<12x64xf32>
    %240 = arith.truncf %239 : vector<12x64xf32> to vector<12x64xbf16>
    %241 = arith.truncf %236 : vector<16x128xf32> to vector<16x128xbf16>
    %cst_85 = arith.constant 0.000000e+00 : f32
    %242 = vector.broadcast %cst_85 : f32 to vector<12x64xf32>
    %243 = vector.extract_strided_slice %240 {offsets = [0, 0], sizes = [12, 8], strides = [1, 1]} : vector<12x64xbf16> to vector<12x8xbf16>
    %244 = vector.extract_strided_slice %241 {offsets = [0, 0], sizes = [16, 8], strides = [1, 1]} : vector<16x128xbf16> to vector<16x8xbf16>
    %245 = vector.extract_strided_slice %241 {offsets = [0, 64], sizes = [16, 8], strides = [1, 1]} : vector<16x128xbf16> to vector<16x8xbf16>
    %cst_86 = arith.constant dense<0.000000e+00> : vector<12x16xf32>
    %246 = tpu.matmul %243, %244, %cst_86 {dimension_numbers = #tpu.dot_dimension_numbers<[1], [1], [0], [0], [0, 0, 1, 0], [], []>} : vector<12x8xbf16>, vector<16x8xbf16>, vector<12x16xf32> -> vector<12x16xf32>
    %cst_87 = arith.constant dense<0xFF800000> : vector<12xf32>
    %247 = vector.multi_reduction <maximumf>, %246, %cst_87 [1] : vector<12x16xf32> to vector<12xf32>
    %248 = vector.shape_cast %247 : vector<12xf32> to vector<12x1xf32>
    %249 = vector.broadcast %248 : vector<12x1xf32> to vector<12x16xf32>
    %250 = arith.subf %246, %249 : vector<12x16xf32>
    %251 = math.exp %250 : vector<12x16xf32>
    %cst_88 = arith.constant dense<0.000000e+00> : vector<12xf32>
    %252 = vector.multi_reduction <add>, %251, %cst_88 [1] : vector<12x16xf32> to vector<12xf32>
    %253 = vector.shape_cast %252 : vector<12xf32> to vector<12x1xf32>
    %254 = tpu.reciprocal %253 {approx = true} : vector<12x1xf32> -> vector<12x1xf32>
    %255 = vector.broadcast %254 : vector<12x1xf32> to vector<12x16xf32>
    %256 = arith.mulf %251, %255 : vector<12x16xf32>
    %257 = arith.truncf %256 : vector<12x16xf32> to vector<12x16xbf16>
    %cst_89 = arith.constant dense<0.000000e+00> : vector<12x8xf32>
    %258 = tpu.matmul %257, %245, %cst_89 {dimension_numbers = #tpu.dot_dimension_numbers<[1], [0], [0], [1], [0, 0, 1, 1], [], []>} : vector<12x16xbf16>, vector<16x8xbf16>, vector<12x8xf32> -> vector<12x8xf32>
    %259 = arith.truncf %258 : vector<12x8xf32> to vector<12x8xbf16>
    %260 = vector.extract_strided_slice %237 {offsets = [0, 0], sizes = [8, 64], strides = [1, 1]} : vector<64x64xbf16> to vector<8x64xbf16>
    %cst_90 = arith.constant dense<0.000000e+00> : vector<12x64xf32>
    %261 = tpu.matmul %259, %260, %cst_90 {dimension_numbers = #tpu.dot_dimension_numbers<[1], [0], [0], [1], [0, 0, 1, 1], [], []>} : vector<12x8xbf16>, vector<8x64xbf16>, vector<12x64xf32> -> vector<12x64xf32>
    %262 = arith.addf %242, %261 : vector<12x64xf32>
    %263 = vector.extract_strided_slice %240 {offsets = [0, 8], sizes = [12, 8], strides = [1, 1]} : vector<12x64xbf16> to vector<12x8xbf16>
    %264 = vector.extract_strided_slice %241 {offsets = [0, 8], sizes = [16, 8], strides = [1, 1]} : vector<16x128xbf16> to vector<16x8xbf16>
    %265 = vector.extract_strided_slice %241 {offsets = [0, 72], sizes = [16, 8], strides = [1, 1]} : vector<16x128xbf16> to vector<16x8xbf16>
    %cst_91 = arith.constant dense<0.000000e+00> : vector<12x16xf32>
    %266 = tpu.matmul %263, %264, %cst_91 {dimension_numbers = #tpu.dot_dimension_numbers<[1], [1], [0], [0], [0, 0, 1, 0], [], []>} : vector<12x8xbf16>, vector<16x8xbf16>, vector<12x16xf32> -> vector<12x16xf32>
    %cst_92 = arith.constant dense<0xFF800000> : vector<12xf32>
    %267 = vector.multi_reduction <maximumf>, %266, %cst_92 [1] : vector<12x16xf32> to vector<12xf32>
    %268 = vector.shape_cast %267 : vector<12xf32> to vector<12x1xf32>
    %269 = vector.broadcast %268 : vector<12x1xf32> to vector<12x16xf32>
    %270 = arith.subf %266, %269 : vector<12x16xf32>
    %271 = math.exp %270 : vector<12x16xf32>
    %cst_93 = arith.constant dense<0.000000e+00> : vector<12xf32>
    %272 = vector.multi_reduction <add>, %271, %cst_93 [1] : vector<12x16xf32> to vector<12xf32>
    %273 = vector.shape_cast %272 : vector<12xf32> to vector<12x1xf32>
    %274 = tpu.reciprocal %273 {approx = true} : vector<12x1xf32> -> vector<12x1xf32>
    %275 = vector.broadcast %274 : vector<12x1xf32> to vector<12x16xf32>
    %276 = arith.mulf %271, %275 : vector<12x16xf32>
    %277 = arith.truncf %276 : vector<12x16xf32> to vector<12x16xbf16>
    %cst_94 = arith.constant dense<0.000000e+00> : vector<12x8xf32>
    %278 = tpu.matmul %277, %265, %cst_94 {dimension_numbers = #tpu.dot_dimension_numbers<[1], [0], [0], [1], [0, 0, 1, 1], [], []>} : vector<12x16xbf16>, vector<16x8xbf16>, vector<12x8xf32> -> vector<12x8xf32>
    %279 = arith.truncf %278 : vector<12x8xf32> to vector<12x8xbf16>
    %280 = vector.extract_strided_slice %237 {offsets = [8, 0], sizes = [8, 64], strides = [1, 1]} : vector<64x64xbf16> to vector<8x64xbf16>
    %cst_95 = arith.constant dense<0.000000e+00> : vector<12x64xf32>
    %281 = tpu.matmul %279, %280, %cst_95 {dimension_numbers = #tpu.dot_dimension_numbers<[1], [0], [0], [1], [0, 0, 1, 1], [], []>} : vector<12x8xbf16>, vector<8x64xbf16>, vector<12x64xf32> -> vector<12x64xf32>
    %282 = arith.addf %262, %281 : vector<12x64xf32>
    %283 = vector.extract_strided_slice %240 {offsets = [0, 16], sizes = [12, 8], strides = [1, 1]} : vector<12x64xbf16> to vector<12x8xbf16>
    %284 = vector.extract_strided_slice %241 {offsets = [0, 16], sizes = [16, 8], strides = [1, 1]} : vector<16x128xbf16> to vector<16x8xbf16>
    %285 = vector.extract_strided_slice %241 {offsets = [0, 80], sizes = [16, 8], strides = [1, 1]} : vector<16x128xbf16> to vector<16x8xbf16>
    %cst_96 = arith.constant dense<0.000000e+00> : vector<12x16xf32>
    %286 = tpu.matmul %283, %284, %cst_96 {dimension_numbers = #tpu.dot_dimension_numbers<[1], [1], [0], [0], [0, 0, 1, 0], [], []>} : vector<12x8xbf16>, vector<16x8xbf16>, vector<12x16xf32> -> vector<12x16xf32>
    %cst_97 = arith.constant dense<0xFF800000> : vector<12xf32>
    %287 = vector.multi_reduction <maximumf>, %286, %cst_97 [1] : vector<12x16xf32> to vector<12xf32>
    %288 = vector.shape_cast %287 : vector<12xf32> to vector<12x1xf32>
    %289 = vector.broadcast %288 : vector<12x1xf32> to vector<12x16xf32>
    %290 = arith.subf %286, %289 : vector<12x16xf32>
    %291 = math.exp %290 : vector<12x16xf32>
    %cst_98 = arith.constant dense<0.000000e+00> : vector<12xf32>
    %292 = vector.multi_reduction <add>, %291, %cst_98 [1] : vector<12x16xf32> to vector<12xf32>
    %293 = vector.shape_cast %292 : vector<12xf32> to vector<12x1xf32>
    %294 = tpu.reciprocal %293 {approx = true} : vector<12x1xf32> -> vector<12x1xf32>
    %295 = vector.broadcast %294 : vector<12x1xf32> to vector<12x16xf32>
    %296 = arith.mulf %291, %295 : vector<12x16xf32>
    %297 = arith.truncf %296 : vector<12x16xf32> to vector<12x16xbf16>
    %cst_99 = arith.constant dense<0.000000e+00> : vector<12x8xf32>
    %298 = tpu.matmul %297, %285, %cst_99 {dimension_numbers = #tpu.dot_dimension_numbers<[1], [0], [0], [1], [0, 0, 1, 1], [], []>} : vector<12x16xbf16>, vector<16x8xbf16>, vector<12x8xf32> -> vector<12x8xf32>
    %299 = arith.truncf %298 : vector<12x8xf32> to vector<12x8xbf16>
    %300 = vector.extract_strided_slice %237 {offsets = [16, 0], sizes = [8, 64], strides = [1, 1]} : vector<64x64xbf16> to vector<8x64xbf16>
    %cst_100 = arith.constant dense<0.000000e+00> : vector<12x64xf32>
    %301 = tpu.matmul %299, %300, %cst_100 {dimension_numbers = #tpu.dot_dimension_numbers<[1], [0], [0], [1], [0, 0, 1, 1], [], []>} : vector<12x8xbf16>, vector<8x64xbf16>, vector<12x64xf32> -> vector<12x64xf32>
    %302 = arith.addf %282, %301 : vector<12x64xf32>
    %303 = vector.extract_strided_slice %240 {offsets = [0, 24], sizes = [12, 8], strides = [1, 1]} : vector<12x64xbf16> to vector<12x8xbf16>
    %304 = vector.extract_strided_slice %241 {offsets = [0, 24], sizes = [16, 8], strides = [1, 1]} : vector<16x128xbf16> to vector<16x8xbf16>
    %305 = vector.extract_strided_slice %241 {offsets = [0, 88], sizes = [16, 8], strides = [1, 1]} : vector<16x128xbf16> to vector<16x8xbf16>
    %cst_101 = arith.constant dense<0.000000e+00> : vector<12x16xf32>
    %306 = tpu.matmul %303, %304, %cst_101 {dimension_numbers = #tpu.dot_dimension_numbers<[1], [1], [0], [0], [0, 0, 1, 0], [], []>} : vector<12x8xbf16>, vector<16x8xbf16>, vector<12x16xf32> -> vector<12x16xf32>
    %cst_102 = arith.constant dense<0xFF800000> : vector<12xf32>
    %307 = vector.multi_reduction <maximumf>, %306, %cst_102 [1] : vector<12x16xf32> to vector<12xf32>
    %308 = vector.shape_cast %307 : vector<12xf32> to vector<12x1xf32>
    %309 = vector.broadcast %308 : vector<12x1xf32> to vector<12x16xf32>
    %310 = arith.subf %306, %309 : vector<12x16xf32>
    %311 = math.exp %310 : vector<12x16xf32>
    %cst_103 = arith.constant dense<0.000000e+00> : vector<12xf32>
    %312 = vector.multi_reduction <add>, %311, %cst_103 [1] : vector<12x16xf32> to vector<12xf32>
    %313 = vector.shape_cast %312 : vector<12xf32> to vector<12x1xf32>
    %314 = tpu.reciprocal %313 {approx = true} : vector<12x1xf32> -> vector<12x1xf32>
    %315 = vector.broadcast %314 : vector<12x1xf32> to vector<12x16xf32>
    %316 = arith.mulf %311, %315 : vector<12x16xf32>
    %317 = arith.truncf %316 : vector<12x16xf32> to vector<12x16xbf16>
    %cst_104 = arith.constant dense<0.000000e+00> : vector<12x8xf32>
    %318 = tpu.matmul %317, %305, %cst_104 {dimension_numbers = #tpu.dot_dimension_numbers<[1], [0], [0], [1], [0, 0, 1, 1], [], []>} : vector<12x16xbf16>, vector<16x8xbf16>, vector<12x8xf32> -> vector<12x8xf32>
    %319 = arith.truncf %318 : vector<12x8xf32> to vector<12x8xbf16>
    %320 = vector.extract_strided_slice %237 {offsets = [24, 0], sizes = [8, 64], strides = [1, 1]} : vector<64x64xbf16> to vector<8x64xbf16>
    %cst_105 = arith.constant dense<0.000000e+00> : vector<12x64xf32>
    %321 = tpu.matmul %319, %320, %cst_105 {dimension_numbers = #tpu.dot_dimension_numbers<[1], [0], [0], [1], [0, 0, 1, 1], [], []>} : vector<12x8xbf16>, vector<8x64xbf16>, vector<12x64xf32> -> vector<12x64xf32>
    %322 = arith.addf %302, %321 : vector<12x64xf32>
    %323 = vector.extract_strided_slice %240 {offsets = [0, 32], sizes = [12, 8], strides = [1, 1]} : vector<12x64xbf16> to vector<12x8xbf16>
    %324 = vector.extract_strided_slice %241 {offsets = [0, 32], sizes = [16, 8], strides = [1, 1]} : vector<16x128xbf16> to vector<16x8xbf16>
    %325 = vector.extract_strided_slice %241 {offsets = [0, 96], sizes = [16, 8], strides = [1, 1]} : vector<16x128xbf16> to vector<16x8xbf16>
    %cst_106 = arith.constant dense<0.000000e+00> : vector<12x16xf32>
    %326 = tpu.matmul %323, %324, %cst_106 {dimension_numbers = #tpu.dot_dimension_numbers<[1], [1], [0], [0], [0, 0, 1, 0], [], []>} : vector<12x8xbf16>, vector<16x8xbf16>, vector<12x16xf32> -> vector<12x16xf32>
    %cst_107 = arith.constant dense<0xFF800000> : vector<12xf32>
    %327 = vector.multi_reduction <maximumf>, %326, %cst_107 [1] : vector<12x16xf32> to vector<12xf32>
    %328 = vector.shape_cast %327 : vector<12xf32> to vector<12x1xf32>
    %329 = vector.broadcast %328 : vector<12x1xf32> to vector<12x16xf32>
    %330 = arith.subf %326, %329 : vector<12x16xf32>
    %331 = math.exp %330 : vector<12x16xf32>
    %cst_108 = arith.constant dense<0.000000e+00> : vector<12xf32>
    %332 = vector.multi_reduction <add>, %331, %cst_108 [1] : vector<12x16xf32> to vector<12xf32>
    %333 = vector.shape_cast %332 : vector<12xf32> to vector<12x1xf32>
    %334 = tpu.reciprocal %333 {approx = true} : vector<12x1xf32> -> vector<12x1xf32>
    %335 = vector.broadcast %334 : vector<12x1xf32> to vector<12x16xf32>
    %336 = arith.mulf %331, %335 : vector<12x16xf32>
    %337 = arith.truncf %336 : vector<12x16xf32> to vector<12x16xbf16>
    %cst_109 = arith.constant dense<0.000000e+00> : vector<12x8xf32>
    %338 = tpu.matmul %337, %325, %cst_109 {dimension_numbers = #tpu.dot_dimension_numbers<[1], [0], [0], [1], [0, 0, 1, 1], [], []>} : vector<12x16xbf16>, vector<16x8xbf16>, vector<12x8xf32> -> vector<12x8xf32>
    %339 = arith.truncf %338 : vector<12x8xf32> to vector<12x8xbf16>
    %340 = vector.extract_strided_slice %237 {offsets = [32, 0], sizes = [8, 64], strides = [1, 1]} : vector<64x64xbf16> to vector<8x64xbf16>
    %cst_110 = arith.constant dense<0.000000e+00> : vector<12x64xf32>
    %341 = tpu.matmul %339, %340, %cst_110 {dimension_numbers = #tpu.dot_dimension_numbers<[1], [0], [0], [1], [0, 0, 1, 1], [], []>} : vector<12x8xbf16>, vector<8x64xbf16>, vector<12x64xf32> -> vector<12x64xf32>
    %342 = arith.addf %322, %341 : vector<12x64xf32>
    %343 = vector.extract_strided_slice %240 {offsets = [0, 40], sizes = [12, 8], strides = [1, 1]} : vector<12x64xbf16> to vector<12x8xbf16>
    %344 = vector.extract_strided_slice %241 {offsets = [0, 40], sizes = [16, 8], strides = [1, 1]} : vector<16x128xbf16> to vector<16x8xbf16>
    %345 = vector.extract_strided_slice %241 {offsets = [0, 104], sizes = [16, 8], strides = [1, 1]} : vector<16x128xbf16> to vector<16x8xbf16>
    %cst_111 = arith.constant dense<0.000000e+00> : vector<12x16xf32>
    %346 = tpu.matmul %343, %344, %cst_111 {dimension_numbers = #tpu.dot_dimension_numbers<[1], [1], [0], [0], [0, 0, 1, 0], [], []>} : vector<12x8xbf16>, vector<16x8xbf16>, vector<12x16xf32> -> vector<12x16xf32>
    %cst_112 = arith.constant dense<0xFF800000> : vector<12xf32>
    %347 = vector.multi_reduction <maximumf>, %346, %cst_112 [1] : vector<12x16xf32> to vector<12xf32>
    %348 = vector.shape_cast %347 : vector<12xf32> to vector<12x1xf32>
    %349 = vector.broadcast %348 : vector<12x1xf32> to vector<12x16xf32>
    %350 = arith.subf %346, %349 : vector<12x16xf32>
    %351 = math.exp %350 : vector<12x16xf32>
    %cst_113 = arith.constant dense<0.000000e+00> : vector<12xf32>
    %352 = vector.multi_reduction <add>, %351, %cst_113 [1] : vector<12x16xf32> to vector<12xf32>
    %353 = vector.shape_cast %352 : vector<12xf32> to vector<12x1xf32>
    %354 = tpu.reciprocal %353 {approx = true} : vector<12x1xf32> -> vector<12x1xf32>
    %355 = vector.broadcast %354 : vector<12x1xf32> to vector<12x16xf32>
    %356 = arith.mulf %351, %355 : vector<12x16xf32>
    %357 = arith.truncf %356 : vector<12x16xf32> to vector<12x16xbf16>
    %cst_114 = arith.constant dense<0.000000e+00> : vector<12x8xf32>
    %358 = tpu.matmul %357, %345, %cst_114 {dimension_numbers = #tpu.dot_dimension_numbers<[1], [0], [0], [1], [0, 0, 1, 1], [], []>} : vector<12x16xbf16>, vector<16x8xbf16>, vector<12x8xf32> -> vector<12x8xf32>
    %359 = arith.truncf %358 : vector<12x8xf32> to vector<12x8xbf16>
    %360 = vector.extract_strided_slice %237 {offsets = [40, 0], sizes = [8, 64], strides = [1, 1]} : vector<64x64xbf16> to vector<8x64xbf16>
    %cst_115 = arith.constant dense<0.000000e+00> : vector<12x64xf32>
    %361 = tpu.matmul %359, %360, %cst_115 {dimension_numbers = #tpu.dot_dimension_numbers<[1], [0], [0], [1], [0, 0, 1, 1], [], []>} : vector<12x8xbf16>, vector<8x64xbf16>, vector<12x64xf32> -> vector<12x64xf32>
    %362 = arith.addf %342, %361 : vector<12x64xf32>
    %363 = vector.extract_strided_slice %240 {offsets = [0, 48], sizes = [12, 8], strides = [1, 1]} : vector<12x64xbf16> to vector<12x8xbf16>
    %364 = vector.extract_strided_slice %241 {offsets = [0, 48], sizes = [16, 8], strides = [1, 1]} : vector<16x128xbf16> to vector<16x8xbf16>
    %365 = vector.extract_strided_slice %241 {offsets = [0, 112], sizes = [16, 8], strides = [1, 1]} : vector<16x128xbf16> to vector<16x8xbf16>
    %cst_116 = arith.constant dense<0.000000e+00> : vector<12x16xf32>
    %366 = tpu.matmul %363, %364, %cst_116 {dimension_numbers = #tpu.dot_dimension_numbers<[1], [1], [0], [0], [0, 0, 1, 0], [], []>} : vector<12x8xbf16>, vector<16x8xbf16>, vector<12x16xf32> -> vector<12x16xf32>
    %cst_117 = arith.constant dense<0xFF800000> : vector<12xf32>
    %367 = vector.multi_reduction <maximumf>, %366, %cst_117 [1] : vector<12x16xf32> to vector<12xf32>
    %368 = vector.shape_cast %367 : vector<12xf32> to vector<12x1xf32>
    %369 = vector.broadcast %368 : vector<12x1xf32> to vector<12x16xf32>
    %370 = arith.subf %366, %369 : vector<12x16xf32>
    %371 = math.exp %370 : vector<12x16xf32>
    %cst_118 = arith.constant dense<0.000000e+00> : vector<12xf32>
    %372 = vector.multi_reduction <add>, %371, %cst_118 [1] : vector<12x16xf32> to vector<12xf32>
    %373 = vector.shape_cast %372 : vector<12xf32> to vector<12x1xf32>
    %374 = tpu.reciprocal %373 {approx = true} : vector<12x1xf32> -> vector<12x1xf32>
    %375 = vector.broadcast %374 : vector<12x1xf32> to vector<12x16xf32>
    %376 = arith.mulf %371, %375 : vector<12x16xf32>
    %377 = arith.truncf %376 : vector<12x16xf32> to vector<12x16xbf16>
    %cst_119 = arith.constant dense<0.000000e+00> : vector<12x8xf32>
    %378 = tpu.matmul %377, %365, %cst_119 {dimension_numbers = #tpu.dot_dimension_numbers<[1], [0], [0], [1], [0, 0, 1, 1], [], []>} : vector<12x16xbf16>, vector<16x8xbf16>, vector<12x8xf32> -> vector<12x8xf32>
    %379 = arith.truncf %378 : vector<12x8xf32> to vector<12x8xbf16>
    %380 = vector.extract_strided_slice %237 {offsets = [48, 0], sizes = [8, 64], strides = [1, 1]} : vector<64x64xbf16> to vector<8x64xbf16>
    %cst_120 = arith.constant dense<0.000000e+00> : vector<12x64xf32>
    %381 = tpu.matmul %379, %380, %cst_120 {dimension_numbers = #tpu.dot_dimension_numbers<[1], [0], [0], [1], [0, 0, 1, 1], [], []>} : vector<12x8xbf16>, vector<8x64xbf16>, vector<12x64xf32> -> vector<12x64xf32>
    %382 = arith.addf %362, %381 : vector<12x64xf32>
    %383 = vector.extract_strided_slice %240 {offsets = [0, 56], sizes = [12, 8], strides = [1, 1]} : vector<12x64xbf16> to vector<12x8xbf16>
    %384 = vector.extract_strided_slice %241 {offsets = [0, 56], sizes = [16, 8], strides = [1, 1]} : vector<16x128xbf16> to vector<16x8xbf16>
    %385 = vector.extract_strided_slice %241 {offsets = [0, 120], sizes = [16, 8], strides = [1, 1]} : vector<16x128xbf16> to vector<16x8xbf16>
    %cst_121 = arith.constant dense<0.000000e+00> : vector<12x16xf32>
    %386 = tpu.matmul %383, %384, %cst_121 {dimension_numbers = #tpu.dot_dimension_numbers<[1], [1], [0], [0], [0, 0, 1, 0], [], []>} : vector<12x8xbf16>, vector<16x8xbf16>, vector<12x16xf32> -> vector<12x16xf32>
    %cst_122 = arith.constant dense<0xFF800000> : vector<12xf32>
    %387 = vector.multi_reduction <maximumf>, %386, %cst_122 [1] : vector<12x16xf32> to vector<12xf32>
    %388 = vector.shape_cast %387 : vector<12xf32> to vector<12x1xf32>
    %389 = vector.broadcast %388 : vector<12x1xf32> to vector<12x16xf32>
    %390 = arith.subf %386, %389 : vector<12x16xf32>
    %391 = math.exp %390 : vector<12x16xf32>
    %cst_123 = arith.constant dense<0.000000e+00> : vector<12xf32>
    %392 = vector.multi_reduction <add>, %391, %cst_123 [1] : vector<12x16xf32> to vector<12xf32>
    %393 = vector.shape_cast %392 : vector<12xf32> to vector<12x1xf32>
    %394 = tpu.reciprocal %393 {approx = true} : vector<12x1xf32> -> vector<12x1xf32>
    %395 = vector.broadcast %394 : vector<12x1xf32> to vector<12x16xf32>
    %396 = arith.mulf %391, %395 : vector<12x16xf32>
    %397 = arith.truncf %396 : vector<12x16xf32> to vector<12x16xbf16>
    %cst_124 = arith.constant dense<0.000000e+00> : vector<12x8xf32>
    %398 = tpu.matmul %397, %385, %cst_124 {dimension_numbers = #tpu.dot_dimension_numbers<[1], [0], [0], [1], [0, 0, 1, 1], [], []>} : vector<12x16xbf16>, vector<16x8xbf16>, vector<12x8xf32> -> vector<12x8xf32>
    %399 = arith.truncf %398 : vector<12x8xf32> to vector<12x8xbf16>
    %400 = vector.extract_strided_slice %237 {offsets = [56, 0], sizes = [8, 64], strides = [1, 1]} : vector<64x64xbf16> to vector<8x64xbf16>
    %cst_125 = arith.constant dense<0.000000e+00> : vector<12x64xf32>
    %401 = tpu.matmul %399, %400, %cst_125 {dimension_numbers = #tpu.dot_dimension_numbers<[1], [0], [0], [1], [0, 0, 1, 1], [], []>} : vector<12x8xbf16>, vector<8x64xbf16>, vector<12x64xf32> -> vector<12x64xf32>
    %402 = arith.addf %382, %401 : vector<12x64xf32>
    %403 = arith.addf %224, %402 : vector<12x64xf32>
    %c0_126 = arith.constant 0 : index
    %c0_127 = arith.constant 0 : index
    %404 = vector.load %arg14[%c0_126, %c0_127] : memref<1x64xf32, #tpu.memory_space<vmem>>, vector<1x64xf32>
    %405 = vector.broadcast %404 : vector<1x64xf32> to vector<12x64xf32>
    %406 = arith.addf %403, %405 : vector<12x64xf32>
    %c0_128 = arith.constant 0 : index
    %c0_129 = arith.constant 0 : index
    %407 = vector.load %arg15[%c0_128, %c0_129] : memref<1x64xf32, #tpu.memory_space<vmem>>, vector<1x64xf32>
    %c0_130 = arith.constant 0 : index
    %c0_131 = arith.constant 0 : index
    %408 = vector.load %arg16[%c0_130, %c0_131] : memref<1x64xf32, #tpu.memory_space<vmem>>, vector<1x64xf32>
    %cst_132 = arith.constant dense<0.000000e+00> : vector<12xf32>
    %409 = vector.multi_reduction <add>, %406, %cst_132 [1] : vector<12x64xf32> to vector<12xf32>
    %410 = vector.shape_cast %409 : vector<12xf32> to vector<12x1xf32>
    %cst_133 = arith.constant 6.400000e+01 : f32
    %411 = vector.broadcast %cst_133 : f32 to vector<12x1xf32>
    %412 = arith.divf %410, %411 : vector<12x1xf32>
    %413 = vector.broadcast %412 : vector<12x1xf32> to vector<12x64xf32>
    %414 = arith.subf %406, %413 : vector<12x64xf32>
    %415 = arith.mulf %414, %414 : vector<12x64xf32>
    %cst_134 = arith.constant dense<0.000000e+00> : vector<12xf32>
    %416 = vector.multi_reduction <add>, %415, %cst_134 [1] : vector<12x64xf32> to vector<12xf32>
    %417 = vector.shape_cast %416 : vector<12xf32> to vector<12x1xf32>
    %cst_135 = arith.constant 6.400000e+01 : f32
    %418 = vector.broadcast %cst_135 : f32 to vector<12x1xf32>
    %419 = arith.divf %417, %418 : vector<12x1xf32>
    %420 = vector.broadcast %412 : vector<12x1xf32> to vector<12x64xf32>
    %421 = arith.subf %406, %420 : vector<12x64xf32>
    %cst_136 = arith.constant 9.99999974E-6 : f32
    %422 = vector.broadcast %cst_136 : f32 to vector<12x1xf32>
    %423 = arith.addf %419, %422 : vector<12x1xf32>
    %424 = math.rsqrt %423 : vector<12x1xf32>
    %425 = vector.broadcast %424 : vector<12x1xf32> to vector<12x64xf32>
    %426 = arith.mulf %421, %425 : vector<12x64xf32>
    %427 = vector.broadcast %407 : vector<1x64xf32> to vector<12x64xf32>
    %428 = arith.mulf %426, %427 : vector<12x64xf32>
    %429 = vector.broadcast %408 : vector<1x64xf32> to vector<12x64xf32>
    %430 = arith.addf %428, %429 : vector<12x64xf32>
    %431 = arith.truncf %430 : vector<12x64xf32> to vector<12x64xbf16>
    %c0_137 = arith.constant 0 : index
    %c0_138 = arith.constant 0 : index
    %432 = vector.load %arg17[%c0_137, %c0_138] : memref<64x128xbf16, #tpu.memory_space<vmem>>, vector<64x128xbf16>
    %cst_139 = arith.constant dense<0.000000e+00> : vector<12x128xf32>
    %433 = tpu.matmul %431, %432, %cst_139 {dimension_numbers = #tpu.dot_dimension_numbers<[1], [0], [0], [1], [0, 0, 1, 1], [], []>} : vector<12x64xbf16>, vector<64x128xbf16>, vector<12x128xf32> -> vector<12x128xf32>
    %c0_140 = arith.constant 0 : index
    %c0_141 = arith.constant 0 : index
    %434 = vector.load %arg18[%c0_140, %c0_141] : memref<1x128xf32, #tpu.memory_space<vmem>>, vector<1x128xf32>
    %435 = vector.broadcast %434 : vector<1x128xf32> to vector<12x128xf32>
    %436 = arith.addf %433, %435 : vector<12x128xf32>
    %cst_142 = arith.constant 0.000000e+00 : f32
    %437 = vector.broadcast %cst_142 : f32 to vector<12x128xf32>
    %438 = arith.maximumf %436, %437 : vector<12x128xf32>
    %439 = arith.truncf %438 : vector<12x128xf32> to vector<12x128xbf16>
    %c0_143 = arith.constant 0 : index
    %c0_144 = arith.constant 0 : index
    %440 = vector.load %arg19[%c0_143, %c0_144] : memref<128x64xbf16, #tpu.memory_space<vmem>>, vector<128x64xbf16>
    %cst_145 = arith.constant dense<0.000000e+00> : vector<12x64xf32>
    %441 = tpu.matmul %439, %440, %cst_145 {dimension_numbers = #tpu.dot_dimension_numbers<[1], [0], [0], [1], [0, 0, 1, 1], [], []>} : vector<12x128xbf16>, vector<128x64xbf16>, vector<12x64xf32> -> vector<12x64xf32>
    %c0_146 = arith.constant 0 : index
    %c0_147 = arith.constant 0 : index
    %442 = vector.load %arg20[%c0_146, %c0_147] : memref<1x64xf32, #tpu.memory_space<vmem>>, vector<1x64xf32>
    %443 = vector.broadcast %442 : vector<1x64xf32> to vector<12x64xf32>
    %444 = arith.addf %441, %443 : vector<12x64xf32>
    %445 = arith.addf %430, %444 : vector<12x64xf32>
    %c0_148 = arith.constant 0 : index
    %c0_149 = arith.constant 0 : index
    %446 = vector.load %arg21[%c0_148, %c0_149] : memref<1x64xf32, #tpu.memory_space<vmem>>, vector<1x64xf32>
    %c0_150 = arith.constant 0 : index
    %c0_151 = arith.constant 0 : index
    %447 = vector.load %arg22[%c0_150, %c0_151] : memref<1x64xf32, #tpu.memory_space<vmem>>, vector<1x64xf32>
    %cst_152 = arith.constant dense<0.000000e+00> : vector<12xf32>
    %448 = vector.multi_reduction <add>, %445, %cst_152 [1] : vector<12x64xf32> to vector<12xf32>
    %449 = vector.shape_cast %448 : vector<12xf32> to vector<12x1xf32>
    %cst_153 = arith.constant 6.400000e+01 : f32
    %450 = vector.broadcast %cst_153 : f32 to vector<12x1xf32>
    %451 = arith.divf %449, %450 : vector<12x1xf32>
    %452 = vector.broadcast %451 : vector<12x1xf32> to vector<12x64xf32>
    %453 = arith.subf %445, %452 : vector<12x64xf32>
    %454 = arith.mulf %453, %453 : vector<12x64xf32>
    %cst_154 = arith.constant dense<0.000000e+00> : vector<12xf32>
    %455 = vector.multi_reduction <add>, %454, %cst_154 [1] : vector<12x64xf32> to vector<12xf32>
    %456 = vector.shape_cast %455 : vector<12xf32> to vector<12x1xf32>
    %cst_155 = arith.constant 6.400000e+01 : f32
    %457 = vector.broadcast %cst_155 : f32 to vector<12x1xf32>
    %458 = arith.divf %456, %457 : vector<12x1xf32>
    %459 = vector.broadcast %451 : vector<12x1xf32> to vector<12x64xf32>
    %460 = arith.subf %445, %459 : vector<12x64xf32>
    %cst_156 = arith.constant 9.99999974E-6 : f32
    %461 = vector.broadcast %cst_156 : f32 to vector<12x1xf32>
    %462 = arith.addf %458, %461 : vector<12x1xf32>
    %463 = math.rsqrt %462 : vector<12x1xf32>
    %464 = vector.broadcast %463 : vector<12x1xf32> to vector<12x64xf32>
    %465 = arith.mulf %460, %464 : vector<12x64xf32>
    %466 = vector.broadcast %446 : vector<1x64xf32> to vector<12x64xf32>
    %467 = arith.mulf %465, %466 : vector<12x64xf32>
    %468 = vector.broadcast %447 : vector<1x64xf32> to vector<12x64xf32>
    %469 = arith.addf %467, %468 : vector<12x64xf32>
    %c0_157 = arith.constant 0 : index
    %c0_158 = arith.constant 0 : index
    %c0_159 = arith.constant 0 : index
    %470 = vector.load %arg23[%c0_157, %c0_158, %c0_159] : memref<1x12x64xf32, #tpu.memory_space<vmem>>, vector<1x12x64xf32>
    %471 = vector.shape_cast %470 : vector<1x12x64xf32> to vector<12x64xf32>
    %472 = vector.shape_cast %469 : vector<12x64xf32> to vector<1x12x64xf32>
    tpu.vector_store %arg23[%c0_157, %c0_158, %c0_159], %472 {strides = array<i32>} : memref<1x12x64xf32, #tpu.memory_space<vmem>>, vector<1x12x64xf32>,
    return
  }
  func.func @transform_0(%arg0: i32) -> (i32, i32, i32) {
    %c0_i32 = arith.constant 0 : i32
    %c0_i32_0 = arith.constant 0 : i32
    %c0_i32_1 = arith.constant 0 : i32
    return %arg0, %c0_i32, %c0_i32_0 : i32, i32, i32
  }
  func.func @transform_1(%arg0: i32) -> (i32, i32, i32) {
    %c0_i32 = arith.constant 0 : i32
    %c0_i32_0 = arith.constant 0 : i32
    %c0_i32_1 = arith.constant 0 : i32
    return %arg0, %c0_i32, %c0_i32_0 : i32, i32, i32
  }
  func.func @transform_2(%arg0: i32) -> (i32, i32) {
    %c0_i32 = arith.constant 0 : i32
    %c0_i32_0 = arith.constant 0 : i32
    %c0_i32_1 = arith.constant 0 : i32
    return %c0_i32, %c0_i32_0 : i32, i32
  }
  func.func @transform_3(%arg0: i32) -> (i32, i32) {
    %c0_i32 = arith.constant 0 : i32
    %c0_i32_0 = arith.constant 0 : i32
    %c0_i32_1 = arith.constant 0 : i32
    return %c0_i32, %c0_i32_0 : i32, i32
  }
  func.func @transform_4(%arg0: i32) -> (i32, i32) {
    %c0_i32 = arith.constant 0 : i32
    %c0_i32_0 = arith.constant 0 : i32
    %c0_i32_1 = arith.constant 0 : i32
    return %c0_i32, %c0_i32_0 : i32, i32
  }
  func.func @transform_5(%arg0: i32) -> (i32, i32) {
    %c0_i32 = arith.constant 0 : i32
    %c0_i32_0 = arith.constant 0 : i32
    %c0_i32_1 = arith.constant 0 : i32
    return %c0_i32, %c0_i32_0 : i32, i32
  }
  func.func @transform_6(%arg0: i32) -> (i32, i32) {
    %c0_i32 = arith.constant 0 : i32
    %c0_i32_0 = arith.constant 0 : i32
    %c0_i32_1 = arith.constant 0 : i32
    return %c0_i32, %c0_i32_0 : i32, i32
  }
  func.func @transform_7(%arg0: i32) -> (i32, i32) {
    %c0_i32 = arith.constant 0 : i32
    %c0_i32_0 = arith.constant 0 : i32
    %c0_i32_1 = arith.constant 0 : i32
    return %c0_i32, %c0_i32_0 : i32, i32
  }
  func.func @transform_8(%arg0: i32) -> (i32, i32) {
    %c0_i32 = arith.constant 0 : i32
    %c0_i32_0 = arith.constant 0 : i32
    %c0_i32_1 = arith.constant 0 : i32
    return %c0_i32, %c0_i32_0 : i32, i32
  }
  func.func @transform_9(%arg0: i32) -> (i32, i32) {
    %c0_i32 = arith.constant 0 : i32
    %c0_i32_0 = arith.constant 0 : i32
    %c0_i32_1 = arith.constant 0 : i32
    return %c0_i32, %c0_i32_0 : i32, i32
  }
  func.func @transform_10(%arg0: i32) -> (i32, i32) {
    %c0_i32 = arith.constant 0 : i32
    %c0_i32_0 = arith.constant 0 : i32
    %c0_i32_1 = arith.constant 0 : i32
    return %c0_i32, %c0_i32_0 : i32, i32
  }
  func.func @transform_11(%arg0: i32) -> (i32, i32) {
    %c0_i32 = arith.constant 0 : i32
    %c0_i32_0 = arith.constant 0 : i32
    %c0_i32_1 = arith.constant 0 : i32
    return %c0_i32, %c0_i32_0 : i32, i32
  }
  func.func @transform_12(%arg0: i32) -> (i32, i32) {
    %c0_i32 = arith.constant 0 : i32
    %c0_i32_0 = arith.constant 0 : i32
    %c0_i32_1 = arith.constant 0 : i32
    return %c0_i32, %c0_i32_0 : i32, i32
  }
  func.func @transform_13(%arg0: i32) -> (i32, i32) {
    %c0_i32 = arith.constant 0 : i32
    %c0_i32_0 = arith.constant 0 : i32
    %c0_i32_1 = arith.constant 0 : i32
    return %c0_i32, %c0_i32_0 : i32, i32
  }
  func.func @transform_14(%arg0: i32) -> (i32, i32) {
    %c0_i32 = arith.constant 0 : i32
    %c0_i32_0 = arith.constant 0 : i32
    %c0_i32_1 = arith.constant 0 : i32
    return %c0_i32, %c0_i32_0 : i32, i32
  }
  func.func @transform_15(%arg0: i32) -> (i32, i32) {
    %c0_i32 = arith.constant 0 : i32
    %c0_i32_0 = arith.constant 0 : i32
    %c0_i32_1 = arith.constant 0 : i32
    return %c0_i32, %c0_i32_0 : i32, i32
  }
  func.func @transform_16(%arg0: i32) -> (i32, i32) {
    %c0_i32 = arith.constant 0 : i32
    %c0_i32_0 = arith.constant 0 : i32
    %c0_i32_1 = arith.constant 0 : i32
    return %c0_i32, %c0_i32_0 : i32, i32
  }
  func.func @transform_17(%arg0: i32) -> (i32, i32) {
    %c0_i32 = arith.constant 0 : i32
    %c0_i32_0 = arith.constant 0 : i32
    %c0_i32_1 = arith.constant 0 : i32
    return %c0_i32, %c0_i32_0 : i32, i32
  }
  func.func @transform_18(%arg0: i32) -> (i32, i32) {
    %c0_i32 = arith.constant 0 : i32
    %c0_i32_0 = arith.constant 0 : i32
    %c0_i32_1 = arith.constant 0 : i32
    return %c0_i32, %c0_i32_0 : i32, i32
  }
  func.func @transform_19(%arg0: i32) -> (i32, i32) {
    %c0_i32 = arith.constant 0 : i32
    %c0_i32_0 = arith.constant 0 : i32
    %c0_i32_1 = arith.constant 0 : i32
    return %c0_i32, %c0_i32_0 : i32, i32
  }
  func.func @transform_20(%arg0: i32) -> (i32, i32) {
    %c0_i32 = arith.constant 0 : i32
    %c0_i32_0 = arith.constant 0 : i32
    %c0_i32_1 = arith.constant 0 : i32
    return %c0_i32, %c0_i32_0 : i32, i32
  }
  func.func @transform_21(%arg0: i32) -> (i32, i32) {
    %c0_i32 = arith.constant 0 : i32
    %c0_i32_0 = arith.constant 0 : i32
    %c0_i32_1 = arith.constant 0 : i32
    return %c0_i32, %c0_i32_0 : i32, i32
  }
  func.func @transform_22(%arg0: i32) -> (i32, i32, i32) {
    %c0_i32 = arith.constant 0 : i32
    %c0_i32_0 = arith.constant 0 : i32
    %c0_i32_1 = arith.constant 0 : i32
    return %arg0, %c0_i32, %c0_i32_0 : i32, i32, i32
  }
}

module attributes {stable_mosaic.version = 11 : i64} {
  func.func @_ln_proj_kernel(%arg0: i32, %arg1: memref<1x12x64xf32, #tpu.memory_space<vmem>>, %arg2: memref<1x64xf32, #tpu.memory_space<vmem>>, %arg3: memref<1x64xf32, #tpu.memory_space<vmem>>, %arg4: memref<64x1xbf16, #tpu.memory_space<vmem>>, %arg5: memref<1x1xf32, #tpu.memory_space<vmem>>, %arg6: memref<1x12x1xf32, #tpu.memory_space<vmem>>) attributes {dimension_semantics = [#tpu.dimension_semantics<parallel>], iteration_bounds = array<i64: 2>, scalar_prefetch = 0 : i64, scratch_operands = 0 : i64, tpu.core_type = #tpu.core_type<tc>, window_params = [{transform_indices = @transform_0, window_bounds = array<i64: 1, 12, 64>}, {pipeline_mode = #tpu.pipeline_mode<synchronous>, transform_indices = @transform_1, window_bounds = array<i64: 1, 64>}, {pipeline_mode = #tpu.pipeline_mode<synchronous>, transform_indices = @transform_2, window_bounds = array<i64: 1, 64>}, {pipeline_mode = #tpu.pipeline_mode<synchronous>, transform_indices = @transform_3, window_bounds = array<i64: 64, 1>}, {pipeline_mode = #tpu.pipeline_mode<synchronous>, transform_indices = @transform_4, window_bounds = array<i64: 1, 1>}, {transform_indices = @transform_5, window_bounds = array<i64: 1, 12, 1>}]} {
    %c0 = arith.constant 0 : index
    %c0_0 = arith.constant 0 : index
    %c0_1 = arith.constant 0 : index
    %0 = vector.load %arg1[%c0, %c0_0, %c0_1] : memref<1x12x64xf32, #tpu.memory_space<vmem>>, vector<1x12x64xf32>
    %1 = vector.shape_cast %0 : vector<1x12x64xf32> to vector<12x64xf32>
    %c0_2 = arith.constant 0 : index
    %c0_3 = arith.constant 0 : index
    %2 = vector.load %arg2[%c0_2, %c0_3] : memref<1x64xf32, #tpu.memory_space<vmem>>, vector<1x64xf32>
    %c0_4 = arith.constant 0 : index
    %c0_5 = arith.constant 0 : index
    %3 = vector.load %arg3[%c0_4, %c0_5] : memref<1x64xf32, #tpu.memory_space<vmem>>, vector<1x64xf32>
    %cst = arith.constant dense<0.000000e+00> : vector<12xf32>
    %4 = vector.multi_reduction <add>, %1, %cst [1] : vector<12x64xf32> to vector<12xf32>
    %5 = vector.shape_cast %4 : vector<12xf32> to vector<12x1xf32>
    %cst_6 = arith.constant 6.400000e+01 : f32
    %6 = vector.broadcast %cst_6 : f32 to vector<12x1xf32>
    %7 = arith.divf %5, %6 : vector<12x1xf32>
    %8 = vector.broadcast %7 : vector<12x1xf32> to vector<12x64xf32>
    %9 = arith.subf %1, %8 : vector<12x64xf32>
    %10 = arith.mulf %9, %9 : vector<12x64xf32>
    %cst_7 = arith.constant dense<0.000000e+00> : vector<12xf32>
    %11 = vector.multi_reduction <add>, %10, %cst_7 [1] : vector<12x64xf32> to vector<12xf32>
    %12 = vector.shape_cast %11 : vector<12xf32> to vector<12x1xf32>
    %cst_8 = arith.constant 6.400000e+01 : f32
    %13 = vector.broadcast %cst_8 : f32 to vector<12x1xf32>
    %14 = arith.divf %12, %13 : vector<12x1xf32>
    %15 = vector.broadcast %7 : vector<12x1xf32> to vector<12x64xf32>
    %16 = arith.subf %1, %15 : vector<12x64xf32>
    %cst_9 = arith.constant 9.99999974E-6 : f32
    %17 = vector.broadcast %cst_9 : f32 to vector<12x1xf32>
    %18 = arith.addf %14, %17 : vector<12x1xf32>
    %19 = math.rsqrt %18 : vector<12x1xf32>
    %20 = vector.broadcast %19 : vector<12x1xf32> to vector<12x64xf32>
    %21 = arith.mulf %16, %20 : vector<12x64xf32>
    %22 = vector.broadcast %2 : vector<1x64xf32> to vector<12x64xf32>
    %23 = arith.mulf %21, %22 : vector<12x64xf32>
    %24 = vector.broadcast %3 : vector<1x64xf32> to vector<12x64xf32>
    %25 = arith.addf %23, %24 : vector<12x64xf32>
    %26 = arith.truncf %25 : vector<12x64xf32> to vector<12x64xbf16>
    %c0_10 = arith.constant 0 : index
    %c0_11 = arith.constant 0 : index
    %27 = vector.load %arg4[%c0_10, %c0_11] : memref<64x1xbf16, #tpu.memory_space<vmem>>, vector<64x1xbf16>
    %cst_12 = arith.constant dense<0.000000e+00> : vector<12x1xf32>
    %28 = tpu.matmul %26, %27, %cst_12 {dimension_numbers = #tpu.dot_dimension_numbers<[1], [0], [0], [1], [0, 0, 1, 1], [], []>} : vector<12x64xbf16>, vector<64x1xbf16>, vector<12x1xf32> -> vector<12x1xf32>
    %c0_13 = arith.constant 0 : index
    %c0_14 = arith.constant 0 : index
    %29 = vector.load %arg5[%c0_13, %c0_14] : memref<1x1xf32, #tpu.memory_space<vmem>>, vector<1x1xf32>
    %30 = vector.broadcast %29 : vector<1x1xf32> to vector<12x1xf32>
    %31 = arith.addf %28, %30 : vector<12x1xf32>
    %c0_15 = arith.constant 0 : index
    %c0_16 = arith.constant 0 : index
    %c0_17 = arith.constant 0 : index
    %32 = vector.load %arg6[%c0_15, %c0_16, %c0_17] : memref<1x12x1xf32, #tpu.memory_space<vmem>>, vector<1x12x1xf32>
    %33 = vector.shape_cast %32 : vector<1x12x1xf32> to vector<12x1xf32>
    %34 = vector.shape_cast %31 : vector<12x1xf32> to vector<1x12x1xf32>
    tpu.vector_store %arg6[%c0_15, %c0_16, %c0_17], %34 {strides = array<i32>} : memref<1x12x1xf32, #tpu.memory_space<vmem>>, vector<1x12x1xf32>,
    return
  }
  func.func @transform_0(%arg0: i32) -> (i32, i32, i32) {
    %c0_i32 = arith.constant 0 : i32
    %c0_i32_0 = arith.constant 0 : i32
    %c0_i32_1 = arith.constant 0 : i32
    return %arg0, %c0_i32, %c0_i32_0 : i32, i32, i32
  }
  func.func @transform_1(%arg0: i32) -> (i32, i32) {
    %c0_i32 = arith.constant 0 : i32
    %c0_i32_0 = arith.constant 0 : i32
    %c0_i32_1 = arith.constant 0 : i32
    return %c0_i32, %c0_i32_0 : i32, i32
  }
  func.func @transform_2(%arg0: i32) -> (i32, i32) {
    %c0_i32 = arith.constant 0 : i32
    %c0_i32_0 = arith.constant 0 : i32
    %c0_i32_1 = arith.constant 0 : i32
    return %c0_i32, %c0_i32_0 : i32, i32
  }
  func.func @transform_3(%arg0: i32) -> (i32, i32) {
    %c0_i32 = arith.constant 0 : i32
    %c0_i32_0 = arith.constant 0 : i32
    %c0_i32_1 = arith.constant 0 : i32
    return %c0_i32, %c0_i32_0 : i32, i32
  }
  func.func @transform_4(%arg0: i32) -> (i32, i32) {
    %c0_i32 = arith.constant 0 : i32
    %c0_i32_0 = arith.constant 0 : i32
    %c0_i32_1 = arith.constant 0 : i32
    return %c0_i32, %c0_i32_0 : i32, i32
  }
  func.func @transform_5(%arg0: i32) -> (i32, i32, i32) {
    %c0_i32 = arith.constant 0 : i32
    %c0_i32_0 = arith.constant 0 : i32
    %c0_i32_1 = arith.constant 0 : i32
    return %arg0, %c0_i32, %c0_i32_0 : i32, i32, i32
  }
}

</mosaic_0001>

<bundles_post_ra>
// kernel: informer_forward.7
= control target key start
LH: loop header
LB: loop body
LE: loop exit
PB: predicated region body
PF: predicated region fallthrough
CT: control target
= control target key end

     0   :  { %s389_s15 = smov 0   ;;  %s418_s0 = inlined_call_operand.vmem [shape: f32[2,16,4], index: 0, kind: input, shape index: {}]   ;;  %s419_s1 = inlined_call_operand.vmem [shape: bf16[4,64], index: 1, kind: input, shape index: {}]   ;;  %s420_s2 = inlined_call_operand.vmem [shape: f32[1,64], index: 2, kind: input, shape index: {}]   ;;  %s421_s3 = inlined_call_operand.vmem [shape: f32[16,64], index: 3, kind: input, shape index: {}]   ;;  %s422_s4 = inlined_call_operand.vmem [shape: f32[2,16,64], index: 4, kind: output, shape index: {}]  }
   0x1 LB: > { %s321_s16 = sadd.s32 4294967295, %s360_s15   ;;  %p325_p0 = scmp.ge.s32.totalorder %s360_s15, 1  ;;  %s360_s15 = sphi %s389_s15, %s14_s15  }
   0x2   : > { %p162_p1 = scmp.lt.s32.totalorder %s360_s15, 3 }
   0x4   : > { %p163_p2 = pnand %p325_p0, %p162_p1 }
   0x5   : > { %v202_v0 = vld [vmem:[%s419_s1] sm:$0x3] (!%p163_p2)  ;;  %vm214_vm0 = vcmask (!%p163_p2), 1041408   ;;  %p188_p3 = scmp.lt.s32.totalorder (!%p163_p2), %s321_s16, 1  ;;  %v362_v1 = vmov (!%p163_p2), 0.0   ;;  %vm363_vm1 = vmmov (!%p163_p2), 0  }
   0x6   : > { %166 = sbr.rel (%p163_p2) target bundleno = 238 (0xee), region = 36  ;;  %338 = vmatprep.subr.bf16.mxu0 (!%p163_p2), %v362_v1  ;;  %v216_v2 = vsel (!%p163_p2), %vm214_vm0, %v202_v0, 0  ;;  %340 = vmatprep.mubr.msk.bf16.mxu0 (!%p163_p2), %vm363_vm1, %v362_v1  ;;  %vm210_vm2 = vcmask (!%p163_p2), 31744   ;;  %v330_v6 = vld [vmem:[%s420_s2] ss:$0 sm:$0xff] (!%p163_p2)  ;;  %vm263_vm3 = vcmask (!%p163_p2), 523264  }
   0x7   : > { %339 = vmatpush3.bf16.msra.mxu0 (!%p163_p2), %v216_v2  ;;  %v259_v8 = vld [vmem:[%s421_s3] sm:$0xff] (!%p163_p2)  ;;  %v260_v12 = vld [vmem:[%s421_s3 + $0x8] sm:$0xff] (!%p163_p2) }
   0xd   : > { %s424_s16 = smov (!%p188_p3, %s321_s16), 1 }
   0xe   : > { %s334_s19 = sshll.u32 %s424_s16, 4 }
   0xf   : > { %s192_s22 = scalar_lea.vmem %s418_s0, %s334_s19  ;;  %s197_s29 = scalar_lea.vmem %s422_s4, %s334_s19 }
  0x10   : > { %v199_v3 = vld [vmem:[%s192_s22] sm:$0xff]  ;;  %v200_v4 = vld [vmem:[%s192_s22 + $0x8] sm:$0xff] }
  0x11   : > { %v201_v5 = vpack.c.bf16 %v200_v4, %v199_v3 }
  0x13   : > { %341 = vmatmul.mubr.msk.bf16.vlgmr.msra.gmra.mrb[0].mxu0 %vm210_vm2, %v201_v5 }
  0xe6   : > { %v252_v7 = vpop.f32.mrb[0].mxu0 }
  0xe7   : > { %v253_v9 = vadd.f32 %v330_v6, %v252_v7  ;;  %v342_v10 = vpop.f32.mrb[1].mxu0 }
  0xe8   : > { %v255_v11 = vpop.f32.mrb[2].mxu0 }
  0xe9   : > { %v261_v13 = vadd.f32 %v259_v8, %v253_v9  ;;  %v256_v14 = vadd.f32 %v330_v6, %v255_v11  ;;  %v343_v15 = vpop.f32.mrb[3].mxu0 }
  0xeb   : > { %264 = vst.msk [vmem:[%s197_s29] sm:$0xff] %vm263_vm3, %v261_v13  ;;  %v262_v16 = vadd.f32 %v260_v12, %v256_v14 }
  0xed   : > { %265 = vst.msk [vmem:[%s197_s29 + $0x8] sm:$0xff] %vm263_vm3, %v262_v16 }
  0xee PF: > { %s14_s15 = sadd.s32 1, %s360_s15  }
  0xef   : > { %p11_p4 = scmp.ge.s32.totalorder %s14_s15, 4  }
  0xf1   :  { %13 = sbr.rel (!%p11_p4) target bundleno = 1 (0x1), region = 66 }

// kernel: informer_forward.10
= control target key start
LH: loop header
LB: loop body
LE: loop exit
PB: predicated region body
PF: predicated region fallthrough
CT: control target
= control target key end

     0   :  { %s331_s12 = smov 0   ;;  %s367_s0 = inlined_call_operand.vmem [shape: f32[2,16,64], index: 0, kind: input, shape index: {}]   ;;  %s368_s1 = inlined_call_operand.vmem [shape: f32[1,64], index: 1, kind: input, shape index: {}]   ;;  %s369_s2 = inlined_call_operand.vmem [shape: f32[1,64], index: 2, kind: input, shape index: {}]   ;;  %s370_s3 = inlined_call_operand.vmem [shape: f32[2,16,64], index: 3, kind: output, shape index: {}]  }
   0x1 LB: > { %s276_s13 = sadd.s32 4294967295, %s309_s12   ;;  %p280_p0 = scmp.ge.s32.totalorder %s309_s12, 1  ;;  %s309_s12 = sphi %s331_s12, %s13_s12  }
   0x2   : > { %p137_p1 = scmp.lt.s32.totalorder %s309_s12, 3 }
   0x4   : > { %p138_p2 = pnand %p280_p0, %p137_p1 }
   0x5   : > { %p161_p3 = scmp.lt.s32.totalorder (!%p138_p2), %s276_s13, 1  ;;  %vm175_vm0 = vcmask (!%p138_p2), 523264   ;;  %v285_v21 = vld [vmem:[%s368_s1] ss:$0 sm:$0xff] (!%p138_p2) }
   0x6   : > { %141 = sbr.rel (%p138_p2) target bundleno = 335 (0x14f), region = 32  ;;  %v286_v23 = vld [vmem:[%s369_s2] ss:$0 sm:$0xff] (!%p138_p2) }
   0xd   : > { %s372_s13 = smov (!%p161_p3, %s276_s13), 1 }
   0xe   : > { %s289_s14 = sshll.u32 %s372_s13, 4 }
   0xf   : > { %s165_s17 = scalar_lea.vmem %s367_s0, %s289_s14  ;;  %s170_s24 = scalar_lea.vmem %s370_s3, %s289_s14 }
  0x10   : > { %v171_v0 = vld [vmem:[%s165_s17] sm:$0xff]  ;;  %v172_v1 = vld [vmem:[%s165_s17 + $0x8] sm:$0xff] }
  0x11   : > { %v176_v2 = vsel %vm175_vm0, %v171_v0, 0.0  ;;  %v179_v3 = vsel %vm175_vm0, %v172_v1, 0.0 }
  0x12   : > { %177 = vadd.xlane.f32.xlu0 %v176_v2 }
  0x16   : > { %180 = vadd.xlane.f32.xlu0 %v179_v3 }
  0x9f   : > { %v178_v4 = vpop.xlane.xlu0 %177 }
  0xa0   : > { %v183_v5 = vmul.f32 0.015625, %v178_v4 }
  0xa2   : > { %v185_v6 = vsub.f32 %v171_v0, %v183_v5 }
  0xa3   : > { %v181_v7 = vpop.xlane.xlu0 %180 }
  0xa4   : > { %v184_v8 = vmul.f32 0.015625, %v181_v7  ;;  %v187_v9 = vmul.f32 %v185_v6, %v185_v6 }
  0xa6   : > { %v186_v10 = vsub.f32 %v172_v1, %v184_v8  ;;  %v189_v11 = vsel %vm175_vm0, %v187_v9, 0.0 }
  0xa7   : > { %190 = vadd.xlane.f32.xlu1 %v189_v11 }
  0xa8   : > { %v188_v12 = vmul.f32 %v186_v10, %v186_v10 }
  0xaa   : > { %v192_v13 = vsel %vm175_vm0, %v188_v12, 0.0 }
  0xab   : > { %193 = vadd.xlane.f32.xlu1 %v192_v13 }
 0x134   : > { %v191_v14 = vpop.xlane.xlu1 %190 }
 0x135   : > { %v195_v15 = vmul.f32 0.015625, %v191_v14 }
 0x137   : > { %v197_v16 = vadd.f32 1e-05, %v195_v15 }
 0x138   : > { %v194_v17 = vpop.xlane.xlu1 %193 }
 0x139   : > { %299 = vrsqrt.f32 %v197_v16  ;;  %v196_v18 = vmul.f32 0.015625, %v194_v17 }
 0x13b   : > { %v198_v19 = vadd.f32 1e-05, %v196_v18 }
 0x13d   : > { %301 = vrsqrt.f32 %v198_v19 }
 0x143   : > { %v300_v20 = vpop.eup %299 }
 0x144   : > { %v201_v22 = vmul.f32 %v300_v20, %v185_v6 }
 0x146   : > { %v209_v24 = vmul.f32 %v285_v21, %v201_v22 }
 0x147   : > { %v302_v25 = vpop.eup %301 }
 0x148   : > { %v217_v26 = vadd.f32 %v286_v23, %v209_v24  ;;  %v202_v27 = vmul.f32 %v302_v25, %v186_v10 }
 0x14a   : > { %219 = vst.msk [vmem:[%s170_s24] sm:$0xff] %vm175_vm0, %v217_v26  ;;  %v210_v28 = vmul.f32 %v285_v21, %v202_v27 }
 0x14c   : > { %v218_v29 = vadd.f32 %v286_v23, %v210_v28 }
 0x14e   : > { %220 = vst.msk [vmem:[%s170_s24 + $0x8] sm:$0xff] %vm175_vm0, %v218_v29 }
 0x14f PF: > { %s13_s12 = sadd.s32 1, %s309_s12  }
 0x150   : > { %p10_p4 = scmp.ge.s32.totalorder %s13_s12, 4  }
 0x152   :  { %12 = sbr.rel (!%p10_p4) target bundleno = 1 (0x1), region = 62 }

// kernel: informer_forward.11
= control target key start
LH: loop header
LB: loop body
LE: loop exit
PB: predicated region body
PF: predicated region fallthrough
CT: control target
= control target key end

     0   :  { %s390_s15 = smov 0   ;;  %s419_s0 = inlined_call_operand.vmem [shape: f32[2,12,4], index: 0, kind: input, shape index: {}]   ;;  %s420_s1 = inlined_call_operand.vmem [shape: bf16[4,64], index: 1, kind: input, shape index: {}]   ;;  %s421_s2 = inlined_call_operand.vmem [shape: f32[1,64], index: 2, kind: input, shape index: {}]   ;;  %s422_s3 = inlined_call_operand.vmem [shape: f32[12,64], index: 3, kind: input, shape index: {}]   ;;  %s423_s4 = inlined_call_operand.vmem [shape: f32[2,12,64], index: 4, kind: output, shape index: {}]  }
   0x1 LB: > { %s322_s16 = sadd.s32 4294967295, %s361_s15   ;;  %p326_p0 = scmp.ge.s32.totalorder %s361_s15, 1  ;;  %s361_s15 = sphi %s390_s15, %s14_s15  }
   0x2   : > { %p162_p1 = scmp.lt.s32.totalorder %s361_s15, 3 }
   0x4   : > { %p163_p2 = pnand %p326_p0, %p162_p1 }
   0x5   : > { %v202_v0 = vld [vmem:[%s420_s1] sm:$0x3] (!%p163_p2)  ;;  %vm214_vm0 = vcmask (!%p163_p2), 1041408   ;;  %p188_p3 = scmp.lt.s32.totalorder (!%p163_p2), %s322_s16, 1  ;;  %v363_v1 = vmov (!%p163_p2), 0.0   ;;  %vm364_vm1 = vmmov (!%p163_p2), 0  }
   0x6   : > { %166 = sbr.rel (%p163_p2) target bundleno = 238 (0xee), region = 36  ;;  %339 = vmatprep.subr.bf16.mxu0 (!%p163_p2), %v363_v1  ;;  %v216_v2 = vsel (!%p163_p2), %vm214_vm0, %v202_v0, 0  ;;  %341 = vmatprep.mubr.msk.bf16.mxu0 (!%p163_p2), %vm364_vm1, %v363_v1  ;;  %vm210_vm2 = vcmask (!%p163_p2), 31744   ;;  %v331_v6 = vld [vmem:[%s421_s2] ss:$0 sm:$0xff] (!%p163_p2)  ;;  %vm263_vm3 = vcmask (!%p163_p2), 523264  }
   0x7   : > { %340 = vmatpush3.bf16.msra.mxu0 (!%p163_p2), %v216_v2  ;;  %v259_v8 = vld [vmem:[%s422_s3] sm:$0xff] (!%p163_p2)  ;;  %v260_v12 = vld [vmem:[%s422_s3 + $0x8] sm:$0xf] (!%p163_p2)  ;;  %vm265_vm4 = vcmask (!%p163_p2), 519168  }
   0xd   : > { %s425_s16 = smov (!%p188_p3, %s322_s16), 1 }
   0xe   : > { %s335_s19 = sshll.u32 %s425_s16, 4 }
   0xf   : > { %s192_s22 = scalar_lea.vmem %s419_s0, %s335_s19  ;;  %s197_s29 = scalar_lea.vmem %s423_s4, %s335_s19 }
  0x10   : > { %v199_v3 = vld [vmem:[%s192_s22] sm:$0xff]  ;;  %v200_v4 = vld [vmem:[%s192_s22 + $0x8] sm:$0xf] }
  0x11   : > { %v201_v5 = vpack.c.bf16 %v200_v4, %v199_v3 }
  0x13   : > { %342 = vmatmul.mubr.msk.bf16.vlgmr.msra.gmra.mrb[0].mxu0 %vm210_vm2, %v201_v5 }
  0xe6   : > { %v252_v7 = vpop.f32.mrb[0].mxu0 }
  0xe7   : > { %v253_v9 = vadd.f32 %v331_v6, %v252_v7  ;;  %v343_v10 = vpop.f32.mrb[1].mxu0 }
  0xe8   : > { %v255_v11 = vpop.f32.mrb[2].mxu0 }
  0xe9   : > { %v261_v13 = vadd.f32 %v259_v8, %v253_v9  ;;  %v256_v14 = vadd.f32 %v331_v6, %v255_v11  ;;  %v344_v15 = vpop.f32.mrb[3].mxu0 }
  0xeb   : > { %264 = vst.msk [vmem:[%s197_s29] sm:$0xff] %vm263_vm3, %v261_v13  ;;  %v262_v16 = vadd.f32 %v260_v12, %v256_v14 }
  0xed   : > { %266 = vst.msk [vmem:[%s197_s29 + $0x8] sm:$0xf] %vm265_vm4, %v262_v16 }
  0xee PF: > { %s14_s15 = sadd.s32 1, %s361_s15  }
  0xef   : > { %p11_p4 = scmp.ge.s32.totalorder %s14_s15, 4  }
  0xf1   :  { %13 = sbr.rel (!%p11_p4) target bundleno = 1 (0x1), region = 66 }

// kernel: informer_forward.8
= control target key start
LH: loop header
LB: loop body
LE: loop exit
PB: predicated region body
PF: predicated region fallthrough
CT: control target
= control target key end

     0   :  { %s2812_s25 = smov 0   ;;  %s3184_s0 = inlined_call_operand.vmem [shape: f32[2,16,64], index: 0, kind: input, shape index: {}]   ;;  %s3185_s1 = inlined_call_operand.vmem [shape: bf16[64,192], index: 1, kind: input, shape index: {}]   ;;  %s3186_s2 = inlined_call_operand.vmem [shape: f32[1,192], index: 2, kind: input, shape index: {}]   ;;  %s3187_s3 = inlined_call_operand.vmem [shape: bf16[64,64], index: 3, kind: input, shape index: {}]   ;;  %s3188_s4 = inlined_call_operand.vmem [shape: f32[1,64], index: 4, kind: input, shape index: {}]   ;;  %s3189_s5 = inlined_call_operand.vmem [shape: f32[1,64], index: 5, kind: input, shape index: {}]   ;;  %s3190_s6 = inlined_call_operand.vmem [shape: f32[1,64], index: 6, kind: input, shape index: {}]   ;;  %s3191_s7 = inlined_call_operand.vmem [shape: bf16[64,128], index: 7, kind: input, shape index: {}]   ;;  %s3192_s8 = inlined_call_operand.vmem [shape: f32[1,128], index: 8, kind: input, shape index: {}]   ;;  %s3193_s9 = inlined_call_operand.vmem [shape: bf16[128,64], index: 9, kind: input, shape index: {}]   ;;  %s3194_s10 = inlined_call_operand.vmem [shape: f32[1,64], index: 10, kind: input, shape index: {}]   ;;  %s3195_s11 = inlined_call_operand.vmem [shape: f32[1,64], index: 11, kind: input, shape index: {}]   ;;  %s3196_s12 = inlined_call_operand.vmem [shape: f32[1,64], index: 12, kind: input, shape index: {}]   ;;  %s3197_s13 = inlined_call_operand.vmem [shape: f32[2,16,64], index: 13, kind: output, shape index: {}]  }
   0x1 LB: > { %s2288_s26 = sadd.s32 4294967295, %s2722_s25   ;;  %p2292_p0 = scmp.ge.s32.totalorder %s2722_s25, 1  ;;  %s2722_s25 = sphi %s2812_s25, %s23_s25  }
   0x2   : > { %p387_p1 = scmp.lt.s32.totalorder %s2722_s25, 3 }
   0x4   : > { %p388_p2 = pnand %p2292_p0, %p387_p1 }
   0x5   : > { %v2618_v0 = vld [vmem:[%s3185_s1 + $0x4] ss:$8 sps:$4 sm:$0xff] (!%p388_p2)   ;;  %p431_p3 = scmp.lt.s32.totalorder (!%p388_p2), %s2288_s26, 1  ;;  %v2620_v1 = vld [vmem:[%s3185_s1] ss:$8 sps:$4 sm:$0xff] (!%p388_p2)   ;;  %v2724_v2 = vmov (!%p388_p2), 0   ;;  %v455_v13 = vlaneseq (!%p388_p2) }
   0x6   : > { %391 = sbr.rel (%p388_p2) target bundleno = 5858 (0x16e2), region = 72  ;;  %541 = vmatprep.mubr.bf16.mxu0 (!%p388_p2), %v2724_v2  ;;  %509 = vmatprep.subr.bf16.mxu0 (!%p388_p2), %v2618_v0  ;;  %v2621_v3 = vld [vmem:[%s3185_s1 + $0x14] ss:$8 sps:$4 sm:$0xff] (!%p388_p2)   ;;  %v2623_v4 = vld [vmem:[%s3185_s1 + $0x10] ss:$8 sps:$4 sm:$0xff] (!%p388_p2)   ;;  %vm505_vm0 = vcmask (!%p388_p2), 523264  }
   0x7   : > { %510 = vmatpush1.bf16.msra.mxu0 (!%p388_p2), %v2620_v1  ;;  %v2624_v5 = vld [vmem:[%s3185_s1 + $0x24] ss:$8 sps:$4 sm:$0xff] (!%p388_p2)   ;;  %v2626_v6 = vld [vmem:[%s3185_s1 + $0x20] ss:$8 sps:$4 sm:$0xff] (!%p388_p2)   ;;  %v2627_v7 = vld [vmem:[%s3185_s1 + $0x34] ss:$8 sps:$4 sm:$0xff] (!%p388_p2)  }
   0x8   : > { %511 = vmatprep.subr.bf16.mxu0 (!%p388_p2), %v2621_v3  ;;  %v2629_v8 = vld [vmem:[%s3185_s1 + $0x30] ss:$8 sps:$4 sm:$0xff] (!%p388_p2)   ;;  %v2725_v12 = vmov (!%p388_p2), 0.0   ;;  %v456_v14 = vshrl.u32 (!%p388_p2), %v455_v13, 7  ;;  %v453_v16 = vld [vmem:[%s3186_s2] sm:$0x3] (!%p388_p2) }
   0x9   : > { %2422 = vmatprep.subr.bf16.mxu1 (!%p388_p2), %v2725_v12  ;;  %vm2726_vm1 = vmmov (!%p388_p2), 0   ;;  %s2727_s17 = smov (!%p388_p2), 64   ;;  %s2728_s18 = smov (!%p388_p2), 120   ;;  %vm568_vm2 = vcmask (!%p388_p2), 64512   ;;  %vm616_vm3 = vcmask (!%p388_p2), 130048   ;;  %vm812_vm4 = vcmask (!%p388_p2), 1043456  }
   0xa   : > { %v457_v15 = vsub.s32 (!%p388_p2), 0, %v456_v14  ;;  %v461_v17 = vsub.s32 (!%p388_p2), 1, %v456_v14  ;;  %2424 = vmatprep.mubr.msk.bf16.mxu1 (!%p388_p2), %vm2726_vm1, %v2725_v12  ;;  %s2729_s19 = smov (!%p388_p2), 56   ;;  %s2730_s21 = smov (!%p388_p2), 48  }
   0xb   : > { %512 = vmatpush1.bf16.msra.mxu0 (!%p388_p2), %v2623_v4  ;;  %s2731_s22 = smov (!%p388_p2), 112   ;;  %s2732_s30 = smov (!%p388_p2), 104  }
   0xc   : > { %513 = vmatprep.subr.bf16.mxu0 (!%p388_p2), %v2624_v5  ;;  %v458_v18 = vrot.slane (!%p388_p2), %v453_v16, %v457_v15  ;;  %v462_v20 = vrot.slane (!%p388_p2), %v453_v16, %v461_v17  ;;  %s2733_s14 = smov (!%p388_p2), 40   ;;  %s2737_s23 = smov (!%p388_p2), 24  }
   0xd   : > { %s3199_s26 = smov (!%p431_p3, %s2288_s26), 1  ;;  %s2738_s28 = smov 16  }
   0xe   : > { %s2352_s20 = sshll.u32 %s3199_s26, 4  ;;  %s2740_s16 = smov 72  }
   0xf   : > { %s2849_s29 = scalar_lea.vmem %s3184_s0, %s2352_s20  ;;  %514 = vmatpush1.bf16.msra.mxu0 %v2626_v6 }
  0x10   : > { %v442_v9 = vld [vmem:[%s2849_s29] sm:$0xff]  ;;  %v443_v10 = vld [vmem:[%s2849_s29 + $0x8] sm:$0xff]  ;;  %515 = vmatprep.subr.bf16.mxu0 %v2627_v7 }
  0x11   : > { %v444_v11 = vpack.c.bf16 %v443_v10, %v442_v9 }
  0x13   : > { %516 = vmatpush1.bf16.msra.mxu0 %v2629_v8 }
  0x14   : > { %2416 = vmatprep.subr.bf16.mxu0 %v2725_v12 }
  0x16   : > { %2305 = vmatmul.mubr.msk.bf16.vlgmr.msra.gmra.mrb[0].mxu0 %vm505_vm0, %v444_v11 }
  0x17   : > { %2418 = vmatprep.mubr.msk.bf16.mxu0 %vm2726_vm1, %v2725_v12 }
  0xe9   : > { %v543_v19 = vpop.f32.mrb[0].mxu0 }
  0xea   : > { %v544_v21 = vadd.f32 %v543_v19, %v458_v18  ;;  %v545_v22 = vpop.f32.mrb[1].mxu0 }
  0xeb   : > { %v547_v23 = vpop.f32.mrb[2].mxu0  ;;  %v546_v26 = vadd.f32 %v545_v22, %v462_v20  ;;  %v552_v22 = vld [vmem:[%s3187_s3] sm:$0xf] }
  0xec   : > { %v548_v24 = vadd.f32 %v547_v23, %v458_v18  ;;  %v549_v25 = vpop.f32.mrb[3].mxu0  ;;  %v560_v28 = vmul.f32 0.35355338, %v544_v21  ;;  %v861_v23 = vsel %vm812_vm4, %v552_v22, 0 }
  0xed   : > { %v550_v27 = vadd.f32 %v549_v25, %v462_v20 }
  0xee   : > { %v561_v29 = vmul.f32 0.35355338, %v548_v24  ;;  %v2866_v30 = vpack.c.bf16 %v548_v24, %v544_v21  ;;  %v553_v24 = vld [vmem:[%s3187_s3 + $0x4] sm:$0xf] }
  0xef   : > { %v2868_v31 = vpack.c.bf16 %v550_v27, %v546_v26  ;;  %v814_v25 = vsel %vm812_vm4, %v553_v24, 0 }
  0xf0   : > { %v2870_v32 = vpack.c.bf16 %v561_v29, %v560_v28  ;;  %566 = vrot.lane.b32.xlu0 %v2866_v30, %s2727_s17  ;;  %s2734_s17 = smov 32  }
  0xf1   : > { %2423 = vmatpush3.bf16.msra.mxu1 %v2868_v31 }
  0xf2   : > { %686 = vrot.lane.b32.xlu1 %v2870_v32, %s2728_s18  ;;  %2434 = vmatprep.subr.bf16.mxu1 %v2725_v12 }
  0xf4   : > { %688 = vrot.lane.b32.xlu0 %v2866_v30, %s2729_s19 }
 0x162   : > { %v567_v33 = vpop.permute.xlu0 %566 }
 0x163   : > { %v573_v34 = vsel %vm568_vm2, %v567_v33, 0 }
 0x164   : > { %2417 = vmatpush3.bf16.xpose.msra.mxu0 %v573_v34  ;;  %v687_v37 = vpop.permute.xlu1 %686 }
 0x165   : > { %2428 = vmatprep.subr.bf16.mxu0 %v2725_v12 }
 0x166   : > { %v689_v35 = vpop.permute.xlu0 %688 }
 0x167   : > { %v694_v36 = vsel %vm568_vm2, %v689_v35, 0 }
 0x16b   : > { %2419 = vmatmul.mubr.msk.bf16.vlgmr.msra.gmra.mrb[4].mxu0 %vm568_vm2, %v2870_v32 }
 0x16c   : > { %2429 = vmatpush3.bf16.xpose.msra.mxu0 %v694_v36  ;;  %2430 = vmatprep.mubr.msk.bf16.mxu0 %vm2726_vm1, %v2725_v12 }
 0x16d   : > { %2440 = vmatprep.subr.bf16.mxu0 %v2725_v12 }
 0x173   : > { %2431 = vmatmul.mubr.msk.bf16.vlgmr.msra.gmra.mrb[8].mxu0 %vm568_vm2, %v687_v37 }
 0x174   : > { %2442 = vmatprep.mubr.msk.bf16.mxu0 %vm2726_vm1, %v2725_v12  ;;  %2441 = vmatpush3.bf16.msra.mxu0 %v814_v25 }
 0x175   : > { %2452 = vmatprep.subr.bf16.mxu0 %v2725_v12 }
 0x23e   : > { %v609_v38 = vpop.f32.mrb[4].mxu0 }
 0x23f   : > { %v2420_v39 = vpop.f32.mrb[5].mxu0  ;;  %v617_v40 = vsel %vm616_vm3, %v609_v38, -inf }
 0x240   : > { %618 = vmax.xlane.f32.xlu1 %v617_v40  ;;  %v612_v41 = vpop.f32.mrb[6].mxu0 }
 0x241   : > { %v2421_v42 = vpop.f32.mrb[7].mxu0  ;;  %v620_v43 = vsel %vm616_vm3, %v612_v41, -inf }
 0x242   : > { %621 = vmax.xlane.f32.xlu0 %v620_v43 }
 0x246   : > { %v730_v44 = vpop.f32.mrb[8].mxu0 }
 0x247   : > { %v2432_v45 = vpop.f32.mrb[9].mxu0  ;;  %v737_v46 = vsel %vm616_vm3, %v730_v44, -inf }
 0x248   : > { %738 = vmax.xlane.f32.xlu0 %v737_v46  ;;  %v733_v47 = vpop.f32.mrb[10].mxu0 }
 0x249   : > { %v2433_v48 = vpop.f32.mrb[11].mxu0  ;;  %v740_v49 = vsel %vm616_vm3, %v733_v47, -inf }
 0x24a   : > { %741 = vmax.xlane.f32.xlu1 %v740_v49 }
 0x2cd   : > { %v619_v50 = vpop.xlane.xlu1 %618 }
 0x2ce   : > { %v623_v51 = vsub.f32 %v609_v38, %v619_v50 }
 0x2cf   : > { %v622_v52 = vpop.xlane.xlu0 %621 }
 0x2d0   : > { %v625_v53 = vmul.f32 1.442695, %v623_v51  ;;  %v624_v54 = vsub.f32 %v612_v41, %v622_v52 }
 0x2d2   : > { %2642 = vpow2.f32 %v625_v53  ;;  %v627_v55 = vmul.f32 1.442695, %v624_v54 }
 0x2d4   : > { %2644 = vpow2.f32 %v627_v55 }
 0x2d5   : > { %v739_v56 = vpop.xlane.xlu0 %738 }
 0x2d6   : > { %v743_v57 = vsub.f32 %v730_v44, %v739_v56 }
 0x2d7   : > { %v742_v58 = vpop.xlane.xlu1 %741 }
 0x2d8   : > { %v745_v59 = vmul.f32 1.442695, %v743_v57  ;;  %v744_v60 = vsub.f32 %v733_v47, %v742_v58 }
 0x2da   : > { %2646 = vpow2.f32 %v745_v59  ;;  %v747_v61 = vmul.f32 1.442695, %v744_v60 }
 0x2dc   : > { %v2643_v62 = vpop.eup %2642  ;;  %2648 = vpow2.f32 %v747_v61 }
 0x2dd   : > { %v629_v63 = vsel %vm616_vm3, %v2643_v62, 0.0 }
 0x2de   : > { %v2645_v0 = vpop.eup %2644  ;;  %630 = vadd.xlane.f32.xlu0 %v629_v63 }
 0x2df   : > { %v632_v1 = vsel %vm616_vm3, %v2645_v0, 0.0 }
 0x2e0   : > { %633 = vadd.xlane.f32.xlu1 %v632_v1 }
 0x2e4   : > { %v2647_v2 = vpop.eup %2646 }
 0x2e5   : > { %v749_v3 = vsel %vm616_vm3, %v2647_v2, 0.0 }
 0x2e6   : > { %v2649_v4 = vpop.eup %2648  ;;  %750 = vadd.xlane.f32.xlu0 %v749_v3 }
 0x2e7   : > { %v752_v5 = vsel %vm616_vm3, %v2649_v4, 0.0 }
 0x2e8   : > { %753 = vadd.xlane.f32.xlu1 %v752_v5 }
 0x2f9   : > { %906 = vrot.lane.b32.xlu1 %v2866_v30, %s2730_s21  ;;  %s440_s21 = scalar_lea.vmem %s3197_s13, %s2352_s20 }
 0x2fc   : > { %761 = vrot.lane.b32.xlu0 %v2868_v31, %s2728_s18  ;;  %s2735_s18 = smov 96  }
 0x2fd   : > { %904 = vrot.lane.b32.xlu1 %v2870_v32, %s2731_s22 }
 0x36b   : > { %v631_v6 = vpop.xlane.xlu0 %630 }
 0x36c   : > { %2650 = vrcp.f32 %v631_v6 }
 0x36d   : > { %v634_v7 = vpop.xlane.xlu1 %633 }
 0x36e   : > { %2652 = vrcp.f32 %v634_v7 }
 0x373   : > { %v751_v8 = vpop.xlane.xlu0 %750 }
 0x374   : > { %2654 = vrcp.f32 %v751_v8 }
 0x375   : > { %v754_v9 = vpop.xlane.xlu1 %753 }
 0x376   : > { %v2651_v10 = vpop.eup %2650  ;;  %2656 = vrcp.f32 %v754_v9 }
 0x377   : > { %v637_v13 = vmul.f32 %v2651_v10, %v2643_v62  ;;  %v762_v16 = vpop.permute.xlu0 %761 }
 0x378   : > { %v2653_v11 = vpop.eup %2652 }
 0x379   : > { %v638_v14 = vmul.f32 %v2653_v11, %v2645_v0  ;;  %v907_v36 = vpop.permute.xlu1 %906 }
 0x37a   : > { %v912_v40 = vsel %vm568_vm2, %v907_v36, 0 }
 0x37b   : > { %v639_v15 = vpack.c.bf16 %v638_v14, %v637_v13 }
 0x37d   : > { %2425 = vmatmul.mubr.msk.bf16.vlgmr.msra.gmra.mrb[0].mxu1 %vm616_vm3, %v639_v15  ;;  %v905_v41 = vpop.permute.xlu1 %904 }
 0x37e   : > { %v2655_v17 = vpop.eup %2654  ;;  %2435 = vmatpush3.bf16.msra.mxu1 %v762_v16  ;;  %2436 = vmatprep.mubr.msk.bf16.mxu1 %vm2726_vm1, %v2725_v12  ;;  %v554_v16 = vld [vmem:[%s3187_s3 + $0x8] sm:$0xf] }
 0x37f   : > { %2446 = vmatprep.subr.bf16.mxu1 %v2725_v12  ;;  %v757_v19 = vmul.f32 %v2655_v17, %v2647_v2  ;;  %v1030_v17 = vsel %vm812_vm4, %v554_v16, 0 }
 0x380   : > { %v2657_v18 = vpop.eup %2656 }
 0x381   : > { %v758_v20 = vmul.f32 %v2657_v18, %v2649_v4 }
 0x383   : > { %v759_v21 = vpack.c.bf16 %v758_v20, %v757_v19 }
 0x385   : > { %2437 = vmatmul.mubr.msk.bf16.vlgmr.msra.gmra.mrb[4].mxu1 %vm616_vm3, %v759_v21 }
 0x386   : > { %2448 = vmatprep.mubr.msk.bf16.mxu1 %vm2726_vm1, %v2725_v12  ;;  %2447 = vmatpush3.bf16.msra.mxu1 %v861_v23 }
 0x387   : > { %2458 = vmatprep.subr.bf16.mxu1 %v2725_v12 }
 0x450   : > { %v677_v26 = vpop.f32.mrb[0].mxu1 }
 0x451   : > { %v2426_v27 = vpop.f32.mrb[1].mxu1 }
 0x452   : > { %v680_v28 = vpop.f32.mrb[2].mxu1 }
 0x453   : > { %v684_v29 = vpack.c.bf16 %v680_v28, %v677_v26  ;;  %v2427_v33 = vpop.f32.mrb[3].mxu1 }
 0x455   : > { %2449 = vmatmul.mubr.msk.bf16.vlgmr.msra.gmra.mrb[8].mxu1 %vm568_vm2, %v684_v29 }
 0x456   : > { %2460 = vmatprep.mubr.msk.bf16.mxu1 %vm2726_vm1, %v2725_v12 }
 0x458   : > { %v801_v34 = vpop.f32.mrb[4].mxu1 }
 0x459   : > { %v2438_v35 = vpop.f32.mrb[5].mxu1 }
 0x45a   : > { %v804_v37 = vpop.f32.mrb[6].mxu1 }
 0x45b   : > { %v808_v38 = vpack.c.bf16 %v804_v37, %v801_v34  ;;  %v2439_v39 = vpop.f32.mrb[7].mxu1 }
 0x45d   : > { %2443 = vmatmul.mubr.msk.bf16.vlgmr.msra.gmra.mrb[12].mxu0 %vm568_vm2, %v808_v38 }
 0x45e   : > { %2453 = vmatpush3.bf16.xpose.msra.mxu0 %v912_v40  ;;  %2454 = vmatprep.mubr.msk.bf16.mxu0 %vm2726_vm1, %v2725_v12 }
 0x45f   : > { %2464 = vmatprep.subr.bf16.mxu0 %v2725_v12 }
 0x465   : > { %2455 = vmatmul.mubr.msk.bf16.vlgmr.msra.gmra.mrb[16].mxu0 %vm568_vm2, %v905_v41 }
 0x466   : > { %2466 = vmatprep.mubr.msk.bf16.mxu0 %vm2726_vm1, %v2725_v12  ;;  %2465 = vmatpush3.bf16.msra.mxu0 %v1030_v17 }
 0x467   : > { %2476 = vmatprep.subr.bf16.mxu0 %v2725_v12 }
 0x528   : > { %v897_v42 = vpop.f32.mrb[8].mxu1 }
 0x529   : > { %v2450_v43 = vpop.f32.mrb[9].mxu1 }
 0x52a   : > { %v900_v44 = vpop.f32.mrb[10].mxu1 }
 0x52b   : > { %v2451_v45 = vpop.f32.mrb[11].mxu1 }
 0x530   : > { %v850_v46 = vpop.f32.mrb[12].mxu0 }
 0x531   : > { %v2930_v47 = vadd.f32 %v897_v42, %v850_v46  ;;  %v2444_v48 = vpop.f32.mrb[13].mxu0 }
 0x532   : > { %v853_v49 = vpop.f32.mrb[14].mxu0 }
 0x533   : > { %v2932_v50 = vadd.f32 %v900_v44, %v853_v49  ;;  %v2445_v51 = vpop.f32.mrb[15].mxu0 }
 0x538   : > { %v948_v52 = vpop.f32.mrb[16].mxu0 }
 0x539   : > { %v2456_v53 = vpop.f32.mrb[17].mxu0  ;;  %v955_v54 = vsel %vm616_vm3, %v948_v52, -inf }
 0x53a   : > { %956 = vmax.xlane.f32.xlu0 %v955_v54  ;;  %v951_v55 = vpop.f32.mrb[18].mxu0 }
 0x53b   : > { %v2457_v56 = vpop.f32.mrb[19].mxu0  ;;  %v958_v57 = vsel %vm616_vm3, %v951_v55, -inf }
 0x53c   : > { %959 = vmax.xlane.f32.xlu1 %v958_v57 }
 0x54d   : > { %978 = vrot.lane.b32.xlu1 %v2868_v31, %s2731_s22  ;;  %s2736_s22 = smov 88  }
 0x551   : > { %1075 = vrot.lane.b32.xlu1 %v2870_v32, %s2732_s30 }
 0x5c7   : > { %v957_v58 = vpop.xlane.xlu0 %956 }
 0x5c8   : > { %v961_v59 = vsub.f32 %v948_v52, %v957_v58 }
 0x5c9   : > { %v960_v60 = vpop.xlane.xlu1 %959 }
 0x5ca   : > { %v963_v61 = vmul.f32 1.442695, %v961_v59  ;;  %v962_v62 = vsub.f32 %v951_v55, %v960_v60  ;;  %v555_v59 = vld [vmem:[%s3187_s3 + $0xc] sm:$0xf] }
 0x5cb   : > { %v1201_v60 = vsel %vm812_vm4, %v555_v59, 0 }
 0x5cc   : > { %2658 = vpow2.f32 %v963_v61  ;;  %v965_v63 = vmul.f32 1.442695, %v962_v62 }
 0x5cd   : > { %v979_v0 = vpop.permute.xlu1 %978 }
 0x5ce   : > { %2660 = vpow2.f32 %v965_v63  ;;  %2459 = vmatpush3.bf16.msra.mxu1 %v979_v0 }
 0x5cf   : > { %2470 = vmatprep.subr.bf16.mxu1 %v2725_v12 }
 0x5d1   : > { %v1076_v15 = vpop.permute.xlu1 %1075 }
 0x5d6   : > { %v2659_v1 = vpop.eup %2658 }
 0x5d7   : > { %v967_v2 = vsel %vm616_vm3, %v2659_v1, 0.0 }
 0x5d8   : > { %v2661_v3 = vpop.eup %2660  ;;  %968 = vadd.xlane.f32.xlu0 %v967_v2 }
 0x5d9   : > { %v970_v4 = vsel %vm616_vm3, %v2661_v3, 0.0 }
 0x5dc   : > { %971 = vadd.xlane.f32.xlu0 %v970_v4 }
 0x5f2   : > { %1077 = vrot.lane.b32.xlu0 %v2866_v30, %s2733_s14 }
 0x665   : > { %v969_v5 = vpop.xlane.xlu0 %968 }
 0x666   : > { %2662 = vrcp.f32 %v969_v5 }
 0x669   : > { %v972_v6 = vpop.xlane.xlu0 %971 }
 0x66a   : > { %2664 = vrcp.f32 %v972_v6 }
 0x66d   : > { %v1078_v11 = vpop.permute.xlu0 %1077 }
 0x66e   : > { %v1083_v14 = vsel %vm568_vm2, %v1078_v11, 0 }
 0x670   : > { %v2663_v7 = vpop.eup %2662 }
 0x671   : > { %v975_v9 = vmul.f32 %v2663_v7, %v2659_v1 }
 0x674   : > { %v2665_v8 = vpop.eup %2664 }
 0x675   : > { %v976_v10 = vmul.f32 %v2665_v8, %v2661_v3 }
 0x677   : > { %v977_v13 = vpack.c.bf16 %v976_v10, %v975_v9 }
 0x679   : > { %2461 = vmatmul.mubr.msk.bf16.vlgmr.msra.gmra.mrb[12].mxu1 %vm616_vm3, %v977_v13 }
 0x67a   : > { %2471 = vmatpush3.bf16.xpose.msra.mxu1 %v1083_v14  ;;  %2472 = vmatprep.mubr.msk.bf16.mxu1 %vm2726_vm1, %v2725_v12 }
 0x67b   : > { %2482 = vmatprep.subr.bf16.mxu1 %v2725_v12 }
 0x681   : > { %2473 = vmatmul.mubr.msk.bf16.vlgmr.msra.gmra.mrb[16].mxu1 %vm568_vm2, %v1076_v15 }
 0x682   : > { %2484 = vmatprep.mubr.msk.bf16.mxu1 %vm2726_vm1, %v2725_v12  ;;  %2483 = vmatpush3.bf16.msra.mxu1 %v1201_v60 }
 0x683   : > { %2494 = vmatprep.subr.bf16.mxu1 %v2725_v12 }
 0x74c   : > { %v1018_v18 = vpop.f32.mrb[12].mxu1 }
 0x74d   : > { %v2462_v19 = vpop.f32.mrb[13].mxu1 }
 0x74e   : > { %v1021_v20 = vpop.f32.mrb[14].mxu1 }
 0x74f   : > { %v1025_v21 = vpack.c.bf16 %v1021_v20, %v1018_v18  ;;  %v2463_v22 = vpop.f32.mrb[15].mxu1 }
 0x751   : > { %2467 = vmatmul.mubr.msk.bf16.vlgmr.msra.gmra.mrb[20].mxu0 %vm568_vm2, %v1025_v21 }
 0x752   : > { %2478 = vmatprep.mubr.msk.bf16.mxu0 %vm2726_vm1, %v2725_v12 }
 0x754   : > { %v1119_v23 = vpop.f32.mrb[16].mxu1 }
 0x755   : > { %v2474_v24 = vpop.f32.mrb[17].mxu1  ;;  %v1126_v25 = vsel %vm616_vm3, %v1119_v23, -inf }
 0x756   : > { %1127 = vmax.xlane.f32.xlu1 %v1126_v25  ;;  %v1122_v26 = vpop.f32.mrb[18].mxu1 }
 0x757   : > { %v2475_v27 = vpop.f32.mrb[19].mxu1  ;;  %v1129_v28 = vsel %vm616_vm3, %v1122_v26, -inf }
 0x758   : > { %1130 = vmax.xlane.f32.xlu0 %v1129_v28 }
 0x7e3   : > { %v1128_v29 = vpop.xlane.xlu1 %1127 }
 0x7e4   : > { %v1132_v33 = vsub.f32 %v1119_v23, %v1128_v29 }
 0x7e5   : > { %v1131_v34 = vpop.xlane.xlu0 %1130 }
 0x7e6   : > { %v1134_v35 = vmul.f32 1.442695, %v1132_v33  ;;  %v1133_v36 = vsub.f32 %v1122_v26, %v1131_v34 }
 0x7e8   : > { %2666 = vpow2.f32 %v1134_v35  ;;  %v1136_v37 = vmul.f32 1.442695, %v1133_v36 }
 0x7ea   : > { %2668 = vpow2.f32 %v1136_v37 }
 0x7f2   : > { %v2667_v38 = vpop.eup %2666 }
 0x7f3   : > { %v1138_v39 = vsel %vm616_vm3, %v2667_v38, 0.0 }
 0x7f4   : > { %v2669_v40 = vpop.eup %2668  ;;  %1139 = vadd.xlane.f32.xlu0 %v1138_v39  ;;  %v556_v39 = vld [vmem:[%s3187_s3 + $0x10] sm:$0xf] }
 0x7f5   : > { %v1141_v41 = vsel %vm616_vm3, %v2669_v40, 0.0 }
 0x7f6   : > { %1142 = vadd.xlane.f32.xlu1 %v1141_v41 }
 0x807   : > { %1248 = vrot.lane.b32.xlu1 %v2866_v30, %s2734_s17  ;;  %s2741_s17 = smov 8  }
 0x80a   : > { %1149 = vrot.lane.b32.xlu0 %v2868_v31, %s2732_s30  ;;  %s2739_s30 = smov 80  }
 0x80b   : > { %1246 = vrot.lane.b32.xlu1 %v2870_v32, %s2735_s18 }
 0x824   : > { %v1066_v42 = vpop.f32.mrb[20].mxu0 }
 0x825   : > { %v2970_v43 = vadd.f32 %v1066_v42, %v2930_v47  ;;  %v2468_v44 = vpop.f32.mrb[21].mxu0 }
 0x826   : > { %v1069_v45 = vpop.f32.mrb[22].mxu0 }
 0x827   : > { %v2973_v46 = vadd.f32 %v1069_v45, %v2932_v50  ;;  %v2469_v48 = vpop.f32.mrb[23].mxu0 }
 0x881   : > { %v1140_v49 = vpop.xlane.xlu0 %1139 }
 0x882   : > { %2670 = vrcp.f32 %v1140_v49 }
 0x883   : > { %v1143_v51 = vpop.xlane.xlu1 %1142 }
 0x884   : > { %2672 = vrcp.f32 %v1143_v51 }
 0x885   : > { %v1150_v52 = vpop.permute.xlu0 %1149 }
 0x886   : > { %2477 = vmatpush3.bf16.msra.mxu0 %v1150_v52 }
 0x887   : > { %2488 = vmatprep.subr.bf16.mxu0 %v2725_v12  ;;  %v1249_v47 = vpop.permute.xlu1 %1248 }
 0x888   : > { %v1254_v58 = vsel %vm568_vm2, %v1249_v47, 0 }
 0x88b   : > { %v1247_v50 = vpop.permute.xlu1 %1246 }
 0x88c   : > { %v2671_v53 = vpop.eup %2670 }
 0x88d   : > { %v1146_v55 = vmul.f32 %v2671_v53, %v2667_v38 }
 0x88e   : > { %v2673_v54 = vpop.eup %2672 }
 0x88f   : > { %v1147_v56 = vmul.f32 %v2673_v54, %v2669_v40  ;;  %v1372_v40 = vsel %vm812_vm4, %v556_v39, 0 }
 0x891   : > { %v1148_v57 = vpack.c.bf16 %v1147_v56, %v1146_v55 }
 0x893   : > { %2479 = vmatmul.mubr.msk.bf16.vlgmr.msra.gmra.mrb[24].mxu0 %vm616_vm3, %v1148_v57 }
 0x894   : > { %2489 = vmatpush3.bf16.xpose.msra.mxu0 %v1254_v58  ;;  %2490 = vmatprep.mubr.msk.bf16.mxu0 %vm2726_vm1, %v2725_v12 }
 0x895   : > { %2500 = vmatprep.subr.bf16.mxu0 %v2725_v12 }
 0x89b   : > { %2491 = vmatmul.mubr.msk.bf16.vlgmr.msra.gmra.mrb[28].mxu0 %vm568_vm2, %v1247_v50 }
 0x89c   : > { %2502 = vmatprep.mubr.msk.bf16.mxu0 %vm2726_vm1, %v2725_v12  ;;  %2501 = vmatpush3.bf16.msra.mxu0 %v1372_v40 }
 0x89d   : > { %2512 = vmatprep.subr.bf16.mxu0 %v2725_v12 }
 0x966   : > { %v1189_v61 = vpop.f32.mrb[24].mxu0 }
 0x967   : > { %v2480_v62 = vpop.f32.mrb[25].mxu0 }
 0x968   : > { %v1192_v63 = vpop.f32.mrb[26].mxu0 }
 0x969   : > { %v1196_v0 = vpack.c.bf16 %v1192_v63, %v1189_v61  ;;  %v2481_v1 = vpop.f32.mrb[27].mxu0 }
 0x96b   : > { %2485 = vmatmul.mubr.msk.bf16.vlgmr.msra.gmra.mrb[20].mxu1 %vm568_vm2, %v1196_v0 }
 0x96c   : > { %2496 = vmatprep.mubr.msk.bf16.mxu1 %vm2726_vm1, %v2725_v12 }
 0x96e   : > { %v1290_v2 = vpop.f32.mrb[28].mxu0 }
 0x96f   : > { %v2492_v3 = vpop.f32.mrb[29].mxu0  ;;  %v1297_v4 = vsel %vm616_vm3, %v1290_v2, -inf }
 0x970   : > { %1298 = vmax.xlane.f32.xlu0 %v1297_v4  ;;  %v1293_v5 = vpop.f32.mrb[30].mxu0 }
 0x971   : > { %v2493_v6 = vpop.f32.mrb[31].mxu0  ;;  %v1300_v7 = vsel %vm616_vm3, %v1293_v5, -inf }
 0x972   : > { %1301 = vmax.xlane.f32.xlu1 %v1300_v7 }
 0x983   : > { %1320 = vrot.lane.b32.xlu1 %v2868_v31, %s2735_s18 }
 0x987   : > { %1417 = vrot.lane.b32.xlu1 %v2870_v32, %s2736_s22 }
 0x9fd   : > { %v1299_v8 = vpop.xlane.xlu0 %1298 }
 0x9fe   : > { %v1303_v9 = vsub.f32 %v1290_v2, %v1299_v8 }
 0x9ff   : > { %v1302_v10 = vpop.xlane.xlu1 %1301 }
 0xa00   : > { %v1305_v11 = vmul.f32 1.442695, %v1303_v9  ;;  %v1304_v13 = vsub.f32 %v1293_v5, %v1302_v10 }
 0xa02   : > { %2674 = vpow2.f32 %v1305_v11  ;;  %v1307_v14 = vmul.f32 1.442695, %v1304_v13 }
 0xa03   : > { %v1321_v15 = vpop.permute.xlu1 %1320 }
 0xa04   : > { %2676 = vpow2.f32 %v1307_v14  ;;  %2495 = vmatpush3.bf16.msra.mxu1 %v1321_v15 }
 0xa05   : > { %2506 = vmatprep.subr.bf16.mxu1 %v2725_v12 }
 0xa07   : > { %v1418_v38 = vpop.permute.xlu1 %1417 }
 0xa0c   : > { %v2675_v16 = vpop.eup %2674 }
 0xa0d   : > { %v1309_v17 = vsel %vm616_vm3, %v2675_v16, 0.0 }
 0xa0e   : > { %v2677_v18 = vpop.eup %2676  ;;  %1310 = vadd.xlane.f32.xlu0 %v1309_v17 }
 0xa0f   : > { %v1312_v19 = vsel %vm616_vm3, %v2677_v18, 0.0 }
 0xa12   : > { %1313 = vadd.xlane.f32.xlu0 %v1312_v19 }
 0xa28   : > { %1419 = vrot.lane.b32.xlu0 %v2866_v30, %s2737_s23 }
 0xa3e   : > { %v1237_v20 = vpop.f32.mrb[20].mxu1 }
 0xa3f   : > { %v1244_v21 = vadd.f32 %v1237_v20, %v2970_v43  ;;  %v2486_v22 = vpop.f32.mrb[21].mxu1 }
 0xa40   : > { %v1240_v23 = vpop.f32.mrb[22].mxu1 }
 0xa41   : > { %v1245_v24 = vadd.f32 %v1240_v23, %v2973_v46  ;;  %v2487_v25 = vpop.f32.mrb[23].mxu1 }
 0xa9b   : > { %v1311_v26 = vpop.xlane.xlu0 %1310 }
 0xa9c   : > { %2678 = vrcp.f32 %v1311_v26 }
 0xa9f   : > { %v1314_v27 = vpop.xlane.xlu0 %1313 }
 0xaa0   : > { %2680 = vrcp.f32 %v1314_v27 }
 0xaa3   : > { %v1420_v35 = vpop.permute.xlu0 %1419 }
 0xaa4   : > { %v1425_v37 = vsel %vm568_vm2, %v1420_v35, 0 }
 0xaa6   : > { %v2679_v28 = vpop.eup %2678 }
 0xaa7   : > { %v1317_v33 = vmul.f32 %v2679_v28, %v2675_v16  ;;  %v557_v16 = vld [vmem:[%s3187_s3 + $0x14] sm:$0xf] }
 0xaa8   : > { %v1543_v17 = vsel %vm812_vm4, %v557_v16, 0 }
 0xaaa   : > { %v2681_v29 = vpop.eup %2680 }
 0xaab   : > { %v1318_v34 = vmul.f32 %v2681_v29, %v2677_v18 }
 0xaad   : > { %v1319_v36 = vpack.c.bf16 %v1318_v34, %v1317_v33 }
 0xaaf   : > { %2497 = vmatmul.mubr.msk.bf16.vlgmr.msra.gmra.mrb[24].mxu1 %vm616_vm3, %v1319_v36 }
 0xab0   : > { %2507 = vmatpush3.bf16.xpose.msra.mxu1 %v1425_v37  ;;  %2508 = vmatprep.mubr.msk.bf16.mxu1 %vm2726_vm1, %v2725_v12 }
 0xab1   : > { %2518 = vmatprep.subr.bf16.mxu1 %v2725_v12 }
 0xab7   : > { %2509 = vmatmul.mubr.msk.bf16.vlgmr.msra.gmra.mrb[28].mxu1 %vm568_vm2, %v1418_v38 }
 0xab8   : > { %2520 = vmatprep.mubr.msk.bf16.mxu1 %vm2726_vm1, %v2725_v12  ;;  %2519 = vmatpush3.bf16.msra.mxu1 %v1543_v17  ;;  %v559_v17 = vld [vmem:[%s3187_s3 + $0x1c] sm:$0xf] }
 0xab9   : > { %2530 = vmatprep.subr.bf16.mxu1 %v2725_v12 }
 0xb82   : > { %v1360_v41 = vpop.f32.mrb[24].mxu1 }
 0xb83   : > { %v2498_v42 = vpop.f32.mrb[25].mxu1 }
 0xb84   : > { %v1363_v43 = vpop.f32.mrb[26].mxu1 }
 0xb85   : > { %v1367_v44 = vpack.c.bf16 %v1363_v43, %v1360_v41  ;;  %v2499_v45 = vpop.f32.mrb[27].mxu1 }
 0xb87   : > { %2503 = vmatmul.mubr.msk.bf16.vlgmr.msra.gmra.mrb[32].mxu0 %vm568_vm2, %v1367_v44 }
 0xb88   : > { %2514 = vmatprep.mubr.msk.bf16.mxu0 %vm2726_vm1, %v2725_v12 }
 0xb8a   : > { %v1461_v46 = vpop.f32.mrb[28].mxu1 }
 0xb8b   : > { %v2510_v48 = vpop.f32.mrb[29].mxu1  ;;  %v1468_v49 = vsel %vm616_vm3, %v1461_v46, -inf }
 0xb8c   : > { %1469 = vmax.xlane.f32.xlu1 %v1468_v49  ;;  %v1464_v51 = vpop.f32.mrb[30].mxu1 }
 0xb8d   : > { %v2511_v52 = vpop.f32.mrb[31].mxu1  ;;  %v1471_v53 = vsel %vm616_vm3, %v1464_v51, -inf }
 0xb8e   : > { %1472 = vmax.xlane.f32.xlu0 %v1471_v53 }
 0xc19   : > { %v1470_v54 = vpop.xlane.xlu1 %1469 }
 0xc1a   : > { %v1474_v55 = vsub.f32 %v1461_v46, %v1470_v54 }
 0xc1b   : > { %v1473_v56 = vpop.xlane.xlu0 %1472 }
 0xc1c   : > { %v1476_v47 = vmul.f32 1.442695, %v1474_v55  ;;  %v1475_v57 = vsub.f32 %v1464_v51, %v1473_v56 }
 0xc1e   : > { %2682 = vpow2.f32 %v1476_v47  ;;  %v1478_v58 = vmul.f32 1.442695, %v1475_v57 }
 0xc20   : > { %2684 = vpow2.f32 %v1478_v58  ;;  %v558_v58 = vld [vmem:[%s3187_s3 + $0x18] sm:$0xf] }
 0xc28   : > { %v2683_v50 = vpop.eup %2682 }
 0xc29   : > { %v1480_v59 = vsel %vm616_vm3, %v2683_v50, 0.0 }
 0xc2a   : > { %v2685_v60 = vpop.eup %2684  ;;  %1481 = vadd.xlane.f32.xlu0 %v1480_v59 }
 0xc2b   : > { %v1483_v61 = vsel %vm616_vm3, %v2685_v60, 0.0 }
 0xc2c   : > { %1484 = vadd.xlane.f32.xlu1 %v1483_v61 }
 0xc3d   : > { %1590 = vrot.lane.b32.xlu1 %v2866_v30, %s2738_s28 }
 0xc40   : > { %1491 = vrot.lane.b32.xlu0 %v2868_v31, %s2736_s22 }
 0xc41   : > { %1588 = vrot.lane.b32.xlu1 %v2870_v32, %s2739_s30 }
 0xc5a   : > { %v1408_v62 = vpop.f32.mrb[32].mxu0 }
 0xc5b   : > { %v3029_v63 = vadd.f32 %v1408_v62, %v1244_v21  ;;  %v2504_v0 = vpop.f32.mrb[33].mxu0 }
 0xc5c   : > { %v1411_v1 = vpop.f32.mrb[34].mxu0 }
 0xc5d   : > { %v3031_v2 = vadd.f32 %v1411_v1, %v1245_v24  ;;  %v2505_v3 = vpop.f32.mrb[35].mxu0 }
 0xcb7   : > { %v1482_v4 = vpop.xlane.xlu0 %1481 }
 0xcb8   : > { %2686 = vrcp.f32 %v1482_v4 }
 0xcb9   : > { %v1485_v5 = vpop.xlane.xlu1 %1484 }
 0xcba   : > { %2688 = vrcp.f32 %v1485_v5 }
 0xcbb   : > { %v1492_v6 = vpop.permute.xlu0 %1491 }
 0xcbc   : > { %2513 = vmatpush3.bf16.msra.mxu0 %v1492_v6 }
 0xcbd   : > { %2524 = vmatprep.subr.bf16.mxu0 %v2725_v12  ;;  %v1591_v11 = vpop.permute.xlu1 %1590 }
 0xcbe   : > { %v1596_v14 = vsel %vm568_vm2, %v1591_v11, 0 }
 0xcc1   : > { %v1589_v15 = vpop.permute.xlu1 %1588 }
 0xcc2   : > { %v2687_v7 = vpop.eup %2686 }
 0xcc3   : > { %v1488_v9 = vmul.f32 %v2687_v7, %v2683_v50  ;;  %v1714_v50 = vsel %vm812_vm4, %v558_v58, 0 }
 0xcc4   : > { %v2689_v8 = vpop.eup %2688 }
 0xcc5   : > { %v1489_v10 = vmul.f32 %v2689_v8, %v2685_v60 }
 0xcc7   : > { %v1490_v13 = vpack.c.bf16 %v1489_v10, %v1488_v9 }
 0xcc9   : > { %2515 = vmatmul.mubr.msk.bf16.vlgmr.msra.gmra.mrb[36].mxu0 %vm616_vm3, %v1490_v13 }
 0xcca   : > { %2525 = vmatpush3.bf16.xpose.msra.mxu0 %v1596_v14  ;;  %2526 = vmatprep.mubr.msk.bf16.mxu0 %vm2726_vm1, %v2725_v12 }
 0xccb   : > { %2536 = vmatprep.subr.bf16.mxu0 %v2725_v12 }
 0xcd1   : > { %2527 = vmatmul.mubr.msk.bf16.vlgmr.msra.gmra.mrb[40].mxu0 %vm568_vm2, %v1589_v15 }
 0xcd2   : > { %2538 = vmatprep.mubr.msk.bf16.mxu0 %vm2726_vm1, %v2725_v12  ;;  %2537 = vmatpush3.bf16.msra.mxu0 %v1714_v50 }
 0xcd3   : > { %2548 = vmatprep.subr.bf16.mxu0 %v2725_v12 }
 0xd9c   : > { %v1531_v18 = vpop.f32.mrb[36].mxu0 }
 0xd9d   : > { %v2516_v19 = vpop.f32.mrb[37].mxu0 }
 0xd9e   : > { %v1534_v20 = vpop.f32.mrb[38].mxu0 }
 0xd9f   : > { %v1538_v21 = vpack.c.bf16 %v1534_v20, %v1531_v18  ;;  %v2517_v22 = vpop.f32.mrb[39].mxu0  ;;  %v1885_v18 = vsel %vm812_vm4, %v559_v17, 0 }
 0xda1   : > { %2521 = vmatmul.mubr.msk.bf16.vlgmr.msra.gmra.mrb[32].mxu1 %vm568_vm2, %v1538_v21 }
 0xda2   : > { %2532 = vmatprep.mubr.msk.bf16.mxu1 %vm2726_vm1, %v2725_v12 }
 0xda4   : > { %v1632_v23 = vpop.f32.mrb[40].mxu0 }
 0xda5   : > { %v2528_v24 = vpop.f32.mrb[41].mxu0  ;;  %v1639_v25 = vsel %vm616_vm3, %v1632_v23, -inf }
 0xda6   : > { %1640 = vmax.xlane.f32.xlu0 %v1639_v25  ;;  %v1635_v26 = vpop.f32.mrb[42].mxu0 }
 0xda7   : > { %v2529_v27 = vpop.f32.mrb[43].mxu0  ;;  %v1642_v28 = vsel %vm616_vm3, %v1635_v26, -inf }
 0xda8   : > { %1643 = vmax.xlane.f32.xlu1 %v1642_v28 }
 0xdb9   : > { %1662 = vrot.lane.b32.xlu1 %v2868_v31, %s2739_s30 }
 0xdbd   : > { %1759 = vrot.lane.b32.xlu1 %v2870_v32, %s2740_s16 }
 0xe33   : > { %v1641_v29 = vpop.xlane.xlu0 %1640 }
 0xe34   : > { %v1645_v33 = vsub.f32 %v1632_v23, %v1641_v29 }
 0xe35   : > { %v1644_v34 = vpop.xlane.xlu1 %1643 }
 0xe36   : > { %v1647_v35 = vmul.f32 1.442695, %v1645_v33  ;;  %v1646_v36 = vsub.f32 %v1635_v26, %v1644_v34 }
 0xe38   : > { %2690 = vpow2.f32 %v1647_v35  ;;  %v1649_v37 = vmul.f32 1.442695, %v1646_v36 }
 0xe39   : > { %v1663_v38 = vpop.permute.xlu1 %1662 }
 0xe3a   : > { %2692 = vpow2.f32 %v1649_v37  ;;  %2531 = vmatpush3.bf16.msra.mxu1 %v1663_v38 }
 0xe3b   : > { %2542 = vmatprep.subr.bf16.mxu1 %v2725_v12 }
 0xe3d   : > { %v1760_v57 = vpop.permute.xlu1 %1759 }
 0xe42   : > { %v2691_v39 = vpop.eup %2690 }
 0xe43   : > { %v1651_v40 = vsel %vm616_vm3, %v2691_v39, 0.0 }
 0xe44   : > { %v2693_v41 = vpop.eup %2692  ;;  %1652 = vadd.xlane.f32.xlu0 %v1651_v40 }
 0xe45   : > { %v1654_v42 = vsel %vm616_vm3, %v2693_v41, 0.0 }
 0xe48   : > { %1655 = vadd.xlane.f32.xlu0 %v1654_v42 }
 0xe5e   : > { %1761 = vrot.lane.b32.xlu0 %v2866_v30, %s2741_s17 }
 0xe74   : > { %v1579_v32 = vpop.f32.mrb[32].mxu1 }
 0xe75   : > { %v1586_v43 = vadd.f32 %v1579_v32, %v3029_v63  ;;  %v2522_v44 = vpop.f32.mrb[33].mxu1 }
 0xe76   : > { %v1582_v45 = vpop.f32.mrb[34].mxu1  ;;  %v2714_v44 = vld [vmem:[%s2849_s29] sm:$0xff] }
 0xe77   : > { %v1587_v46 = vadd.f32 %v1582_v45, %v3031_v2  ;;  %v2523_v48 = vpop.f32.mrb[35].mxu1 }
 0xed1   : > { %v1653_v49 = vpop.xlane.xlu0 %1652 }
 0xed2   : > { %2694 = vrcp.f32 %v1653_v49  ;;  %v2715_v49 = vld [vmem:[%s2849_s29 + $0x8] sm:$0xff] }
 0xed5   : > { %v1656_v51 = vpop.xlane.xlu0 %1655 }
 0xed6   : > { %2696 = vrcp.f32 %v1656_v51 }
 0xed9   : > { %v1762_v56 = vpop.permute.xlu0 %1761 }
 0xeda   : > { %v1767_v30 = vsel %vm568_vm2, %v1762_v56, 0 }
 0xedc   : > { %v2695_v52 = vpop.eup %2694 }
 0xedd   : > { %v1659_v54 = vmul.f32 %v2695_v52, %v2691_v39 }
 0xee0   : > { %v2697_v53 = vpop.eup %2696 }
 0xee1   : > { %v1660_v55 = vmul.f32 %v2697_v53, %v2693_v41 }
 0xee3   : > { %v1661_v47 = vpack.c.bf16 %v1660_v55, %v1659_v54 }
 0xee5   : > { %2533 = vmatmul.mubr.msk.bf16.vlgmr.msra.gmra.mrb[36].mxu1 %vm616_vm3, %v1661_v47 }
 0xee6   : > { %2543 = vmatpush3.bf16.xpose.msra.mxu1 %v1767_v30  ;;  %2544 = vmatprep.mubr.msk.bf16.mxu1 %vm2726_vm1, %v2725_v12 }
 0xee7   : > { %2554 = vmatprep.subr.bf16.mxu1 %v2725_v12 }
 0xeed   : > { %2545 = vmatmul.mubr.msk.bf16.vlgmr.msra.gmra.mrb[40].mxu1 %vm568_vm2, %v1760_v57 }
 0xeee   : > { %2556 = vmatprep.mubr.msk.bf16.mxu1 %vm2726_vm1, %v2725_v12  ;;  %2555 = vmatpush3.bf16.msra.mxu1 %v1885_v18  ;;  %v2331_v18 = vld [vmem:[%s3189_s5] ss:$0 sm:$0xff] }
 0xeef   : > { %2572 = vmatprep.subr.bf16.mxu1 %v2725_v12 }
 0xfb8   : > { %v1702_v59 = vpop.f32.mrb[36].mxu1 }
 0xfb9   : > { %v2534_v60 = vpop.f32.mrb[37].mxu1 }
 0xfba   : > { %v1705_v61 = vpop.f32.mrb[38].mxu1 }
 0xfbb   : > { %v1709_v62 = vpack.c.bf16 %v1705_v61, %v1702_v59  ;;  %v2535_v63 = vpop.f32.mrb[39].mxu1 }
 0xfbc   : > { %v2630_v63 = vld [vmem:[%s3191_s7] sm:$0xff]  }
 0xfbd   : > { %2539 = vmatmul.mubr.msk.bf16.vlgmr.msra.gmra.mrb[44].mxu0 %vm568_vm2, %v1709_v62 }
 0xfbe   : > { %2550 = vmatprep.mubr.msk.bf16.mxu0 %vm2726_vm1, %v2725_v12 }
 0xfc0   : > { %v1803_v0 = vpop.f32.mrb[40].mxu1 }
 0xfc1   : > { %v2546_v1 = vpop.f32.mrb[41].mxu1  ;;  %v1810_v2 = vsel %vm616_vm3, %v1803_v0, -inf }
 0xfc2   : > { %1811 = vmax.xlane.f32.xlu1 %v1810_v2  ;;  %v1806_v3 = vpop.f32.mrb[42].mxu1  ;;  %v2632_v1 = vld [vmem:[%s3191_s7 + $0x10] sm:$0xff]   ;;  %v2633_v2 = vld [vmem:[%s3191_s7 + $0x18] sm:$0xff]  }
 0xfc3   : > { %v2547_v4 = vpop.f32.mrb[43].mxu1  ;;  %v1813_v5 = vsel %vm616_vm3, %v1806_v3, -inf }
 0xfc4   : > { %1814 = vmax.xlane.f32.xlu0 %v1813_v5  ;;  %v2635_v4 = vld [vmem:[%s3193_s9 + $0x8] sm:$0xff]   ;;  %v2636_v5 = vld [vmem:[%s3193_s9 + $0x10] sm:$0xff]  }
0x104f   : > { %v1812_v6 = vpop.xlane.xlu1 %1811 }
0x1050   : > { %v1816_v7 = vsub.f32 %v1803_v0, %v1812_v6  ;;  %v2631_v0 = vld [vmem:[%s3191_s7 + $0x8] sm:$0xff]   ;;  %v2637_v6 = vld [vmem:[%s3193_s9 + $0x18] sm:$0xff]  }
0x1051   : > { %v1815_v8 = vpop.xlane.xlu0 %1814 }
0x1052   : > { %v1818_v9 = vmul.f32 1.442695, %v1816_v7  ;;  %v1817_v10 = vsub.f32 %v1806_v3, %v1815_v8  ;;  %v2634_v3 = vld [vmem:[%s3193_s9] sm:$0xff]   ;;  %v2639_v8 = vld [vmem:[%s3193_s9 + $0x28] sm:$0xff]  }
0x1053   : > { %v2638_v7 = vld [vmem:[%s3193_s9 + $0x20] sm:$0xff]  }
0x1054   : > { %2698 = vpow2.f32 %v1818_v9  ;;  %v1820_v11 = vmul.f32 1.442695, %v1817_v10 }
0x1056   : > { %2700 = vpow2.f32 %v1820_v11 }
0x105e   : > { %v2699_v13 = vpop.eup %2698 }
0x105f   : > { %v1822_v14 = vsel %vm616_vm3, %v2699_v13, 0.0 }
0x1060   : > { %v2701_v15 = vpop.eup %2700  ;;  %1823 = vadd.xlane.f32.xlu0 %v1822_v14 }
0x1061   : > { %v1825_v16 = vsel %vm616_vm3, %v2701_v15, 0.0 }
0x1062   : > { %1826 = vadd.xlane.f32.xlu1 %v1825_v16 }
0x1076   : > { %1833 = vrot.lane.b32.xlu0 %v2868_v31, %s2740_s16 }
0x1090   : > { %v1750_v19 = vpop.f32.mrb[44].mxu0 }
0x1091   : > { %v1757_v20 = vadd.f32 %v1750_v19, %v1586_v43  ;;  %v2540_v21 = vpop.f32.mrb[45].mxu0  ;;  %v2330_v43 = vld [vmem:[%s3188_s4] ss:$0 sm:$0xff] }
0x1092   : > { %v1753_v22 = vpop.f32.mrb[46].mxu0 }
0x1093   : > { %v1758_v23 = vadd.f32 %v1753_v22, %v1587_v46  ;;  %v2541_v24 = vpop.f32.mrb[47].mxu0  ;;  %v2332_v22 = vld [vmem:[%s3190_s6] ss:$0 sm:$0xff] }
0x10ed   : > { %v1824_v25 = vpop.xlane.xlu0 %1823 }
0x10ee   : > { %2702 = vrcp.f32 %v1824_v25 }
0x10ef   : > { %v1827_v26 = vpop.xlane.xlu1 %1826 }
0x10f0   : > { %2704 = vrcp.f32 %v1827_v26 }
0x10f1   : > { %v1834_v31 = vpop.permute.xlu0 %1833 }
0x10f2   : > { %2549 = vmatpush3.bf16.msra.mxu0 %v1834_v31  ;;  %v2640_v31 = vld [vmem:[%s3193_s9 + $0x30] sm:$0xff]  }
0x10f3   : > { %2560 = vmatprep.subr.bf16.mxu0 %v2725_v12 }
0x10f8   : > { %v2703_v27 = vpop.eup %2702 }
0x10f9   : > { %v1830_v29 = vmul.f32 %v2703_v27, %v2699_v13  ;;  %v2641_v27 = vld [vmem:[%s3193_s9 + $0x38] sm:$0xff]  }
0x10fa   : > { %v2705_v28 = vpop.eup %2704 }
0x10fb   : > { %v1831_v33 = vmul.f32 %v2705_v28, %v2701_v15  ;;  %v2333_v28 = vld [vmem:[%s3192_s8] ss:$0 sm:$0xff] }
0x10fd   : > { %v1832_v34 = vpack.c.bf16 %v1831_v33, %v1830_v29 }
0x10ff   : > { %2551 = vmatmul.mubr.msk.bf16.vlgmr.msra.gmra.mrb[48].mxu0 %vm616_vm3, %v1832_v34 }
0x1100   : > { %2568 = vmatprep.mubr.msk.bf16.mxu0 %vm2726_vm1, %v2725_v12  ;;  %2561 = vmatpush3.bf16.msra.mxu0 %v2630_v63 }
0x1101   : > { %2562 = vmatprep.subr.bf16.mxu0 %v2725_v12 }
0x1104   : > { %2563 = vmatpush3.bf16.msra.mxu0 %v2631_v0 }
0x1105   : > { %2564 = vmatprep.subr.bf16.mxu0 %v2725_v12 }
0x1108   : > { %2565 = vmatpush3.bf16.msra.mxu0 %v2632_v1 }
0x1109   : > { %2566 = vmatprep.subr.bf16.mxu0 %v2725_v12 }
0x110c   : > { %2567 = vmatpush3.bf16.msra.mxu0 %v2633_v2  ;;  %v2348_v2 = vld [vmem:[%s3195_s11] ss:$0 sm:$0xff] }
0x11d2   : > { %v1873_v35 = vpop.f32.mrb[48].mxu0 }
0x11d3   : > { %v2552_v36 = vpop.f32.mrb[49].mxu0 }
0x11d4   : > { %v1876_v37 = vpop.f32.mrb[50].mxu0 }
0x11d5   : > { %v1880_v38 = vpack.c.bf16 %v1876_v37, %v1873_v35  ;;  %v2553_v39 = vpop.f32.mrb[51].mxu0 }
0x11d7   : > { %2557 = vmatmul.mubr.msk.bf16.vlgmr.msra.gmra.mrb[44].mxu1 %vm568_vm2, %v1880_v38 }
0x11d8   : > { %2588 = vmatprep.mubr.msk.bf16.mxu1 %vm2726_vm1, %v2725_v12  ;;  %2573 = vmatpush3.bf16.msra.mxu1 %v2634_v3 }
0x11d9   : > { %2574 = vmatprep.subr.bf16.mxu1 %v2725_v12 }
0x11dc   : > { %2575 = vmatpush3.bf16.msra.mxu1 %v2635_v4  ;;  %v2349_v4 = vld [vmem:[%s3196_s12] ss:$0 sm:$0xff] }
0x11dd   : > { %2576 = vmatprep.subr.bf16.mxu1 %v2725_v12 }
0x11e0   : > { %2577 = vmatpush3.bf16.msra.mxu1 %v2636_v5 }
0x11e1   : > { %2578 = vmatprep.subr.bf16.mxu1 %v2725_v12 }
0x11e4   : > { %2579 = vmatpush3.bf16.msra.mxu1 %v2637_v6 }
0x11e5   : > { %2580 = vmatprep.subr.bf16.mxu1 %v2725_v12 }
0x11e8   : > { %2581 = vmatpush3.bf16.msra.mxu1 %v2638_v7 }
0x11e9   : > { %2582 = vmatprep.subr.bf16.mxu1 %v2725_v12 }
0x11ec   : > { %2583 = vmatpush3.bf16.msra.mxu1 %v2639_v8 }
0x11ed   : > { %2584 = vmatprep.subr.bf16.mxu1 %v2725_v12 }
0x11f0   : > { %2585 = vmatpush3.bf16.msra.mxu1 %v2640_v31 }
0x11f1   : > { %2586 = vmatprep.subr.bf16.mxu1 %v2725_v12  ;;  %v2339_v12 = vld [vmem:[%s3194_s10] ss:$0 sm:$0xff] }
0x11f4   : > { %2587 = vmatpush3.bf16.msra.mxu1 %v2641_v27 }
0x12aa   : > { %v1921_v40 = vpop.f32.mrb[44].mxu1 }
0x12ab   : > { %v1928_v41 = vadd.f32 %v1921_v40, %v1757_v20  ;;  %v2558_v42 = vpop.f32.mrb[45].mxu1 }
0x12ac   : > { %v1924_v32 = vpop.f32.mrb[46].mxu1 }
0x12ad   : > { %v1930_v45 = vadd.f32 %v2714_v44, %v1928_v41  ;;  %v1929_v46 = vadd.f32 %v1924_v32, %v1758_v23  ;;  %v2559_v48 = vpop.f32.mrb[47].mxu1 }
0x12af   : > { %v1931_v51 = vadd.f32 %v2715_v49, %v1929_v46  ;;  %v1939_v52 = vadd.f32 %v2330_v43, %v1930_v45 }
0x12b1   : > { %v1943_v53 = vsel %vm505_vm0, %v1939_v52, 0.0  ;;  %v1940_v54 = vadd.f32 %v2330_v43, %v1931_v51 }
0x12b2   : > { %1944 = vadd.xlane.f32.xlu1 %v1943_v53 }
0x12b3   : > { %v1946_v55 = vsel %vm505_vm0, %v1940_v54, 0.0 }
0x12b6   : > { %1947 = vadd.xlane.f32.xlu1 %v1946_v55 }
0x133f   : > { %v1945_v56 = vpop.xlane.xlu1 %1944 }
0x1340   : > { %v1950_v47 = vmul.f32 0.015625, %v1945_v56 }
0x1342   : > { %v1952_v30 = vsub.f32 %v1939_v52, %v1950_v47 }
0x1343   : > { %v1948_v57 = vpop.xlane.xlu1 %1947 }
0x1344   : > { %v1951_v58 = vmul.f32 0.015625, %v1948_v57  ;;  %v1954_v50 = vmul.f32 %v1952_v30, %v1952_v30 }
0x1346   : > { %v1953_v59 = vsub.f32 %v1940_v54, %v1951_v58  ;;  %v1956_v60 = vsel %vm505_vm0, %v1954_v50, 0.0 }
0x1347   : > { %1957 = vadd.xlane.f32.xlu1 %v1956_v60 }
0x1348   : > { %v1955_v61 = vmul.f32 %v1953_v59, %v1953_v59 }
0x134a   : > { %v1959_v62 = vsel %vm505_vm0, %v1955_v61, 0.0 }
0x134b   : > { %1960 = vadd.xlane.f32.xlu1 %v1959_v62 }
0x13d4   : > { %v1958_v9 = vpop.xlane.xlu1 %1957 }
0x13d5   : > { %v1962_v10 = vmul.f32 0.015625, %v1958_v9 }
0x13d7   : > { %v1964_v11 = vadd.f32 1e-05, %v1962_v10 }
0x13d8   : > { %v1961_v13 = vpop.xlane.xlu1 %1960 }
0x13d9   : > { %2706 = vrsqrt.f32 %v1964_v11  ;;  %v1963_v14 = vmul.f32 0.015625, %v1961_v13 }
0x13db   : > { %v1965_v15 = vadd.f32 1e-05, %v1963_v14 }
0x13dd   : > { %2708 = vrsqrt.f32 %v1965_v15 }
0x13e3   : > { %v2707_v16 = vpop.eup %2706 }
0x13e4   : > { %v1968_v17 = vmul.f32 %v2707_v16, %v1952_v30 }
0x13e6   : > { %v1976_v20 = vmul.f32 %v2331_v18, %v1968_v17 }
0x13e7   : > { %v2709_v19 = vpop.eup %2708 }
0x13e8   : > { %v1969_v21 = vmul.f32 %v2709_v19, %v1953_v59  ;;  %v1984_v24 = vadd.f32 %v2332_v22, %v1976_v20 }
0x13ea   : > { %v1977_v23 = vmul.f32 %v2331_v18, %v1969_v21 }
0x13ec   : > { %v1985_v25 = vadd.f32 %v2332_v22, %v1977_v23 }
0x13ee   : > { %v1986_v26 = vpack.c.bf16 %v1985_v25, %v1984_v24 }
0x13f0   : > { %2569 = vmatmul.mubr.msk.bf16.vlgmr.msra.gmra.mrb[52].mxu0 %vm505_vm0, %v1986_v26 }
0x14c3   : > { %v2063_v29 = vpop.f32.mrb[52].mxu0 }
0x14c4   : > { %v2064_v33 = vadd.f32 %v2333_v28, %v2063_v29  ;;  %v2570_v34 = vpop.f32.mrb[53].mxu0 }
0x14c5   : > { %v2066_v35 = vpop.f32.mrb[54].mxu0 }
0x14c6   : > { %v2067_v36 = vadd.f32 %v2333_v28, %v2066_v35  ;;  %v2571_v37 = vpop.f32.mrb[55].mxu0  ;;  %v2070_v38 = vmax.f32 %v2064_v33, 0.0 }
0x14c8   : > { %v2071_v39 = vmax.f32 %v2067_v36, 0.0 }
0x14ca   : > { %v2072_v40 = vpack.c.bf16 %v2071_v39, %v2070_v38 }
0x14cc   : > { %2589 = vmatmul.mubr.bf16.vlgmr.msra.gmra.mrb[48].mxu1 %v2072_v40 }
0x159f   : > { %v2178_v41 = vpop.f32.mrb[48].mxu1 }
0x15a0   : > { %v2179_v42 = vadd.f32 %v2339_v12, %v2178_v41  ;;  %v2590_v32 = vpop.f32.mrb[49].mxu1 }
0x15a1   : > { %v2181_v43 = vpop.f32.mrb[50].mxu1 }
0x15a2   : > { %v2182_v44 = vadd.f32 %v2339_v12, %v2181_v43  ;;  %v2591_v45 = vpop.f32.mrb[51].mxu1  ;;  %v2185_v46 = vadd.f32 %v2179_v42, %v1984_v24 }
0x15a4   : > { %v2189_v48 = vsel %vm505_vm0, %v2185_v46, 0.0  ;;  %v2186_v49 = vadd.f32 %v2182_v44, %v1985_v25 }
0x15a5   : > { %2190 = vadd.xlane.f32.xlu1 %v2189_v48 }
0x15a6   : > { %v2192_v51 = vsel %vm505_vm0, %v2186_v49, 0.0 }
0x15a9   : > { %2193 = vadd.xlane.f32.xlu1 %v2192_v51 }
0x1632   : > { %v2191_v52 = vpop.xlane.xlu1 %2190 }
0x1633   : > { %v2195_v53 = vmul.f32 0.015625, %v2191_v52 }
0x1635   : > { %v2197_v54 = vsub.f32 %v2185_v46, %v2195_v53 }
0x1636   : > { %v2194_v55 = vpop.xlane.xlu1 %2193 }
0x1637   : > { %v2196_v56 = vmul.f32 0.015625, %v2194_v55  ;;  %v2199_v47 = vmul.f32 %v2197_v54, %v2197_v54 }
0x1639   : > { %v2198_v30 = vsub.f32 %v2186_v49, %v2196_v56  ;;  %v2201_v57 = vsel %vm505_vm0, %v2199_v47, 0.0 }
0x163a   : > { %2202 = vadd.xlane.f32.xlu0 %v2201_v57 }
0x163b   : > { %v2200_v58 = vmul.f32 %v2198_v30, %v2198_v30 }
0x163d   : > { %v2204_v50 = vsel %vm505_vm0, %v2200_v58, 0.0 }
0x163e   : > { %2205 = vadd.xlane.f32.xlu1 %v2204_v50 }
0x16c7   : > { %v2203_v59 = vpop.xlane.xlu0 %2202 }
0x16c8   : > { %v2207_v60 = vmul.f32 0.015625, %v2203_v59 }
0x16ca   : > { %v2209_v61 = vadd.f32 1e-05, %v2207_v60 }
0x16cb   : > { %v2206_v62 = vpop.xlane.xlu1 %2205 }
0x16cc   : > { %2710 = vrsqrt.f32 %v2209_v61  ;;  %v2208_v63 = vmul.f32 0.015625, %v2206_v62 }
0x16ce   : > { %v2210_v0 = vadd.f32 1e-05, %v2208_v63 }
0x16d0   : > { %2712 = vrsqrt.f32 %v2210_v0 }
0x16d6   : > { %v2711_v1 = vpop.eup %2710 }
0x16d7   : > { %v2213_v3 = vmul.f32 %v2711_v1, %v2197_v54 }
0x16d9   : > { %v2221_v5 = vmul.f32 %v2348_v2, %v2213_v3 }
0x16da   : > { %v2713_v6 = vpop.eup %2712 }
0x16db   : > { %v2229_v7 = vadd.f32 %v2349_v4, %v2221_v5  ;;  %v2214_v8 = vmul.f32 %v2713_v6, %v2198_v30 }
0x16dd   : > { %2231 = vst.msk [vmem:[%s440_s21] sm:$0xff] %vm505_vm0, %v2229_v7  ;;  %v2222_v9 = vmul.f32 %v2348_v2, %v2214_v8 }
0x16df   : > { %v2230_v10 = vadd.f32 %v2349_v4, %v2222_v9 }
0x16e1   : > { %2232 = vst.msk [vmem:[%s440_s21 + $0x8] sm:$0xff] %vm505_vm0, %v2230_v10 }
0x16e2 PF: > { %s23_s25 = sadd.s32 1, %s2722_s25  }
0x16e3   : > { %p20_p4 = scmp.ge.s32.totalorder %s23_s25, 4  }
0x16e5   :  { %22 = sbr.rel (!%p20_p4) target bundleno = 1 (0x1), region = 102 }

// kernel: informer_forward.13
= control target key start
LH: loop header
LB: loop body
LE: loop exit
PB: predicated region body
PF: predicated region fallthrough
CT: control target
= control target key end

     0   :  { %s519_s20 = smov 0   ;;  %s564_s0 = inlined_call_operand.vmem [shape: f32[2,12,64], index: 0, kind: input, shape index: {}]   ;;  %s565_s1 = inlined_call_operand.vmem [shape: f32[1,64], index: 1, kind: input, shape index: {}]   ;;  %s566_s2 = inlined_call_operand.vmem [shape: f32[1,64], index: 2, kind: input, shape index: {}]   ;;  %s567_s3 = inlined_call_operand.vmem [shape: bf16[64,1], index: 3, kind: input, shape index: {}]   ;;  %s568_s4 = inlined_call_operand.<no memory space> [shape: f32[1,1], index: 4, kind: input, shape index: {}]   ;;  %s569_s5 = inlined_call_operand.vmem [shape: f32[2,12,1], index: 5, kind: output, shape index: {}]  }
   0x1   :  { %v10_v0 = vstv %s568_s4 }
   0x2   :  { %11 = vst [vmem:[#allocation2] sm:$0x1] %v10_v0 }
   0x3 LB: > { %s420_s21 = sadd.s32 4294967295, %s482_s20   ;;  %p424_p0 = scmp.ge.s32.totalorder %s482_s20, 1  ;;  %s482_s20 = sphi %s519_s20, %s17_s20  }
   0x4   : > { %p189_p1 = scmp.lt.s32.totalorder %s482_s20, 3 }
   0x6   : > { %p190_p2 = pnand %p424_p0, %p189_p1 }
   0x7   : > { %p217_p3 = scmp.lt.s32.totalorder (!%p190_p2), %s420_s21, 1  ;;  %vm232_vm0 = vcmask (!%p190_p2), 523264   ;;  %vm236_vm1 = vcmask (!%p190_p2), 519168   ;;  %v468_v15 = vld [vmem:[%s567_s3] sm:$0xff] (!%p190_p2)   ;;  %v484_v16 = vmov (!%p190_p2), 0.0   ;;  %v469_v17 = vld [vmem:[%s567_s3 + $0x8] sm:$0xff] (!%p190_p2)  }
   0x8   : > { %193 = sbr.rel (%p190_p2) target bundleno = 555 (0x22b), region = 40  ;;  %446 = vmatprep.subr.bf16.mxu0 (!%p190_p2), %v484_v16  ;;  %v470_v18 = vld [vmem:[%s567_s3 + $0x10] sm:$0xff] (!%p190_p2)   ;;  %v471_v19 = vld [vmem:[%s567_s3 + $0x18] sm:$0xff] (!%p190_p2)   ;;  %vm485_vm2 = vmmov (!%p190_p2), 0   ;;  %v429_v28 = vld [vmem:[%s565_s1] ss:$0 sm:$0xff] (!%p190_p2) }
   0x9   : > { %447 = vmatpush3.bf16.msra.mxu0 (!%p190_p2), %v468_v15  ;;  %454 = vmatprep.mubr.msk.bf16.mxu0 (!%p190_p2), %vm485_vm2, %v484_v16  ;;  %v430_v32 = vld [vmem:[%s566_s2] ss:$0 sm:$0xff] (!%p190_p2)  ;;  %vm361_vm3 = vcmask (!%p190_p2), 7168   ;;  %vm363_vm4 = vcmask (!%p190_p2), 3072  }
   0xa   : > { %448 = vmatprep.subr.bf16.mxu0 (!%p190_p2), %v484_v16  ;;  %v431_v37 = vld [vmem:[#allocation2] ss:$0 sm:$0xff] (!%p190_p2) }
   0xd   : > { %449 = vmatpush3.bf16.msra.mxu0 (!%p190_p2), %v469_v17 }
   0xe   : > { %450 = vmatprep.subr.bf16.mxu0 (!%p190_p2), %v484_v16 }
   0xf   : > { %s571_s21 = smov (!%p217_p3, %s420_s21), 1 }
  0x10   : > { %s439_s4 = sshll.u32 %s571_s21, 4 }
  0x11   : > { %s221_s24 = scalar_lea.vmem %s564_s0, %s439_s4  ;;  %451 = vmatpush3.bf16.msra.mxu0 %v470_v18  ;;  %s226_s14 = scalar_lea.vmem %s569_s5, %s439_s4 }
  0x12   : > { %v228_v1 = vld [vmem:[%s221_s24] sm:$0xff]  ;;  %v229_v2 = vld [vmem:[%s221_s24 + $0x8] sm:$0xf]  ;;  %452 = vmatprep.subr.bf16.mxu0 %v484_v16 }
  0x13   : > { %v233_v3 = vsel %vm232_vm0, %v228_v1, 0.0  ;;  %v237_v4 = vsel %vm236_vm1, %v229_v2, 0.0 }
  0x14   : > { %234 = vadd.xlane.f32.xlu0 %v233_v3 }
  0x15   : > { %453 = vmatpush3.bf16.msra.mxu0 %v471_v19 }
  0x18   : > { %238 = vadd.xlane.f32.xlu0 %v237_v4 }
  0xa1   : > { %v235_v5 = vpop.xlane.xlu0 %234 }
  0xa2   : > { %v241_v6 = vmul.f32 0.015625, %v235_v5 }
  0xa4   : > { %v243_v7 = vsub.f32 %v228_v1, %v241_v6 }
  0xa5   : > { %v239_v8 = vpop.xlane.xlu0 %238 }
  0xa6   : > { %v242_v9 = vmul.f32 0.015625, %v239_v8  ;;  %v245_v10 = vmul.f32 %v243_v7, %v243_v7 }
  0xa8   : > { %v244_v11 = vsub.f32 %v229_v2, %v242_v9  ;;  %v247_v12 = vsel %vm232_vm0, %v245_v10, 0.0 }
  0xa9   : > { %248 = vadd.xlane.f32.xlu1 %v247_v12 }
  0xaa   : > { %v246_v13 = vmul.f32 %v244_v11, %v244_v11 }
  0xac   : > { %v250_v14 = vsel %vm236_vm1, %v246_v13, 0.0 }
  0xad   : > { %251 = vadd.xlane.f32.xlu1 %v250_v14 }
 0x136   : > { %v249_v20 = vpop.xlane.xlu1 %248 }
 0x137   : > { %v253_v21 = vmul.f32 0.015625, %v249_v20 }
 0x139   : > { %v255_v22 = vadd.f32 1e-05, %v253_v21 }
 0x13a   : > { %v252_v23 = vpop.xlane.xlu1 %251 }
 0x13b   : > { %472 = vrsqrt.f32 %v255_v22  ;;  %v254_v24 = vmul.f32 0.015625, %v252_v23 }
 0x13d   : > { %v256_v25 = vadd.f32 1e-05, %v254_v24 }
 0x13f   : > { %474 = vrsqrt.f32 %v256_v25 }
 0x145   : > { %v473_v26 = vpop.eup %472 }
 0x146   : > { %v259_v27 = vmul.f32 %v473_v26, %v243_v7 }
 0x148   : > { %v267_v31 = vmul.f32 %v429_v28, %v259_v27 }
 0x149   : > { %v475_v29 = vpop.eup %474 }
 0x14a   : > { %v260_v30 = vmul.f32 %v475_v29, %v244_v11  ;;  %v275_v34 = vadd.f32 %v430_v32, %v267_v31 }
 0x14c   : > { %v268_v33 = vmul.f32 %v429_v28, %v260_v30 }
 0x14e   : > { %v276_v35 = vadd.f32 %v430_v32, %v268_v33 }
 0x150   : > { %v277_v36 = vpack.c.bf16 %v276_v35, %v275_v34 }
 0x152   : > { %455 = vmatmul.mubr.msk.bf16.vlgmr.msra.gmra.mrb[0].mxu0 %vm232_vm0, %v277_v36 }
 0x225   : > { %v354_v38 = vpop.f32.mrb[0].mxu0 }
 0x226   : > { %v355_v39 = vadd.f32 %v431_v37, %v354_v38  ;;  %v456_v40 = vpop.f32.mrb[1].mxu0 }
 0x227   : > { %v357_v41 = vpop.f32.mrb[2].mxu0 }
 0x228   : > { %362 = vst.msk [vmem:[%s226_s14] sm:$0xff] %vm361_vm3, %v355_v39  ;;  %v358_v42 = vadd.f32 %v431_v37, %v357_v41  ;;  %v457_v43 = vpop.f32.mrb[3].mxu0 }
 0x22a   : > { %364 = vst.msk [vmem:[%s226_s14 + $0x8] sm:$0xf] %vm363_vm4, %v358_v42 }
 0x22b PF: > { %s17_s20 = sadd.s32 1, %s482_s20  }
 0x22c   : > { %p14_p4 = scmp.ge.s32.totalorder %s17_s20, 4  }
 0x22e   :  { %16 = sbr.rel (!%p14_p4) target bundleno = 3 (0x3), region = 70 }

// kernel: informer_forward.12
= control target key start
LH: loop header
LB: loop body
LE: loop exit
PB: predicated region body
PF: predicated region fallthrough
CT: control target
= control target key end

     0   :  { %s5862_s0 = inlined_call_operand.vmem [shape: f32[2,12,64], index: 0, kind: input, shape index: {}]   ;;  %s5863_s1 = inlined_call_operand.vmem [shape: f32[2,16,64], index: 1, kind: input, shape index: {}]   ;;  %s5864_s2 = inlined_call_operand.vmem [shape: bf16[64,192], index: 2, kind: input, shape index: {}]   ;;  %s5865_s3 = inlined_call_operand.vmem [shape: f32[1,192], index: 3, kind: input, shape index: {}]   ;;  %s5866_s4 = inlined_call_operand.vmem [shape: bf16[64,64], index: 4, kind: input, shape index: {}]   ;;  %s5867_s5 = inlined_call_operand.vmem [shape: f32[1,64], index: 5, kind: input, shape index: {}]   ;;  %s5868_s6 = inlined_call_operand.vmem [shape: f32[1,64], index: 6, kind: input, shape index: {}]   ;;  %s5869_s7 = inlined_call_operand.vmem [shape: f32[1,64], index: 7, kind: input, shape index: {}]   ;;  %s5870_s8 = inlined_call_operand.vmem [shape: bf16[64,64], index: 8, kind: input, shape index: {}]   ;;  %s5871_s9 = inlined_call_operand.vmem [shape: f32[1,64], index: 9, kind: input, shape index: {}]   ;;  %s5872_s10 = inlined_call_operand.vmem [shape: bf16[64,128], index: 10, kind: input, shape index: {}]   ;;  %s5873_s11 = inlined_call_operand.vmem [shape: f32[1,128], index: 11, kind: input, shape index: {}]   ;;  %s5874_s12 = inlined_call_operand.vmem [shape: bf16[64,64], index: 12, kind: input, shape index: {}]   ;;  %s5875_s13 = inlined_call_operand.vmem [shape: f32[1,64], index: 13, kind: input, shape index: {}]   ;;  %s5876_s14 = inlined_call_operand.vmem [shape: f32[1,64], index: 14, kind: input, shape index: {}]   ;;  %s5877_s15 = inlined_call_operand.vmem [shape: f32[1,64], index: 15, kind: input, shape index: {}]   ;;  %s5878_s16 = inlined_call_operand.vmem [shape: bf16[64,128], index: 16, kind: input, shape index: {}]   ;;  %s5879_s17 = inlined_call_operand.vmem [shape: f32[1,128], index: 17, kind: input, shape index: {}]   ;;  %s5880_s18 = inlined_call_operand.vmem [shape: bf16[128,64], index: 18, kind: input, shape index: {}]   ;;  %s5881_s19 = inlined_call_operand.vmem [shape: f32[1,64], index: 19, kind: input, shape index: {}]   ;;  %s5882_s20 = inlined_call_operand.vmem [shape: f32[1,64], index: 20, kind: input, shape index: {}]   ;;  %s5883_s21 = inlined_call_operand.vmem [shape: f32[1,64], index: 21, kind: input, shape index: {}]   ;;  %s5884_s22 = inlined_call_operand.vmem [shape: f32[2,12,64], index: 22, kind: output, shape index: {}]  }
   0x1   :  { %5907 = sst [smem:[#allocation2_spill]] %s5862_s0 }
   0x2   :  { %5908 = sst [smem:[#allocation3_spill]] %s5863_s1 }
   0x3   :  { %5909 = sst [smem:[#allocation4_spill]] %s5864_s2 }
   0x4   :  { %5910 = sst [smem:[#allocation5_spill]] %s5865_s3  ;;  %s5120_s3 = smov 0  }
   0x5   :  { %5911 = sst [smem:[#allocation6_spill]] %s5866_s4 }
   0x6   :  { %5912 = sst [smem:[#allocation7_spill]] %s5867_s5 }
   0x7   :  { %5913 = sst [smem:[#allocation8_spill]] %s5868_s6 }
   0x8 LB: > { %s4207_s28 = sadd.s32 4294967295, %s4985_s3   ;;  %p4211_p0 = scmp.ge.s32.totalorder %s4985_s3, 1  ;;  %s4985_s3 = sphi %s5120_s3, %s32_s3  }
   0x9   : > { %p622_p1 = scmp.lt.s32.totalorder %s4985_s3, 3 }
   0xb   : > { %p623_p2 = pnand %p4211_p0, %p622_p1 }
   0xc   : > { %s5914_s4 = sld [smem:[#allocation4_spill]] (!%p623_p2)  ;;  %p689_p3 = scmp.lt.s32.totalorder (!%p623_p2), %s4207_s28, 1  ;;  %v4987_v2 = vmov (!%p623_p2), 0   ;;  %vm770_vm0 = vcmask (!%p623_p2), 523264   ;;  %v4988_v12 = vmov (!%p623_p2), 0.0   ;;  %v720_v13 = vlaneseq (!%p623_p2) }
   0xd   : > { %626 = sbr.rel (%p623_p2) target bundleno = 10948 (0x2ac4), region = 108  ;;  %806 = vmatprep.mubr.bf16.mxu0 (!%p623_p2), %v4987_v2  ;;  %s5915_s5 = sld [smem:[#allocation2_spill]] (!%p623_p2)  ;;  %4441 = vmatprep.subr.bf16.mxu1 (!%p623_p2), %v4988_v12  ;;  %vm4989_vm1 = vmmov (!%p623_p2), 0   ;;  %vm918_vm2 = vcmask (!%p623_p2), 1045504   ;;  %vm840_vm3 = vcmask (!%p623_p2), 64512   ;;  %vm890_vm5 = vcmask (!%p623_p2), 97280  }
   0xe   : > { %v721_v14 = vshrl.u32 (!%p623_p2), %v720_v13, 7  ;;  %s5916_s27 = sld [smem:[#allocation5_spill]] (!%p623_p2)  ;;  %4443 = vmatprep.mubr.msk.bf16.mxu1 (!%p623_p2), %vm4989_vm1, %v4988_v12  ;;  %s5906_s29 = smov (!%p623_p2), 64   ;;  %v834_v39 = vand.u32 (!%p623_p2), 127, %v720_v13  ;;  %vm894_vm7 = vcmask (!%p623_p2), 93184   ;;  %vm1095_vm8 = vcmask (!%p623_p2), 1043456  }
   0xf   : > { %s4991_s30 = smov (!%p623_p2), 120   ;;  %s5903_s0 = smov (!%p623_p2), 56   ;;  %vm2253_vm9 = vcmask (!%p623_p2), 519168   ;;  %vm2521_vm10 = vcmask (!%p623_p2), 130048   ;;  %vm2525_vm11 = vcmask (!%p623_p2), 125952  }
  0x10   : > { %v722_v15 = vsub.s32 (!%p623_p2), 0, %v721_v14  ;;  %v726_v17 = vsub.s32 (!%p623_p2), 1, %v721_v14  ;;  %v832_v40 = vadd.s32 (!%p623_p2), 8, %v721_v14  ;;  %vm5198_vm4 = vcmp.gt.s32.totalorder (!%p623_p2), %v834_v39, %v721_v14  ;;  %s5902_s23 = smov (!%p623_p2), 48   ;;  %s5904_s1 = smov (!%p623_p2), 112  }
  0x11   : > { %s5921_s6 = sld [smem:[#allocation6_spill]] (!%p623_p2)  ;;  %s5887_s26 = smov (!%p623_p2), 32  }
  0x12   : > { %v4805_v0 = vld [vmem:[%s5914_s4 + $0x4] ss:$8 sps:$4 sm:$0xff] (!%p623_p2)   ;;  %v4807_v1 = vld [vmem:[%s5914_s4] ss:$8 sps:$4 sm:$0xff] (!%p623_p2)   ;;  %v4808_v3 = vld [vmem:[%s5914_s4 + $0x14] ss:$8 sps:$4 sm:$0xff] (!%p623_p2)   ;;  %vm5202_vm6 = vcmp.gt.s32.totalorder (!%p623_p2), %v834_v39, %v832_v40 }
  0x13   : > { %774 = vmatprep.subr.bf16.mxu0 (!%p623_p2), %v4805_v0  ;;  %v4810_v4 = vld [vmem:[%s5914_s4 + $0x10] ss:$8 sps:$4 sm:$0xff] (!%p623_p2)   ;;  %v4811_v5 = vld [vmem:[%s5914_s4 + $0x24] ss:$8 sps:$4 sm:$0xff] (!%p623_p2)   ;;  %v4813_v6 = vld [vmem:[%s5914_s4 + $0x20] ss:$8 sps:$4 sm:$0xff] (!%p623_p2)  }
  0x14   : > { %s5940_s28 = smov (!%p689_p3, %s4207_s28), 1  ;;  %775 = vmatpush1.bf16.msra.mxu0 %v4807_v1  ;;  %v4814_v7 = vld [vmem:[%s5914_s4 + $0x34] ss:$8 sps:$4 sm:$0xff]   ;;  %v4816_v8 = vld [vmem:[%s5914_s4 + $0x30] ss:$8 sps:$4 sm:$0xff]   ;;  %s5888_s25 = smov 24  }
  0x15   : > { %776 = vmatprep.subr.bf16.mxu0 %v4808_v3  ;;  %s5143_s2 = sshll.u32 %s5940_s28, 4  ;;  %v718_v16 = vld [vmem:[%s5916_s27] sm:$0x3]  ;;  %s5900_s27 = smov 104  }
  0x16   : > { %s5155_s24 = scalar_lea.vmem %s5915_s5, %s5143_s2  ;;  %v723_v18 = vrot.slane %v718_v16, %v722_v15  ;;  %v727_v20 = vrot.slane %v718_v16, %v726_v17  ;;  %s5889_s5 = smov 40  }
  0x17   : > { %v705_v9 = vld [vmem:[%s5155_s24] sm:$0xff]  ;;  %v706_v10 = vld [vmem:[%s5155_s24 + $0x8] sm:$0xf]  ;;  %s5898_s28 = smov 96  }
  0x18   : > { %777 = vmatpush1.bf16.msra.mxu0 %v4810_v4  ;;  %v709_v11 = vpack.c.bf16 %v706_v10, %v705_v9 }
  0x19   : > { %778 = vmatprep.subr.bf16.mxu0 %v4811_v5 }
  0x1c   : > { %779 = vmatpush1.bf16.msra.mxu0 %v4813_v6 }
  0x1d   : > { %780 = vmatprep.subr.bf16.mxu0 %v4814_v7 }
  0x20   : > { %781 = vmatpush1.bf16.msra.mxu0 %v4816_v8 }
  0x21   : > { %4435 = vmatprep.subr.bf16.mxu0 %v4988_v12 }
  0x23   : > { %4226 = vmatmul.mubr.msk.bf16.vlgmr.msra.gmra.mrb[0].mxu0 %vm770_vm0, %v709_v11 }
  0x24   : > { %4437 = vmatprep.mubr.msk.bf16.mxu0 %vm4989_vm1, %v4988_v12 }
  0xf6   : > { %v808_v19 = vpop.f32.mrb[0].mxu0 }
  0xf7   : > { %v809_v21 = vadd.f32 %v808_v19, %v723_v18  ;;  %v810_v22 = vpop.f32.mrb[1].mxu0 }
  0xf8   : > { %v812_v23 = vpop.f32.mrb[2].mxu0  ;;  %v811_v26 = vadd.f32 %v810_v22, %v727_v20 }
  0xf9   : > { %v813_v24 = vadd.f32 %v812_v23, %v723_v18  ;;  %v814_v25 = vpop.f32.mrb[3].mxu0  ;;  %v825_v28 = vmul.f32 0.35355338, %v809_v21 }
  0xfa   : > { %v815_v27 = vadd.f32 %v814_v25, %v727_v20 }
  0xfb   : > { %v826_v29 = vmul.f32 0.35355338, %v813_v24  ;;  %v5172_v30 = vpack.c.bf16 %v813_v24, %v809_v21 }
  0xfc   : > { %v5174_v31 = vpack.c.bf16 %v815_v27, %v811_v26 }
  0xfd   : > { %v5176_v32 = vpack.c.bf16 %v826_v29, %v825_v28  ;;  %838 = vrot.lane.b32.xlu0 %v5172_v30, %s5906_s29 }
  0xfe   : > { %v920_v33 = vsel %vm918_vm2, %v5174_v31, 0 }
  0xff   : > { %4442 = vmatpush3.bf16.msra.mxu1 %v920_v33  ;;  %965 = vrot.lane.b32.xlu1 %v5176_v32, %s4991_s30 }
 0x100   : > { %4453 = vmatprep.subr.bf16.mxu1 %v4988_v12 }
 0x101   : > { %967 = vrot.lane.b32.xlu0 %v5172_v30, %s5903_s0  ;;  %s5929_s0 = smov 104  }
 0x16f   : > { %v839_v34 = vpop.permute.xlu0 %838 }
 0x170   : > { %v845_v35 = vsel %vm840_vm3, %v839_v34, 0 }
 0x171   : > { %4436 = vmatpush3.bf16.xpose.msra.mxu0 %v845_v35  ;;  %v966_v38 = vpop.permute.xlu1 %965  ;;  %v817_v35 = vld [vmem:[%s5921_s6] sm:$0xf] }
 0x172   : > { %4447 = vmatprep.subr.bf16.mxu0 %v4988_v12 }
 0x173   : > { %v968_v36 = vpop.permute.xlu0 %967 }
 0x174   : > { %v973_v37 = vsel %vm840_vm3, %v968_v36, 0  ;;  %v1144_v36 = vsel %vm1095_vm8, %v817_v35, 0 }
 0x178   : > { %4438 = vmatmul.mubr.msk.bf16.vlgmr.msra.gmra.mrb[4].mxu0 %vm840_vm3, %v5176_v32 }
 0x179   : > { %4448 = vmatpush3.bf16.xpose.msra.mxu0 %v973_v37  ;;  %4449 = vmatprep.mubr.msk.bf16.mxu0 %vm4989_vm1, %v4988_v12  ;;  %v818_v37 = vld [vmem:[%s5921_s6 + $0x4] sm:$0xf] }
 0x17a   : > { %4459 = vmatprep.subr.bf16.mxu0 %v4988_v12 }
 0x180   : > { %4450 = vmatmul.mubr.msk.bf16.vlgmr.msra.gmra.mrb[8].mxu0 %vm840_vm3, %v966_v38  ;;  %v1097_v38 = vsel %vm1095_vm8, %v818_v37, 0 }
 0x181   : > { %4461 = vmatprep.mubr.msk.bf16.mxu0 %vm4989_vm1, %v4988_v12  ;;  %4460 = vmatpush3.bf16.msra.mxu0 %v1097_v38 }
 0x182   : > { %4471 = vmatprep.subr.bf16.mxu0 %v4988_v12 }
 0x24b   : > { %v881_v42 = vpop.f32.mrb[4].mxu0 }
 0x24c   : > { %v888_v44 = vsel %vm5198_vm4, -1e+30, %v881_v42  ;;  %v4439_v45 = vpop.f32.mrb[5].mxu0 }
 0x24d   : > { %v884_v46 = vpop.f32.mrb[6].mxu0  ;;  %v891_v47 = vsel %vm890_vm5, %v888_v44, -inf }
 0x24e   : > { %v889_v48 = vsel %vm5202_vm6, -1e+30, %v884_v46  ;;  %892 = vmax.xlane.f32.xlu1 %v891_v47  ;;  %v4440_v49 = vpop.f32.mrb[7].mxu0 }
 0x24f   : > { %v895_v50 = vsel %vm894_vm7, %v889_v48, -inf }
 0x250   : > { %896 = vmax.xlane.f32.xlu0 %v895_v50 }
 0x253   : > { %v1009_v51 = vpop.f32.mrb[8].mxu0 }
 0x254   : > { %v1016_v52 = vsel %vm5198_vm4, -1e+30, %v1009_v51  ;;  %v4451_v53 = vpop.f32.mrb[9].mxu0 }
 0x255   : > { %v1012_v54 = vpop.f32.mrb[10].mxu0  ;;  %v1018_v55 = vsel %vm890_vm5, %v1016_v52, -inf }
 0x256   : > { %v1017_v56 = vsel %vm5202_vm6, -1e+30, %v1012_v54  ;;  %1019 = vmax.xlane.f32.xlu0 %v1018_v55  ;;  %v4452_v57 = vpop.f32.mrb[11].mxu0 }
 0x257   : > { %v1021_v58 = vsel %vm894_vm7, %v1017_v56, -inf }
 0x258   : > { %1022 = vmax.xlane.f32.xlu1 %v1021_v58 }
 0x2db   : > { %v893_v59 = vpop.xlane.xlu1 %892 }
 0x2dc   : > { %v898_v60 = vsub.f32 %v888_v44, %v893_v59 }
 0x2dd   : > { %v897_v61 = vpop.xlane.xlu0 %896 }
 0x2de   : > { %v900_v62 = vmul.f32 1.442695, %v898_v60  ;;  %v899_v63 = vsub.f32 %v889_v48, %v897_v61 }
 0x2e0   : > { %4837 = vpow2.f32 %v900_v62  ;;  %v902_v0 = vmul.f32 1.442695, %v899_v63 }
 0x2e2   : > { %4839 = vpow2.f32 %v902_v0 }
 0x2e3   : > { %v1020_v1 = vpop.xlane.xlu0 %1019 }
 0x2e4   : > { %v1024_v2 = vsub.f32 %v1016_v52, %v1020_v1 }
 0x2e5   : > { %v1023_v3 = vpop.xlane.xlu1 %1022 }
 0x2e6   : > { %v1026_v4 = vmul.f32 1.442695, %v1024_v2  ;;  %v1025_v5 = vsub.f32 %v1017_v56, %v1023_v3 }
 0x2e8   : > { %4841 = vpow2.f32 %v1026_v4  ;;  %v1028_v6 = vmul.f32 1.442695, %v1025_v5 }
 0x2ea   : > { %v4838_v7 = vpop.eup %4837  ;;  %4843 = vpow2.f32 %v1028_v6 }
 0x2eb   : > { %v904_v8 = vsel %vm890_vm5, %v4838_v7, 0.0 }
 0x2ec   : > { %v4840_v9 = vpop.eup %4839  ;;  %905 = vadd.xlane.f32.xlu0 %v904_v8 }
 0x2ed   : > { %v907_v10 = vsel %vm894_vm7, %v4840_v9, 0.0 }
 0x2ee   : > { %908 = vadd.xlane.f32.xlu1 %v907_v10 }
 0x2f2   : > { %v4842_v11 = vpop.eup %4841 }
 0x2f3   : > { %v1030_v13 = vsel %vm890_vm5, %v4842_v11, 0.0 }
 0x2f4   : > { %v4844_v14 = vpop.eup %4843  ;;  %1031 = vadd.xlane.f32.xlu0 %v1030_v13 }
 0x2f5   : > { %v1033_v15 = vsel %vm894_vm7, %v4844_v14, 0.0 }
 0x2f6   : > { %1034 = vadd.xlane.f32.xlu1 %v1033_v15 }
 0x307   : > { %1189 = vrot.lane.b32.xlu1 %v5172_v30, %s5902_s23  ;;  %s5935_s23 = smov 24  }
 0x30a   : > { %1042 = vrot.lane.b32.xlu0 %v5174_v31, %s4991_s30 }
 0x30b   : > { %1187 = vrot.lane.b32.xlu1 %v5176_v32, %s5904_s1 }
 0x379   : > { %v906_v16 = vpop.xlane.xlu0 %905 }
 0x37a   : > { %4845 = vrcp.f32 %v906_v16 }
 0x37b   : > { %v909_v17 = vpop.xlane.xlu1 %908 }
 0x37c   : > { %4847 = vrcp.f32 %v909_v17 }
 0x381   : > { %v1032_v18 = vpop.xlane.xlu0 %1031 }
 0x382   : > { %4849 = vrcp.f32 %v1032_v18 }
 0x383   : > { %v1035_v19 = vpop.xlane.xlu1 %1034 }
 0x384   : > { %v4846_v20 = vpop.eup %4845  ;;  %4851 = vrcp.f32 %v1035_v19 }
 0x385   : > { %v912_v22 = vmul.f32 %v4846_v20, %v4838_v7  ;;  %v1043_v24 = vpop.permute.xlu0 %1042 }
 0x386   : > { %v4848_v21 = vpop.eup %4847  ;;  %v1048_v26 = vsel %vm918_vm2, %v1043_v24, 0 }
 0x387   : > { %v913_v23 = vmul.f32 %v4848_v21, %v4840_v9  ;;  %v1190_v48 = vpop.permute.xlu1 %1189 }
 0x388   : > { %v1195_v52 = vsel %vm840_vm3, %v1190_v48, 0 }
 0x389   : > { %v914_v25 = vpack.c.bf16 %v913_v23, %v912_v22 }
 0x38b   : > { %4444 = vmatmul.mubr.msk.bf16.vlgmr.msra.gmra.mrb[0].mxu1 %vm890_vm5, %v914_v25  ;;  %v1188_v53 = vpop.permute.xlu1 %1187 }
 0x38c   : > { %v4850_v27 = vpop.eup %4849  ;;  %4454 = vmatpush3.bf16.msra.mxu1 %v1048_v26  ;;  %4455 = vmatprep.mubr.msk.bf16.mxu1 %vm4989_vm1, %v4988_v12 }
 0x38d   : > { %4465 = vmatprep.subr.bf16.mxu1 %v4988_v12  ;;  %v1038_v29 = vmul.f32 %v4850_v27, %v4842_v11 }
 0x38e   : > { %v4852_v28 = vpop.eup %4851 }
 0x38f   : > { %v1039_v33 = vmul.f32 %v4852_v28, %v4844_v14 }
 0x391   : > { %v1040_v34 = vpack.c.bf16 %v1039_v33, %v1038_v29 }
 0x393   : > { %4456 = vmatmul.mubr.msk.bf16.vlgmr.msra.gmra.mrb[4].mxu1 %vm890_vm5, %v1040_v34  ;;  %v819_v34 = vld [vmem:[%s5921_s6 + $0x8] sm:$0xf] }
 0x394   : > { %4467 = vmatprep.mubr.msk.bf16.mxu1 %vm4989_vm1, %v4988_v12  ;;  %4466 = vmatpush3.bf16.msra.mxu1 %v1144_v36  ;;  %v1317_v35 = vsel %vm1095_vm8, %v819_v34, 0 }
 0x395   : > { %4477 = vmatprep.subr.bf16.mxu1 %v4988_v12 }
 0x45e   : > { %v956_v39 = vpop.f32.mrb[0].mxu1 }
 0x45f   : > { %v4445_v40 = vpop.f32.mrb[1].mxu1 }
 0x460   : > { %v959_v42 = vpop.f32.mrb[2].mxu1 }
 0x461   : > { %v963_v44 = vpack.c.bf16 %v959_v42, %v956_v39  ;;  %v4446_v45 = vpop.f32.mrb[3].mxu1 }
 0x463   : > { %4468 = vmatmul.mubr.msk.bf16.vlgmr.msra.gmra.mrb[8].mxu1 %vm840_vm3, %v963_v44 }
 0x464   : > { %4479 = vmatprep.mubr.msk.bf16.mxu1 %vm4989_vm1, %v4988_v12 }
 0x466   : > { %v1084_v46 = vpop.f32.mrb[4].mxu1 }
 0x467   : > { %v4457_v47 = vpop.f32.mrb[5].mxu1 }
 0x468   : > { %v1087_v49 = vpop.f32.mrb[6].mxu1 }
 0x469   : > { %v1091_v50 = vpack.c.bf16 %v1087_v49, %v1084_v46  ;;  %v4458_v51 = vpop.f32.mrb[7].mxu1 }
 0x46b   : > { %4462 = vmatmul.mubr.msk.bf16.vlgmr.msra.gmra.mrb[12].mxu0 %vm840_vm3, %v1091_v50 }
 0x46c   : > { %4472 = vmatpush3.bf16.xpose.msra.mxu0 %v1195_v52  ;;  %4473 = vmatprep.mubr.msk.bf16.mxu0 %vm4989_vm1, %v4988_v12 }
 0x46d   : > { %4483 = vmatprep.subr.bf16.mxu0 %v4988_v12 }
 0x473   : > { %4474 = vmatmul.mubr.msk.bf16.vlgmr.msra.gmra.mrb[16].mxu0 %vm840_vm3, %v1188_v53 }
 0x474   : > { %4485 = vmatprep.mubr.msk.bf16.mxu0 %vm4989_vm1, %v4988_v12  ;;  %4484 = vmatpush3.bf16.msra.mxu0 %v1317_v35 }
 0x475   : > { %4495 = vmatprep.subr.bf16.mxu0 %v4988_v12 }
 0x536   : > { %v1180_v54 = vpop.f32.mrb[8].mxu1 }
 0x537   : > { %v4469_v55 = vpop.f32.mrb[9].mxu1 }
 0x538   : > { %v1183_v56 = vpop.f32.mrb[10].mxu1 }
 0x539   : > { %v4470_v57 = vpop.f32.mrb[11].mxu1 }
 0x53e   : > { %v1133_v58 = vpop.f32.mrb[12].mxu0 }
 0x53f   : > { %v5257_v59 = vadd.f32 %v1180_v54, %v1133_v58  ;;  %v4463_v60 = vpop.f32.mrb[13].mxu0 }
 0x540   : > { %v1136_v61 = vpop.f32.mrb[14].mxu0 }
 0x541   : > { %v5259_v62 = vadd.f32 %v1183_v56, %v1136_v61  ;;  %v4464_v63 = vpop.f32.mrb[15].mxu0 }
 0x546   : > { %v1231_v0 = vpop.f32.mrb[16].mxu0 }
 0x547   : > { %v1238_v1 = vsel %vm5198_vm4, -1e+30, %v1231_v0  ;;  %v4475_v2 = vpop.f32.mrb[17].mxu0 }
 0x548   : > { %v1234_v3 = vpop.f32.mrb[18].mxu0  ;;  %v1240_v4 = vsel %vm890_vm5, %v1238_v1, -inf }
 0x549   : > { %v1239_v5 = vsel %vm5202_vm6, -1e+30, %v1234_v3  ;;  %1241 = vmax.xlane.f32.xlu0 %v1240_v4  ;;  %v4476_v6 = vpop.f32.mrb[19].mxu0 }
 0x54a   : > { %v1243_v7 = vsel %vm894_vm7, %v1239_v5, -inf }
 0x54b   : > { %1244 = vmax.xlane.f32.xlu1 %v1243_v7 }
 0x55c   : > { %1263 = vrot.lane.b32.xlu1 %v5174_v31, %s5904_s1  ;;  %s5923_s1 = sld [smem:[#allocation3_spill]] }
 0x560   : > { %1362 = vrot.lane.b32.xlu1 %v5176_v32, %s5900_s27 }
 0x562   : > { %s698_s29 = scalar_lea.vmem %s5923_s1, %s5143_s2 }
 0x5d6   : > { %v1242_v8 = vpop.xlane.xlu0 %1241 }
 0x5d7   : > { %v1246_v9 = vsub.f32 %v1238_v1, %v1242_v8 }
 0x5d8   : > { %v1245_v10 = vpop.xlane.xlu1 %1244 }
 0x5d9   : > { %v1248_v11 = vmul.f32 1.442695, %v1246_v9  ;;  %v1247_v13 = vsub.f32 %v1239_v5, %v1245_v10 }
 0x5db   : > { %4853 = vpow2.f32 %v1248_v11  ;;  %v1250_v14 = vmul.f32 1.442695, %v1247_v13 }
 0x5dc   : > { %v1264_v15 = vpop.permute.xlu1 %1263 }
 0x5dd   : > { %4855 = vpow2.f32 %v1250_v14  ;;  %v1269_v16 = vsel %vm918_vm2, %v1264_v15, 0 }
 0x5de   : > { %4478 = vmatpush3.bf16.msra.mxu1 %v1269_v16  ;;  %v820_v16 = vld [vmem:[%s5921_s6 + $0xc] sm:$0xf] }
 0x5df   : > { %4489 = vmatprep.subr.bf16.mxu1 %v4988_v12 }
 0x5e0   : > { %v1363_v33 = vpop.permute.xlu1 %1362 }
 0x5e5   : > { %v4854_v17 = vpop.eup %4853 }
 0x5e6   : > { %v1252_v18 = vsel %vm890_vm5, %v4854_v17, 0.0 }
 0x5e7   : > { %v4856_v19 = vpop.eup %4855  ;;  %1253 = vadd.xlane.f32.xlu0 %v1252_v18 }
 0x5e8   : > { %v1255_v20 = vsel %vm894_vm7, %v4856_v19, 0.0 }
 0x5eb   : > { %1256 = vadd.xlane.f32.xlu0 %v1255_v20 }
 0x601   : > { %1364 = vrot.lane.b32.xlu0 %v5172_v30, %s5889_s5  ;;  %s5890_s5 = smov 16  }
 0x674   : > { %v1254_v21 = vpop.xlane.xlu0 %1253 }
 0x675   : > { %4857 = vrcp.f32 %v1254_v21 }
 0x678   : > { %v1257_v22 = vpop.xlane.xlu0 %1256 }
 0x679   : > { %4859 = vrcp.f32 %v1257_v22 }
 0x67c   : > { %v1365_v27 = vpop.permute.xlu0 %1364 }
 0x67d   : > { %v1370_v29 = vsel %vm840_vm3, %v1365_v27, 0 }
 0x67f   : > { %v4858_v23 = vpop.eup %4857 }
 0x680   : > { %v1260_v25 = vmul.f32 %v4858_v23, %v4854_v17  ;;  %v1492_v17 = vsel %vm1095_vm8, %v820_v16, 0 }
 0x683   : > { %v4860_v24 = vpop.eup %4859 }
 0x684   : > { %v1261_v26 = vmul.f32 %v4860_v24, %v4856_v19 }
 0x686   : > { %v1262_v28 = vpack.c.bf16 %v1261_v26, %v1260_v25 }
 0x688   : > { %4480 = vmatmul.mubr.msk.bf16.vlgmr.msra.gmra.mrb[12].mxu1 %vm890_vm5, %v1262_v28 }
 0x689   : > { %4490 = vmatpush3.bf16.xpose.msra.mxu1 %v1370_v29  ;;  %4491 = vmatprep.mubr.msk.bf16.mxu1 %vm4989_vm1, %v4988_v12 }
 0x68a   : > { %4501 = vmatprep.subr.bf16.mxu1 %v4988_v12 }
 0x690   : > { %4492 = vmatmul.mubr.msk.bf16.vlgmr.msra.gmra.mrb[16].mxu1 %vm840_vm3, %v1363_v33 }
 0x691   : > { %4503 = vmatprep.mubr.msk.bf16.mxu1 %vm4989_vm1, %v4988_v12  ;;  %4502 = vmatpush3.bf16.msra.mxu1 %v1492_v17 }
 0x692   : > { %4513 = vmatprep.subr.bf16.mxu1 %v4988_v12 }
 0x75b   : > { %v1305_v36 = vpop.f32.mrb[12].mxu1 }
 0x75c   : > { %v4481_v37 = vpop.f32.mrb[13].mxu1 }
 0x75d   : > { %v1308_v38 = vpop.f32.mrb[14].mxu1 }
 0x75e   : > { %v1312_v39 = vpack.c.bf16 %v1308_v38, %v1305_v36  ;;  %v4482_v40 = vpop.f32.mrb[15].mxu1 }
 0x760   : > { %4486 = vmatmul.mubr.msk.bf16.vlgmr.msra.gmra.mrb[20].mxu0 %vm840_vm3, %v1312_v39 }
 0x761   : > { %4497 = vmatprep.mubr.msk.bf16.mxu0 %vm4989_vm1, %v4988_v12 }
 0x763   : > { %v1406_v42 = vpop.f32.mrb[16].mxu1 }
 0x764   : > { %v1413_v44 = vsel %vm5198_vm4, -1e+30, %v1406_v42  ;;  %v4493_v45 = vpop.f32.mrb[17].mxu1 }
 0x765   : > { %v1409_v46 = vpop.f32.mrb[18].mxu1  ;;  %v1415_v47 = vsel %vm890_vm5, %v1413_v44, -inf }
 0x766   : > { %v1414_v48 = vsel %vm5202_vm6, -1e+30, %v1409_v46  ;;  %1416 = vmax.xlane.f32.xlu1 %v1415_v47  ;;  %v4494_v49 = vpop.f32.mrb[19].mxu1 }
 0x767   : > { %v1418_v50 = vsel %vm894_vm7, %v1414_v48, -inf }
 0x768   : > { %1419 = vmax.xlane.f32.xlu0 %v1418_v50 }
 0x7f3   : > { %v1417_v51 = vpop.xlane.xlu1 %1416 }
 0x7f4   : > { %v1421_v52 = vsub.f32 %v1413_v44, %v1417_v51 }
 0x7f5   : > { %v1420_v53 = vpop.xlane.xlu0 %1419 }
 0x7f6   : > { %v1423_v54 = vmul.f32 1.442695, %v1421_v52  ;;  %v1422_v55 = vsub.f32 %v1414_v48, %v1420_v53 }
 0x7f8   : > { %4861 = vpow2.f32 %v1423_v54  ;;  %v1425_v56 = vmul.f32 1.442695, %v1422_v55 }
 0x7fa   : > { %4863 = vpow2.f32 %v1425_v56 }
 0x802   : > { %v4862_v57 = vpop.eup %4861 }
 0x803   : > { %v1427_v58 = vsel %vm890_vm5, %v4862_v57, 0.0 }
 0x804   : > { %v4864_v60 = vpop.eup %4863  ;;  %1428 = vadd.xlane.f32.xlu0 %v1427_v58 }
 0x805   : > { %v1430_v61 = vsel %vm894_vm7, %v4864_v60, 0.0 }
 0x806   : > { %1431 = vadd.xlane.f32.xlu1 %v1430_v61 }
 0x817   : > { %1539 = vrot.lane.b32.xlu1 %v5172_v30, %s5887_s26  ;;  %s5891_s26 = smov 88  }
 0x81a   : > { %1438 = vrot.lane.b32.xlu0 %v5174_v31, %s5900_s27 }
 0x81b   : > { %1537 = vrot.lane.b32.xlu1 %v5176_v32, %s5898_s28 }
 0x833   : > { %v1353_v63 = vpop.f32.mrb[20].mxu0 }
 0x834   : > { %v5308_v0 = vadd.f32 %v1353_v63, %v5257_v59  ;;  %v4487_v1 = vpop.f32.mrb[21].mxu0 }
 0x835   : > { %v1356_v2 = vpop.f32.mrb[22].mxu0 }
 0x836   : > { %v5311_v3 = vadd.f32 %v1356_v2, %v5259_v62  ;;  %v4488_v4 = vpop.f32.mrb[23].mxu0  ;;  %v821_v2 = vld [vmem:[%s5921_s6 + $0x10] sm:$0xf] }
 0x891   : > { %v1429_v5 = vpop.xlane.xlu0 %1428 }
 0x892   : > { %4865 = vrcp.f32 %v1429_v5 }
 0x893   : > { %v1432_v6 = vpop.xlane.xlu1 %1431 }
 0x894   : > { %4867 = vrcp.f32 %v1432_v6 }
 0x895   : > { %v1439_v7 = vpop.permute.xlu0 %1438 }
 0x896   : > { %v1444_v8 = vsel %vm918_vm2, %v1439_v7, 0 }
 0x897   : > { %4496 = vmatpush3.bf16.msra.mxu0 %v1444_v8  ;;  %v1540_v13 = vpop.permute.xlu1 %1539 }
 0x898   : > { %4507 = vmatprep.subr.bf16.mxu0 %v4988_v12  ;;  %v1545_v62 = vsel %vm840_vm3, %v1540_v13, 0 }
 0x89b   : > { %v1538_v15 = vpop.permute.xlu1 %1537 }
 0x89c   : > { %v4866_v9 = vpop.eup %4865 }
 0x89d   : > { %v1435_v59 = vmul.f32 %v4866_v9, %v4862_v57 }
 0x89e   : > { %v4868_v10 = vpop.eup %4867 }
 0x89f   : > { %v1436_v11 = vmul.f32 %v4868_v10, %v4864_v60 }
 0x8a1   : > { %v1437_v14 = vpack.c.bf16 %v1436_v11, %v1435_v59 }
 0x8a3   : > { %4498 = vmatmul.mubr.msk.bf16.vlgmr.msra.gmra.mrb[24].mxu0 %vm890_vm5, %v1437_v14 }
 0x8a4   : > { %4508 = vmatpush3.bf16.xpose.msra.mxu0 %v1545_v62  ;;  %4509 = vmatprep.mubr.msk.bf16.mxu0 %vm4989_vm1, %v4988_v12 }
 0x8a5   : > { %4519 = vmatprep.subr.bf16.mxu0 %v4988_v12 }
 0x8ab   : > { %4510 = vmatmul.mubr.msk.bf16.vlgmr.msra.gmra.mrb[28].mxu0 %vm840_vm3, %v1538_v15 }
 0x8ac   : > { %4521 = vmatprep.mubr.msk.bf16.mxu0 %vm4989_vm1, %v4988_v12 }
 0x976   : > { %v1480_v18 = vpop.f32.mrb[24].mxu0 }
 0x977   : > { %v4499_v19 = vpop.f32.mrb[25].mxu0 }
 0x978   : > { %v1483_v20 = vpop.f32.mrb[26].mxu0 }
 0x979   : > { %v1487_v21 = vpack.c.bf16 %v1483_v20, %v1480_v18  ;;  %v4500_v22 = vpop.f32.mrb[27].mxu0 }
 0x97b   : > { %4504 = vmatmul.mubr.msk.bf16.vlgmr.msra.gmra.mrb[20].mxu1 %vm840_vm3, %v1487_v21 }
 0x97c   : > { %4515 = vmatprep.mubr.msk.bf16.mxu1 %vm4989_vm1, %v4988_v12 }
 0x97e   : > { %v1581_v23 = vpop.f32.mrb[28].mxu0 }
 0x97f   : > { %v1588_v24 = vsel %vm5198_vm4, -1e+30, %v1581_v23  ;;  %v4511_v25 = vpop.f32.mrb[29].mxu0 }
 0x980   : > { %v1584_v26 = vpop.f32.mrb[30].mxu0  ;;  %v1590_v27 = vsel %vm890_vm5, %v1588_v24, -inf }
 0x981   : > { %v1589_v28 = vsel %vm5202_vm6, -1e+30, %v1584_v26  ;;  %1591 = vmax.xlane.f32.xlu0 %v1590_v27  ;;  %v4512_v29 = vpop.f32.mrb[31].mxu0 }
 0x982   : > { %v1593_v33 = vsel %vm894_vm7, %v1589_v28, -inf }
 0x983   : > { %1594 = vmax.xlane.f32.xlu1 %v1593_v33 }
 0x994   : > { %1613 = vrot.lane.b32.xlu1 %v5174_v31, %s5898_s28  ;;  %s5928_s28 = smov 48  }
 0x998   : > { %1712 = vrot.lane.b32.xlu1 %v5176_v32, %s5891_s26 }
 0xa0e   : > { %v1592_v34 = vpop.xlane.xlu0 %1591 }
 0xa0f   : > { %v1596_v35 = vsub.f32 %v1588_v24, %v1592_v34 }
 0xa10   : > { %v1595_v36 = vpop.xlane.xlu1 %1594 }
 0xa11   : > { %v1598_v37 = vmul.f32 1.442695, %v1596_v35  ;;  %v1597_v38 = vsub.f32 %v1589_v28, %v1595_v36 }
 0xa13   : > { %4869 = vpow2.f32 %v1598_v37  ;;  %v1600_v39 = vmul.f32 1.442695, %v1597_v38 }
 0xa14   : > { %v1614_v40 = vpop.permute.xlu1 %1613 }
 0xa15   : > { %4871 = vpow2.f32 %v1600_v39  ;;  %v1619_v42 = vsel %vm918_vm2, %v1614_v40, 0 }
 0xa16   : > { %4514 = vmatpush3.bf16.msra.mxu1 %v1619_v42 }
 0xa17   : > { %4525 = vmatprep.subr.bf16.mxu1 %v4988_v12 }
 0xa1d   : > { %v4870_v44 = vpop.eup %4869 }
 0xa1e   : > { %v1602_v45 = vsel %vm890_vm5, %v4870_v44, 0.0 }
 0xa1f   : > { %v4872_v46 = vpop.eup %4871  ;;  %1603 = vadd.xlane.f32.xlu0 %v1602_v45 }
 0xa20   : > { %v1605_v47 = vsel %vm894_vm7, %v4872_v46, 0.0 }
 0xa23   : > { %1606 = vadd.xlane.f32.xlu0 %v1605_v47 }
 0xa39   : > { %1714 = vrot.lane.b32.xlu0 %v5172_v30, %s5888_s25  ;;  %s5894_s25 = smov 80  }
 0xa4e   : > { %v1528_v48 = vpop.f32.mrb[20].mxu1 }
 0xa4f   : > { %v5348_v49 = vadd.f32 %v1528_v48, %v5308_v0  ;;  %v4505_v50 = vpop.f32.mrb[21].mxu1  ;;  %v1713_v0 = vpop.permute.xlu1 %1712 }
 0xa50   : > { %v1531_v51 = vpop.f32.mrb[22].mxu1 }
 0xa51   : > { %v5351_v52 = vadd.f32 %v1531_v51, %v5311_v3  ;;  %v4506_v53 = vpop.f32.mrb[23].mxu1  ;;  %v1667_v3 = vsel %vm1095_vm8, %v821_v2, 0 }
 0xa52   : > { %4520 = vmatpush3.bf16.msra.mxu0 %v1667_v3 }
 0xa53   : > { %4531 = vmatprep.subr.bf16.mxu0 %v4988_v12 }
 0xaac   : > { %v1604_v54 = vpop.xlane.xlu0 %1603 }
 0xaad   : > { %4873 = vrcp.f32 %v1604_v54 }
 0xab0   : > { %v1607_v55 = vpop.xlane.xlu0 %1606 }
 0xab1   : > { %4875 = vrcp.f32 %v1607_v55 }
 0xab4   : > { %v1715_v61 = vpop.permute.xlu0 %1714 }
 0xab5   : > { %v1720_v1 = vsel %vm840_vm3, %v1715_v61, 0 }
 0xab7   : > { %v4874_v56 = vpop.eup %4873 }
 0xab8   : > { %v1610_v58 = vmul.f32 %v4874_v56, %v4870_v44 }
 0xabb   : > { %v4876_v57 = vpop.eup %4875 }
 0xabc   : > { %v1611_v60 = vmul.f32 %v4876_v57, %v4872_v46 }
 0xabe   : > { %v1612_v63 = vpack.c.bf16 %v1611_v60, %v1610_v58 }
 0xac0   : > { %4516 = vmatmul.mubr.msk.bf16.vlgmr.msra.gmra.mrb[24].mxu1 %vm890_vm5, %v1612_v63 }
 0xac1   : > { %4526 = vmatpush3.bf16.xpose.msra.mxu1 %v1720_v1  ;;  %4527 = vmatprep.mubr.msk.bf16.mxu1 %vm4989_vm1, %v4988_v12 }
 0xac2   : > { %4537 = vmatprep.subr.bf16.mxu1 %v4988_v12 }
 0xac8   : > { %4528 = vmatmul.mubr.msk.bf16.vlgmr.msra.gmra.mrb[28].mxu1 %vm840_vm3, %v1713_v0 }
 0xac9   : > { %4539 = vmatprep.mubr.msk.bf16.mxu1 %vm4989_vm1, %v4988_v12 }
 0xb93   : > { %v1655_v4 = vpop.f32.mrb[24].mxu1 }
 0xb94   : > { %v4517_v5 = vpop.f32.mrb[25].mxu1 }
 0xb95   : > { %v1658_v6 = vpop.f32.mrb[26].mxu1 }
 0xb96   : > { %v1662_v7 = vpack.c.bf16 %v1658_v6, %v1655_v4  ;;  %v4518_v8 = vpop.f32.mrb[27].mxu1 }
 0xb98   : > { %4522 = vmatmul.mubr.msk.bf16.vlgmr.msra.gmra.mrb[32].mxu0 %vm840_vm3, %v1662_v7 }
 0xb99   : > { %4533 = vmatprep.mubr.msk.bf16.mxu0 %vm4989_vm1, %v4988_v12 }
 0xb9b   : > { %v1756_v9 = vpop.f32.mrb[28].mxu1 }
 0xb9c   : > { %v1763_v10 = vsel %vm5198_vm4, -1e+30, %v1756_v9  ;;  %v4529_v59 = vpop.f32.mrb[29].mxu1 }
 0xb9d   : > { %v1759_v11 = vpop.f32.mrb[30].mxu1  ;;  %v1765_v13 = vsel %vm890_vm5, %v1763_v10, -inf }
 0xb9e   : > { %v1764_v14 = vsel %vm5202_vm6, -1e+30, %v1759_v11  ;;  %1766 = vmax.xlane.f32.xlu1 %v1765_v13  ;;  %v4530_v62 = vpop.f32.mrb[31].mxu1 }
 0xb9f   : > { %v1768_v15 = vsel %vm894_vm7, %v1764_v14, -inf }
 0xba0   : > { %1769 = vmax.xlane.f32.xlu0 %v1768_v15 }
 0xc2b   : > { %v1767_v16 = vpop.xlane.xlu1 %1766 }
 0xc2c   : > { %v1771_v17 = vsub.f32 %v1763_v10, %v1767_v16 }
 0xc2d   : > { %v1770_v18 = vpop.xlane.xlu0 %1769 }
 0xc2e   : > { %v1773_v19 = vmul.f32 1.442695, %v1771_v17  ;;  %v1772_v20 = vsub.f32 %v1764_v14, %v1770_v18 }
 0xc30   : > { %4877 = vpow2.f32 %v1773_v19  ;;  %v1775_v21 = vmul.f32 1.442695, %v1772_v20 }
 0xc32   : > { %4879 = vpow2.f32 %v1775_v21 }
 0xc3a   : > { %v4878_v22 = vpop.eup %4877 }
 0xc3b   : > { %v1777_v23 = vsel %vm890_vm5, %v4878_v22, 0.0 }
 0xc3c   : > { %v4880_v24 = vpop.eup %4879  ;;  %1778 = vadd.xlane.f32.xlu0 %v1777_v23 }
 0xc3d   : > { %v1780_v25 = vsel %vm894_vm7, %v4880_v24, 0.0 }
 0xc3e   : > { %1781 = vadd.xlane.f32.xlu1 %v1780_v25 }
 0xc4f   : > { %1889 = vrot.lane.b32.xlu1 %v5172_v30, %s5890_s5  ;;  %s5893_s5 = smov 8  }
 0xc52   : > { %1788 = vrot.lane.b32.xlu0 %v5174_v31, %s5891_s26  ;;  %s5896_s26 = smov 72  }
 0xc53   : > { %1887 = vrot.lane.b32.xlu1 %v5176_v32, %s5894_s25 }
 0xc6b   : > { %v1703_v26 = vpop.f32.mrb[32].mxu0 }
 0xc6c   : > { %v5384_v27 = vadd.f32 %v1703_v26, %v5348_v49  ;;  %v4523_v28 = vpop.f32.mrb[33].mxu0  ;;  %v822_v49 = vld [vmem:[%s5921_s6 + $0x14] sm:$0xf] }
 0xc6d   : > { %v1706_v29 = vpop.f32.mrb[34].mxu0  ;;  %v1842_v50 = vsel %vm1095_vm8, %v822_v49, 0 }
 0xc6e   : > { %v5387_v33 = vadd.f32 %v1706_v29, %v5351_v52  ;;  %v4524_v34 = vpop.f32.mrb[35].mxu0  ;;  %4538 = vmatpush3.bf16.msra.mxu1 %v1842_v50 }
 0xc6f   : > { %4549 = vmatprep.subr.bf16.mxu1 %v4988_v12 }
 0xcc9   : > { %v1779_v35 = vpop.xlane.xlu0 %1778 }
 0xcca   : > { %4881 = vrcp.f32 %v1779_v35 }
 0xccb   : > { %v1782_v36 = vpop.xlane.xlu1 %1781 }
 0xccc   : > { %4883 = vrcp.f32 %v1782_v36 }
 0xccd   : > { %v1789_v37 = vpop.permute.xlu0 %1788 }
 0xcce   : > { %v1794_v38 = vsel %vm918_vm2, %v1789_v37, 0 }
 0xccf   : > { %4532 = vmatpush3.bf16.msra.mxu0 %v1794_v38  ;;  %v1890_v45 = vpop.permute.xlu1 %1889 }
 0xcd0   : > { %4543 = vmatprep.subr.bf16.mxu0 %v4988_v12  ;;  %v1895_v47 = vsel %vm840_vm3, %v1890_v45, 0 }
 0xcd3   : > { %v1888_v48 = vpop.permute.xlu1 %1887 }
 0xcd4   : > { %v4882_v39 = vpop.eup %4881 }
 0xcd5   : > { %v1785_v42 = vmul.f32 %v4882_v39, %v4878_v22 }
 0xcd6   : > { %v4884_v40 = vpop.eup %4883 }
 0xcd7   : > { %v1786_v44 = vmul.f32 %v4884_v40, %v4880_v24 }
 0xcd9   : > { %v1787_v46 = vpack.c.bf16 %v1786_v44, %v1785_v42 }
 0xcdb   : > { %4534 = vmatmul.mubr.msk.bf16.vlgmr.msra.gmra.mrb[36].mxu0 %vm890_vm5, %v1787_v46 }
 0xcdc   : > { %4544 = vmatpush3.bf16.xpose.msra.mxu0 %v1895_v47  ;;  %4545 = vmatprep.mubr.msk.bf16.mxu0 %vm4989_vm1, %v4988_v12 }
 0xcdd   : > { %4555 = vmatprep.subr.bf16.mxu0 %v4988_v12 }
 0xce3   : > { %4546 = vmatmul.mubr.msk.bf16.vlgmr.msra.gmra.mrb[40].mxu0 %vm840_vm3, %v1888_v48 }
 0xce4   : > { %4557 = vmatprep.mubr.msk.bf16.mxu0 %vm4989_vm1, %v4988_v12 }
 0xdae   : > { %v1830_v51 = vpop.f32.mrb[36].mxu0 }
 0xdaf   : > { %v4535_v52 = vpop.f32.mrb[37].mxu0 }
 0xdb0   : > { %v1833_v53 = vpop.f32.mrb[38].mxu0 }
 0xdb1   : > { %v1837_v54 = vpack.c.bf16 %v1833_v53, %v1830_v51  ;;  %v4536_v55 = vpop.f32.mrb[39].mxu0 }
 0xdb2   : > { %v824_v55 = vld [vmem:[%s5921_s6 + $0x1c] sm:$0xf] }
 0xdb3   : > { %4540 = vmatmul.mubr.msk.bf16.vlgmr.msra.gmra.mrb[32].mxu1 %vm840_vm3, %v1837_v54 }
 0xdb4   : > { %4551 = vmatprep.mubr.msk.bf16.mxu1 %vm4989_vm1, %v4988_v12 }
 0xdb6   : > { %v1931_v56 = vpop.f32.mrb[40].mxu0 }
 0xdb7   : > { %v1938_v57 = vsel %vm5198_vm4, -1e+30, %v1931_v56  ;;  %v4547_v58 = vpop.f32.mrb[41].mxu0  ;;  %v2192_v56 = vsel %vm1095_vm8, %v824_v55, 0 }
 0xdb8   : > { %v1934_v60 = vpop.f32.mrb[42].mxu0  ;;  %v1940_v61 = vsel %vm890_vm5, %v1938_v57, -inf }
 0xdb9   : > { %v1939_v63 = vsel %vm5202_vm6, -1e+30, %v1934_v60  ;;  %1941 = vmax.xlane.f32.xlu0 %v1940_v61  ;;  %v4548_v1 = vpop.f32.mrb[43].mxu0 }
 0xdba   : > { %v1943_v0 = vsel %vm894_vm7, %v1939_v63, -inf }
 0xdbb   : > { %1944 = vmax.xlane.f32.xlu1 %v1943_v0 }
 0xdcc   : > { %1963 = vrot.lane.b32.xlu1 %v5174_v31, %s5894_s25  ;;  %s5924_s25 = sld [smem:[#allocation8_spill]] }
 0xdd0   : > { %2062 = vrot.lane.b32.xlu1 %v5176_v32, %s5896_s26 }
 0xe46   : > { %v1942_v2 = vpop.xlane.xlu0 %1941 }
 0xe47   : > { %v1946_v3 = vsub.f32 %v1938_v57, %v1942_v2 }
 0xe48   : > { %v1945_v4 = vpop.xlane.xlu1 %1944 }
 0xe49   : > { %v1948_v5 = vmul.f32 1.442695, %v1946_v3  ;;  %v1947_v6 = vsub.f32 %v1939_v63, %v1945_v4 }
 0xe4b   : > { %4885 = vpow2.f32 %v1948_v5  ;;  %v1950_v7 = vmul.f32 1.442695, %v1947_v6 }
 0xe4c   : > { %v1964_v8 = vpop.permute.xlu1 %1963 }
 0xe4d   : > { %4887 = vpow2.f32 %v1950_v7  ;;  %v1969_v9 = vsel %vm918_vm2, %v1964_v8, 0 }
 0xe4e   : > { %4550 = vmatpush3.bf16.msra.mxu1 %v1969_v9 }
 0xe4f   : > { %4561 = vmatprep.subr.bf16.mxu1 %v4988_v12 }
 0xe50   : > { %v2063_v26 = vpop.permute.xlu1 %2062 }
 0xe55   : > { %v4886_v10 = vpop.eup %4885 }
 0xe56   : > { %v1952_v59 = vsel %vm890_vm5, %v4886_v10, 0.0 }
 0xe57   : > { %v4888_v11 = vpop.eup %4887  ;;  %1953 = vadd.xlane.f32.xlu0 %v1952_v59 }
 0xe58   : > { %v1955_v32 = vsel %vm894_vm7, %v4888_v11, 0.0 }
 0xe5b   : > { %1956 = vadd.xlane.f32.xlu0 %v1955_v32 }
 0xe71   : > { %2064 = vrot.lane.b32.xlu0 %v5172_v30, %s5893_s5  ;;  %s5933_s5 = smov 88  }
 0xe86   : > { %v1878_v13 = vpop.f32.mrb[32].mxu1 }
 0xe87   : > { %v5424_v14 = vadd.f32 %v1878_v13, %v5384_v27  ;;  %v4541_v62 = vpop.f32.mrb[33].mxu1  ;;  %v823_v27 = vld [vmem:[%s5921_s6 + $0x18] sm:$0xf] }
 0xe88   : > { %v1881_v15 = vpop.f32.mrb[34].mxu1  ;;  %v2017_v28 = vsel %vm1095_vm8, %v823_v27, 0 }
 0xe89   : > { %v5427_v16 = vadd.f32 %v1881_v15, %v5387_v33  ;;  %v4542_v17 = vpop.f32.mrb[35].mxu1  ;;  %4556 = vmatpush3.bf16.msra.mxu0 %v2017_v28 }
 0xe8a   : > { %4567 = vmatprep.subr.bf16.mxu0 %v4988_v12  ;;  %v4977_v17 = vld [vmem:[%s5155_s24] sm:$0xff] }
 0xee4   : > { %v1954_v18 = vpop.xlane.xlu0 %1953 }
 0xee5   : > { %4889 = vrcp.f32 %v1954_v18 }
 0xee8   : > { %v1957_v19 = vpop.xlane.xlu0 %1956 }
 0xee9   : > { %4891 = vrcp.f32 %v1957_v19 }
 0xeec   : > { %v2065_v24 = vpop.permute.xlu0 %2064 }
 0xeed   : > { %v2070_v25 = vsel %vm840_vm3, %v2065_v24, 0 }
 0xeef   : > { %v4890_v20 = vpop.eup %4889 }
 0xef0   : > { %v1960_v22 = vmul.f32 %v4890_v20, %v4886_v10 }
 0xef3   : > { %v4892_v21 = vpop.eup %4891 }
 0xef4   : > { %v1961_v23 = vmul.f32 %v4892_v21, %v4888_v11  ;;  %v4978_v21 = vld [vmem:[%s5155_s24 + $0x8] sm:$0xf]  ;;  %s5926_s24 = smov 112  }
 0xef6   : > { %v1962_v30 = vpack.c.bf16 %v1961_v23, %v1960_v22 }
 0xef8   : > { %4552 = vmatmul.mubr.msk.bf16.vlgmr.msra.gmra.mrb[36].mxu1 %vm890_vm5, %v1962_v30 }
 0xef9   : > { %4562 = vmatpush3.bf16.xpose.msra.mxu1 %v2070_v25  ;;  %4563 = vmatprep.mubr.msk.bf16.mxu1 %vm4989_vm1, %v4988_v12 }
 0xefa   : > { %4573 = vmatprep.subr.bf16.mxu1 %v4988_v12 }
 0xf00   : > { %4564 = vmatmul.mubr.msk.bf16.vlgmr.msra.gmra.mrb[40].mxu1 %vm840_vm3, %v2063_v26 }
 0xf01   : > { %4575 = vmatprep.mubr.msk.bf16.mxu1 %vm4989_vm1, %v4988_v12  ;;  %4574 = vmatpush3.bf16.msra.mxu1 %v2192_v56 }
 0xf02   : > { %4591 = vmatprep.subr.bf16.mxu1 %v4988_v12 }
 0xfcb   : > { %v2005_v29 = vpop.f32.mrb[36].mxu1 }
 0xfcc   : > { %v4553_v33 = vpop.f32.mrb[37].mxu1 }
 0xfcd   : > { %v2008_v34 = vpop.f32.mrb[38].mxu1 }
 0xfce   : > { %v2012_v35 = vpack.c.bf16 %v2008_v34, %v2005_v29  ;;  %v4554_v36 = vpop.f32.mrb[39].mxu1 }
 0xfd0   : > { %4558 = vmatmul.mubr.msk.bf16.vlgmr.msra.gmra.mrb[44].mxu0 %vm840_vm3, %v2012_v35 }
 0xfd1   : > { %4569 = vmatprep.mubr.msk.bf16.mxu0 %vm4989_vm1, %v4988_v12 }
 0xfd3   : > { %v2106_v37 = vpop.f32.mrb[40].mxu1 }
 0xfd4   : > { %v2113_v38 = vsel %vm5198_vm4, -1e+30, %v2106_v37  ;;  %v4565_v39 = vpop.f32.mrb[41].mxu1 }
 0xfd5   : > { %v2109_v40 = vpop.f32.mrb[42].mxu1  ;;  %v2115_v42 = vsel %vm890_vm5, %v2113_v38, -inf  ;;  %v4817_v39 = vld [vmem:[%s5872_s10] sm:$0xff]  }
 0xfd6   : > { %v2114_v44 = vsel %vm5202_vm6, -1e+30, %v2109_v40  ;;  %2116 = vmax.xlane.f32.xlu1 %v2115_v42  ;;  %v4566_v45 = vpop.f32.mrb[43].mxu1  ;;  %v4818_v40 = vld [vmem:[%s5872_s10 + $0x8] sm:$0xff]   ;;  %v4819_v42 = vld [vmem:[%s5872_s10 + $0x10] sm:$0xff]  }
 0xfd7   : > { %v2118_v46 = vsel %vm894_vm7, %v2114_v44, -inf  ;;  %v4821_v45 = vld [vmem:[%s5872_s10 + $0x18] sm:$0xff]  }
 0xfd8   : > { %2119 = vmax.xlane.f32.xlu0 %v2118_v46  ;;  %v4822_v46 = vld [vmem:[%s5870_s8 + $0x8] sm:$0xff]  }
0x1063   : > { %v2117_v47 = vpop.xlane.xlu1 %2116 }
0x1064   : > { %v2121_v48 = vsub.f32 %v2113_v38, %v2117_v47  ;;  %v707_v47 = vld [vmem:[%s698_s29] sm:$0xff] }
0x1065   : > { %v2120_v49 = vpop.xlane.xlu0 %2119 }
0x1066   : > { %v2123_v50 = vmul.f32 1.442695, %v2121_v48  ;;  %v2122_v51 = vsub.f32 %v2114_v44, %v2120_v49  ;;  %v4820_v44 = vld [vmem:[%s5870_s8] sm:$0xff]   ;;  %v708_v48 = vld [vmem:[%s698_s29 + $0x8] sm:$0xff]  ;;  %s5927_s29 = smov 56  }
0x1067   : > { %v2378_v49 = vpack.c.bf16 %v708_v48, %v707_v47 }
0x1068   : > { %4893 = vpow2.f32 %v2123_v50  ;;  %v2125_v41 = vmul.f32 1.442695, %v2122_v51  ;;  %v4823_v50 = vld [vmem:[%s5870_s8 + $0x10] sm:$0xff]   ;;  %v4824_v51 = vld [vmem:[%s5870_s8 + $0x18] sm:$0xff]  }
0x106a   : > { %4895 = vpow2.f32 %v2125_v41 }
0x1072   : > { %v4894_v52 = vpop.eup %4893 }
0x1073   : > { %v2127_v53 = vsel %vm890_vm5, %v4894_v52, 0.0 }
0x1074   : > { %v4896_v54 = vpop.eup %4895  ;;  %2128 = vadd.xlane.f32.xlu0 %v2127_v53 }
0x1075   : > { %v2130_v43 = vsel %vm894_vm7, %v4896_v54, 0.0 }
0x1076   : > { %2131 = vadd.xlane.f32.xlu1 %v2130_v43 }
0x108a   : > { %2138 = vrot.lane.b32.xlu0 %v5174_v31, %s5896_s26  ;;  %s5922_s26 = sld [smem:[#allocation7_spill]] }
0x10a3   : > { %v2053_v57 = vpop.f32.mrb[44].mxu0 }
0x10a4   : > { %v2060_v58 = vadd.f32 %v2053_v57, %v5424_v14  ;;  %v4559_v60 = vpop.f32.mrb[45].mxu0 }
0x10a5   : > { %v2056_v61 = vpop.f32.mrb[46].mxu0 }
0x10a6   : > { %v2061_v63 = vadd.f32 %v2056_v61, %v5427_v16  ;;  %v4560_v1 = vpop.f32.mrb[47].mxu0  ;;  %v4251_v16 = vld [vmem:[%s5922_s26] ss:$0 sm:$0xff] }
0x10a7   : > { %v4253_v1 = vld [vmem:[%s5869_s7] ss:$0 sm:$0xff] }
0x1101   : > { %v2129_v0 = vpop.xlane.xlu0 %2128 }
0x1102   : > { %4897 = vrcp.f32 %v2129_v0 }
0x1103   : > { %v2132_v31 = vpop.xlane.xlu1 %2131 }
0x1104   : > { %4899 = vrcp.f32 %v2132_v31 }
0x1105   : > { %v2139_v2 = vpop.permute.xlu0 %2138 }
0x1106   : > { %v2144_v3 = vsel %vm918_vm2, %v2139_v2, 0 }
0x1107   : > { %4568 = vmatpush3.bf16.msra.mxu0 %v2144_v3 }
0x1108   : > { %4579 = vmatprep.subr.bf16.mxu0 %v4988_v12 }
0x110c   : > { %v4898_v4 = vpop.eup %4897 }
0x110d   : > { %v2135_v6 = vmul.f32 %v4898_v4, %v4894_v52  ;;  %v4260_v4 = vld [vmem:[%s5873_s11] ss:$0 sm:$0xff] }
0x110e   : > { %v4900_v5 = vpop.eup %4899 }
0x110f   : > { %v2136_v7 = vmul.f32 %v4900_v5, %v4896_v54 }
0x1111   : > { %v2137_v8 = vpack.c.bf16 %v2136_v7, %v2135_v6 }
0x1113   : > { %4570 = vmatmul.mubr.msk.bf16.vlgmr.msra.gmra.mrb[48].mxu0 %vm890_vm5, %v2137_v8 }
0x1114   : > { %4587 = vmatprep.mubr.msk.bf16.mxu0 %vm4989_vm1, %v4988_v12  ;;  %4580 = vmatpush3.bf16.msra.mxu0 %v4820_v44 }
0x1115   : > { %4581 = vmatprep.subr.bf16.mxu0 %v4988_v12 }
0x1118   : > { %4582 = vmatpush3.bf16.msra.mxu0 %v4822_v46 }
0x1119   : > { %4583 = vmatprep.subr.bf16.mxu0 %v4988_v12 }
0x111c   : > { %4584 = vmatpush3.bf16.msra.mxu0 %v4823_v50 }
0x111d   : > { %4585 = vmatprep.subr.bf16.mxu0 %v4988_v12 }
0x1120   : > { %4586 = vmatpush3.bf16.msra.mxu0 %v4824_v51 }
0x1121   : > { %4603 = vmatprep.subr.bf16.mxu0 %v4988_v12 }
0x11e6   : > { %v2180_v9 = vpop.f32.mrb[48].mxu0 }
0x11e7   : > { %v4571_v10 = vpop.f32.mrb[49].mxu0 }
0x11e8   : > { %v2183_v59 = vpop.f32.mrb[50].mxu0 }
0x11e9   : > { %v2187_v11 = vpack.c.bf16 %v2183_v59, %v2180_v9  ;;  %v4572_v32 = vpop.f32.mrb[51].mxu0 }
0x11ea   : > { %v4254_v32 = vld [vmem:[%s5871_s9] ss:$0 sm:$0xff] }
0x11eb   : > { %4576 = vmatmul.mubr.msk.bf16.vlgmr.msra.gmra.mrb[44].mxu1 %vm840_vm3, %v2187_v11 }
0x11ec   : > { %4599 = vmatprep.mubr.msk.bf16.mxu1 %vm4989_vm1, %v4988_v12  ;;  %4592 = vmatpush3.bf16.msra.mxu1 %v4817_v39 }
0x11ed   : > { %4593 = vmatprep.subr.bf16.mxu1 %v4988_v12 }
0x11f0   : > { %4594 = vmatpush3.bf16.msra.mxu1 %v4818_v40 }
0x11f1   : > { %4595 = vmatprep.subr.bf16.mxu1 %v4988_v12 }
0x11f4   : > { %4596 = vmatpush3.bf16.msra.mxu1 %v4819_v42 }
0x11f5   : > { %4597 = vmatprep.subr.bf16.mxu1 %v4988_v12 }
0x11f8   : > { %4598 = vmatpush3.bf16.msra.mxu1 %v4821_v45 }
0x11f9   : > { %4609 = vmatprep.subr.bf16.mxu1 %v4988_v12 }
0x11fb   : > { %4600 = vmatmul.mubr.msk.bf16.vlgmr.msra.gmra.mrb[48].mxu1 %vm770_vm0, %v2378_v49 }
0x11fc   : > { %4611 = vmatprep.mubr.msk.bf16.mxu1 %vm4989_vm1, %v4988_v12 }
0x12be   : > { %v2228_v13 = vpop.f32.mrb[44].mxu1 }
0x12bf   : > { %v2235_v14 = vadd.f32 %v2228_v13, %v2060_v58  ;;  %v4577_v62 = vpop.f32.mrb[45].mxu1  ;;  %v4252_v58 = vld [vmem:[%s5924_s25] ss:$0 sm:$0xff]  ;;  %s5932_s25 = smov 32  }
0x12c0   : > { %v2231_v15 = vpop.f32.mrb[46].mxu1 }
0x12c1   : > { %v2237_v18 = vadd.f32 %v4977_v17, %v2235_v14  ;;  %v2236_v19 = vadd.f32 %v2231_v15, %v2061_v63  ;;  %v4578_v20 = vpop.f32.mrb[47].mxu1 }
0x12c3   : > { %v2238_v22 = vadd.f32 %v4978_v21, %v2236_v19  ;;  %v2246_v23 = vadd.f32 %v4251_v16, %v2237_v18 }
0x12c5   : > { %v2250_v24 = vsel %vm770_vm0, %v2246_v23, 0.0  ;;  %v2247_v30 = vadd.f32 %v4251_v16, %v2238_v22 }
0x12c6   : > { %2251 = vadd.xlane.f32.xlu1 %v2250_v24 }
0x12c7   : > { %v2254_v25 = vsel %vm2253_vm9, %v2247_v30, 0.0 }
0x12ca   : > { %2255 = vadd.xlane.f32.xlu1 %v2254_v25 }
0x12ce   : > { %v2455_v5 = vpop.f32.mrb[48].mxu1 }
0x12cf   : > { %v2456_v6 = vadd.f32 %v4260_v4, %v2455_v5  ;;  %v4601_v7 = vpop.f32.mrb[49].mxu1 }
0x12d0   : > { %v2458_v8 = vpop.f32.mrb[50].mxu1 }
0x12d1   : > { %v2459_v9 = vadd.f32 %v4260_v4, %v2458_v8  ;;  %v4602_v10 = vpop.f32.mrb[51].mxu1 }
0x12d3   : > { %v5536_v59 = vpack.c.bf16 %v2459_v9, %v2456_v6 }
0x12d5   : > { %v2478_v11 = vsel %vm840_vm3, %v5536_v59, 0 }
0x1353   : > { %v2252_v26 = vpop.xlane.xlu1 %2251 }
0x1354   : > { %v2258_v27 = vmul.f32 0.015625, %v2252_v26 }
0x1356   : > { %v2260_v28 = vsub.f32 %v2246_v23, %v2258_v27 }
0x1357   : > { %v2256_v29 = vpop.xlane.xlu1 %2255 }
0x1358   : > { %v2259_v33 = vmul.f32 0.015625, %v2256_v29  ;;  %v2262_v34 = vmul.f32 %v2260_v28, %v2260_v28 }
0x135a   : > { %v2261_v35 = vsub.f32 %v2247_v30, %v2259_v33  ;;  %v2264_v36 = vsel %vm770_vm0, %v2262_v34, 0.0 }
0x135b   : > { %2265 = vadd.xlane.f32.xlu1 %v2264_v36 }
0x135c   : > { %v2263_v37 = vmul.f32 %v2261_v35, %v2261_v35 }
0x135e   : > { %v2267_v38 = vsel %vm2253_vm9, %v2263_v37, 0.0 }
0x135f   : > { %2268 = vadd.xlane.f32.xlu1 %v2267_v38 }
0x1370   : > { %2598 = vrot.lane.b32.xlu1 %v5536_v59, %s4991_s30 }
0x13e8   : > { %v2266_v41 = vpop.xlane.xlu1 %2265 }
0x13e9   : > { %v2270_v52 = vmul.f32 0.015625, %v2266_v41 }
0x13eb   : > { %v2272_v53 = vadd.f32 1e-05, %v2270_v52 }
0x13ec   : > { %v2269_v54 = vpop.xlane.xlu1 %2268 }
0x13ed   : > { %4901 = vrsqrt.f32 %v2272_v53  ;;  %v2271_v43 = vmul.f32 0.015625, %v2269_v54 }
0x13ef   : > { %v2273_v55 = vadd.f32 1e-05, %v2271_v43 }
0x13f0   : > { %v2599_v18 = vpop.permute.xlu1 %2598 }
0x13f1   : > { %4903 = vrsqrt.f32 %v2273_v55  ;;  %v2604_v22 = vsel %vm840_vm3, %v2599_v18, 0 }
0x13f7   : > { %v4902_v56 = vpop.eup %4901 }
0x13f8   : > { %v2276_v57 = vmul.f32 %v4902_v56, %v2260_v28 }
0x13fa   : > { %v2284_v61 = vmul.f32 %v4252_v58, %v2276_v57 }
0x13fb   : > { %v4904_v60 = vpop.eup %4903 }
0x13fc   : > { %v2277_v63 = vmul.f32 %v4904_v60, %v2261_v35  ;;  %v5524_v31 = vadd.f32 %v4253_v1, %v2284_v61 }
0x13fe   : > { %v2285_v0 = vmul.f32 %v4252_v58, %v2277_v63 }
0x1400   : > { %v5526_v2 = vadd.f32 %v4253_v1, %v2285_v0 }
0x1402   : > { %v2294_v3 = vpack.c.bf16 %v5526_v2, %v5524_v31 }
0x1404   : > { %4588 = vmatmul.mubr.msk.bf16.vlgmr.msra.gmra.mrb[52].mxu0 %vm770_vm0, %v2294_v3 }
0x1405   : > { %4605 = vmatprep.mubr.msk.bf16.mxu0 %vm4989_vm1, %v4988_v12  ;;  %4604 = vmatpush3.bf16.xpose.msra.mxu0 %v2478_v11 }
0x1406   : > { %4615 = vmatprep.subr.bf16.mxu0 %v4988_v12 }
0x14d7   : > { %v2371_v13 = vpop.f32.mrb[52].mxu0 }
0x14d8   : > { %v2372_v14 = vadd.f32 %v4254_v32, %v2371_v13  ;;  %v4589_v62 = vpop.f32.mrb[53].mxu0  ;;  %v2462_v13 = vld [vmem:[%s5874_s12] sm:$0xf] }
0x14d9   : > { %v2374_v15 = vpop.f32.mrb[54].mxu0  ;;  %v2463_v62 = vld [vmem:[%s5874_s12 + $0x4] sm:$0xf] }
0x14da   : > { %v2375_v16 = vadd.f32 %v4254_v32, %v2374_v15  ;;  %v4590_v17 = vpop.f32.mrb[55].mxu0  ;;  %v2470_v19 = vmul.f32 0.35355338, %v2372_v14  ;;  %v2769_v14 = vsel %vm1095_vm8, %v2462_v13, 0  ;;  %v2722_v15 = vsel %vm1095_vm8, %v2463_v62, 0 }
0x14dc   : > { %v2471_v20 = vmul.f32 0.35355338, %v2375_v16 }
0x14de   : > { %v5546_v21 = vpack.c.bf16 %v2471_v20, %v2470_v19 }
0x14e0   : > { %2596 = vrot.lane.b32.xlu0 %v5546_v21, %s4991_s30  ;;  %4606 = vmatmul.mubr.msk.bf16.vlgmr.msra.gmra.mrb[56].mxu0 %vm840_vm3, %v5546_v21  ;;  %s5925_s30 = smov 64  }
0x14e1   : > { %4616 = vmatpush3.bf16.xpose.msra.mxu0 %v2604_v22  ;;  %4617 = vmatprep.mubr.msk.bf16.mxu0 %vm4989_vm1, %v4988_v12 }
0x14e2   : > { %4627 = vmatprep.subr.bf16.mxu0 %v4988_v12 }
0x1552   : > { %v2597_v23 = vpop.permute.xlu0 %2596 }
0x1553   : > { %4618 = vmatmul.mubr.msk.bf16.vlgmr.msra.gmra.mrb[60].mxu0 %vm840_vm3, %v2597_v23 }
0x1554   : > { %4629 = vmatprep.mubr.msk.bf16.mxu0 %vm4989_vm1, %v4988_v12  ;;  %4628 = vmatpush3.bf16.msra.mxu0 %v2722_v15 }
0x1555   : > { %4639 = vmatprep.subr.bf16.mxu0 %v4988_v12 }
0x15b3   : > { %v2514_v24 = vpop.f32.mrb[56].mxu0 }
0x15b4   : > { %v4607_v30 = vpop.f32.mrb[57].mxu0  ;;  %v2522_v25 = vsel %vm2521_vm10, %v2514_v24, -inf }
0x15b5   : > { %2523 = vmax.xlane.f32.xlu0 %v2522_v25  ;;  %v2517_v26 = vpop.f32.mrb[58].mxu0 }
0x15b6   : > { %v4608_v27 = vpop.f32.mrb[59].mxu0  ;;  %v2526_v28 = vsel %vm2525_vm11, %v2517_v26, -inf }
0x15b7   : > { %2527 = vmax.xlane.f32.xlu1 %v2526_v28 }
0x1626   : > { %v2640_v29 = vpop.f32.mrb[60].mxu0 }
0x1627   : > { %v4619_v33 = vpop.f32.mrb[61].mxu0  ;;  %v2647_v34 = vsel %vm2521_vm10, %v2640_v29, -inf }
0x1628   : > { %2648 = vmax.xlane.f32.xlu0 %v2647_v34  ;;  %v2643_v35 = vpop.f32.mrb[62].mxu0 }
0x1629   : > { %v4620_v36 = vpop.f32.mrb[63].mxu0  ;;  %v2650_v37 = vsel %vm2525_vm11, %v2643_v35, -inf }
0x162c   : > { %2651 = vmax.xlane.f32.xlu0 %v2650_v37 }
0x1642   : > { %v2524_v38 = vpop.xlane.xlu0 %2523 }
0x1643   : > { %v2529_v39 = vsub.f32 %v2514_v24, %v2524_v38 }
0x1644   : > { %v2528_v40 = vpop.xlane.xlu1 %2527 }
0x1645   : > { %v2531_v42 = vmul.f32 1.442695, %v2529_v39  ;;  %v2530_v44 = vsub.f32 %v2517_v26, %v2528_v40 }
0x1647   : > { %4905 = vpow2.f32 %v2531_v42  ;;  %v2533_v45 = vmul.f32 1.442695, %v2530_v44 }
0x1649   : > { %4907 = vpow2.f32 %v2533_v45 }
0x1651   : > { %v4906_v46 = vpop.eup %4905 }
0x1652   : > { %v2535_v47 = vsel %vm2521_vm10, %v4906_v46, 0.0 }
0x1653   : > { %v4908_v48 = vpop.eup %4907  ;;  %2536 = vadd.xlane.f32.xlu0 %v2535_v47 }
0x1654   : > { %v2538_v49 = vsel %vm2525_vm11, %v4908_v48, 0.0 }
0x1657   : > { %2539 = vadd.xlane.f32.xlu0 %v2538_v49 }
0x16b5   : > { %v2649_v50 = vpop.xlane.xlu0 %2648 }
0x16b6   : > { %v2653_v51 = vsub.f32 %v2640_v29, %v2649_v50 }
0x16b8   : > { %v2655_v41 = vmul.f32 1.442695, %v2653_v51 }
0x16b9   : > { %v2652_v52 = vpop.xlane.xlu0 %2651 }
0x16ba   : > { %4909 = vpow2.f32 %v2655_v41  ;;  %v2654_v53 = vsub.f32 %v2643_v35, %v2652_v52 }
0x16bc   : > { %v2657_v54 = vmul.f32 1.442695, %v2654_v53 }
0x16be   : > { %4911 = vpow2.f32 %v2657_v54 }
0x16c4   : > { %v4910_v43 = vpop.eup %4909 }
0x16c5   : > { %v2659_v55 = vsel %vm2521_vm10, %v4910_v43, 0.0 }
0x16c6   : > { %2660 = vadd.xlane.f32.xlu1 %v2659_v55 }
0x16c8   : > { %v4912_v56 = vpop.eup %4911 }
0x16c9   : > { %v2662_v57 = vsel %vm2525_vm11, %v4912_v56, 0.0 }
0x16ca   : > { %2663 = vadd.xlane.f32.xlu0 %v2662_v57 }
0x16d7   : > { %2547 = vrot.lane.b32.xlu1 %v5536_v59, %s5925_s30  ;;  %s5930_s30 = smov 96  }
0x16db   : > { %2814 = vrot.lane.b32.xlu1 %v5536_v59, %s5926_s24 }
0x16df   : > { %2812 = vrot.lane.b32.xlu1 %v5546_v21, %s5926_s24  ;;  %s5931_s24 = smov 40  }
0x16e0   : > { %2670 = vrot.lane.b32.xlu0 %v5536_v59, %s5927_s29  ;;  %v2537_v58 = vpop.xlane.xlu0 %2536  ;;  %s5937_s29 = smov 72  }
0x16e4   : > { %v2540_v60 = vpop.xlane.xlu0 %2539 }
0x16e5   : > { %4913 = vrcp.f32 %v2540_v60 }
0x16e6   : > { %4915 = vrcp.f32 %v2537_v58 }
0x16ef   : > { %v4914_v61 = vpop.eup %4913 }
0x16f0   : > { %v4916_v1 = vpop.eup %4915  ;;  %v2544_v0 = vmul.f32 %v4914_v61, %v4908_v48 }
0x16f1   : > { %v2543_v3 = vmul.f32 %v4916_v1, %v4906_v46 }
0x16f3   : > { %v2545_v6 = vpack.c.bf16 %v2544_v0, %v2543_v3 }
0x1753   : > { %v2661_v63 = vpop.xlane.xlu1 %2660 }
0x1754   : > { %4917 = vrcp.f32 %v2661_v63 }
0x1757   : > { %v2548_v4 = vpop.permute.xlu1 %2547  ;;  %v2664_v5 = vpop.xlane.xlu0 %2663 }
0x1758   : > { %4919 = vrcp.f32 %v2664_v5  ;;  %4610 = vmatpush3.bf16.msra.mxu1 %v2548_v4 }
0x1759   : > { %4621 = vmatprep.subr.bf16.mxu1 %v4988_v12 }
0x175b   : > { %4612 = vmatmul.mubr.msk.bf16.vlgmr.msra.gmra.mrb[52].mxu1 %vm2521_vm10, %v2545_v6  ;;  %v2671_v7 = vpop.permute.xlu0 %2670  ;;  %v2815_v24 = vpop.permute.xlu1 %2814 }
0x175c   : > { %4622 = vmatpush3.bf16.msra.mxu1 %v2671_v7  ;;  %4623 = vmatprep.mubr.msk.bf16.mxu1 %vm4989_vm1, %v4988_v12  ;;  %v2820_v27 = vsel %vm840_vm3, %v2815_v24, 0 }
0x175d   : > { %4633 = vmatprep.subr.bf16.mxu1 %v4988_v12 }
0x175e   : > { %v4918_v8 = vpop.eup %4917 }
0x175f   : > { %v2667_v10 = vmul.f32 %v4918_v8, %v4910_v43  ;;  %v2813_v28 = vpop.permute.xlu1 %2812  ;;  %v2464_v8 = vld [vmem:[%s5874_s12 + $0x8] sm:$0xf] }
0x1762   : > { %v4920_v9 = vpop.eup %4919 }
0x1763   : > { %v2668_v11 = vmul.f32 %v4920_v9, %v4912_v56  ;;  %v2938_v9 = vsel %vm1095_vm8, %v2464_v8, 0 }
0x1765   : > { %v2669_v32 = vpack.c.bf16 %v2668_v11, %v2667_v10 }
0x1767   : > { %4624 = vmatmul.mubr.msk.bf16.vlgmr.msra.gmra.mrb[56].mxu1 %vm2521_vm10, %v2669_v32 }
0x1768   : > { %4635 = vmatprep.mubr.msk.bf16.mxu1 %vm4989_vm1, %v4988_v12  ;;  %4634 = vmatpush3.bf16.msra.mxu1 %v2769_v14 }
0x1769   : > { %4645 = vmatprep.subr.bf16.mxu1 %v4988_v12 }
0x182e   : > { %v2587_v16 = vpop.f32.mrb[52].mxu1 }
0x182f   : > { %v4613_v17 = vpop.f32.mrb[53].mxu1 }
0x1830   : > { %v2590_v18 = vpop.f32.mrb[54].mxu1 }
0x1831   : > { %v2594_v19 = vpack.c.bf16 %v2590_v18, %v2587_v16  ;;  %v4614_v20 = vpop.f32.mrb[55].mxu1 }
0x1833   : > { %4636 = vmatmul.mubr.msk.bf16.vlgmr.msra.gmra.mrb[60].mxu1 %vm840_vm3, %v2594_v19 }
0x1834   : > { %4647 = vmatprep.mubr.msk.bf16.mxu1 %vm4989_vm1, %v4988_v12 }
0x183a   : > { %v2710_v22 = vpop.f32.mrb[56].mxu1 }
0x183b   : > { %v4625_v23 = vpop.f32.mrb[57].mxu1 }
0x183c   : > { %v2713_v30 = vpop.f32.mrb[58].mxu1 }
0x183d   : > { %v2717_v25 = vpack.c.bf16 %v2713_v30, %v2710_v22  ;;  %v4626_v26 = vpop.f32.mrb[59].mxu1 }
0x183f   : > { %4630 = vmatmul.mubr.msk.bf16.vlgmr.msra.gmra.mrb[64].mxu0 %vm840_vm3, %v2717_v25 }
0x1840   : > { %4640 = vmatpush3.bf16.xpose.msra.mxu0 %v2820_v27  ;;  %4641 = vmatprep.mubr.msk.bf16.mxu0 %vm4989_vm1, %v4988_v12 }
0x1841   : > { %4651 = vmatprep.subr.bf16.mxu0 %v4988_v12 }
0x1847   : > { %4642 = vmatmul.mubr.msk.bf16.vlgmr.msra.gmra.mrb[68].mxu0 %vm840_vm3, %v2813_v28 }
0x1848   : > { %4653 = vmatprep.mubr.msk.bf16.mxu0 %vm4989_vm1, %v4988_v12  ;;  %4652 = vmatpush3.bf16.msra.mxu0 %v2938_v9 }
0x1849   : > { %4663 = vmatprep.subr.bf16.mxu0 %v4988_v12 }
0x1906   : > { %v2805_v29 = vpop.f32.mrb[60].mxu1 }
0x1907   : > { %v4637_v33 = vpop.f32.mrb[61].mxu1 }
0x1908   : > { %v2808_v34 = vpop.f32.mrb[62].mxu1 }
0x1909   : > { %v4638_v35 = vpop.f32.mrb[63].mxu1 }
0x1912   : > { %v2758_v36 = vpop.f32.mrb[64].mxu0 }
0x1913   : > { %v5604_v37 = vadd.f32 %v2805_v29, %v2758_v36  ;;  %v4631_v38 = vpop.f32.mrb[65].mxu0 }
0x1914   : > { %v2761_v39 = vpop.f32.mrb[66].mxu0 }
0x1915   : > { %v5606_v40 = vadd.f32 %v2808_v34, %v2761_v39  ;;  %v4632_v42 = vpop.f32.mrb[67].mxu0 }
0x191a   : > { %v2856_v44 = vpop.f32.mrb[68].mxu0 }
0x191b   : > { %v4643_v45 = vpop.f32.mrb[69].mxu0  ;;  %v2863_v46 = vsel %vm2521_vm10, %v2856_v44, -inf }
0x191c   : > { %2864 = vmax.xlane.f32.xlu0 %v2863_v46  ;;  %v2859_v47 = vpop.f32.mrb[70].mxu0 }
0x191d   : > { %v4644_v48 = vpop.f32.mrb[71].mxu0  ;;  %v2866_v49 = vsel %vm2525_vm11, %v2859_v47, -inf }
0x191e   : > { %2867 = vmax.xlane.f32.xlu1 %v2866_v49 }
0x192f   : > { %2886 = vrot.lane.b32.xlu1 %v5536_v59, %s5928_s28 }
0x1933   : > { %2983 = vrot.lane.b32.xlu1 %v5546_v21, %s5929_s0 }
0x19a9   : > { %v2865_v50 = vpop.xlane.xlu0 %2864 }
0x19aa   : > { %v2869_v51 = vsub.f32 %v2856_v44, %v2865_v50 }
0x19ab   : > { %v2868_v41 = vpop.xlane.xlu1 %2867 }
0x19ac   : > { %v2871_v52 = vmul.f32 1.442695, %v2869_v51  ;;  %v2870_v53 = vsub.f32 %v2859_v47, %v2868_v41  ;;  %v2465_v41 = vld [vmem:[%s5874_s12 + $0xc] sm:$0xf] }
0x19ae   : > { %4921 = vpow2.f32 %v2871_v52  ;;  %v2873_v54 = vmul.f32 1.442695, %v2870_v53  ;;  %v3109_v52 = vsel %vm1095_vm8, %v2465_v41, 0 }
0x19af   : > { %v2887_v43 = vpop.permute.xlu1 %2886 }
0x19b0   : > { %4923 = vpow2.f32 %v2873_v54  ;;  %4646 = vmatpush3.bf16.msra.mxu1 %v2887_v43 }
0x19b1   : > { %4657 = vmatprep.subr.bf16.mxu1 %v4988_v12 }
0x19b3   : > { %v2984_v7 = vpop.permute.xlu1 %2983 }
0x19b8   : > { %v4922_v55 = vpop.eup %4921 }
0x19b9   : > { %v2875_v56 = vsel %vm2521_vm10, %v4922_v55, 0.0 }
0x19ba   : > { %v4924_v57 = vpop.eup %4923  ;;  %2876 = vadd.xlane.f32.xlu0 %v2875_v56 }
0x19bb   : > { %v2878_v58 = vsel %vm2525_vm11, %v4924_v57, 0.0 }
0x19be   : > { %2879 = vadd.xlane.f32.xlu0 %v2878_v58 }
0x19d4   : > { %2985 = vrot.lane.b32.xlu0 %v5536_v59, %s5929_s0  ;;  %s5934_s0 = smov 80  }
0x1a47   : > { %v2877_v60 = vpop.xlane.xlu0 %2876 }
0x1a48   : > { %4925 = vrcp.f32 %v2877_v60 }
0x1a4b   : > { %v2880_v61 = vpop.xlane.xlu0 %2879 }
0x1a4c   : > { %4927 = vrcp.f32 %v2880_v61 }
0x1a4f   : > { %v2986_v4 = vpop.permute.xlu0 %2985 }
0x1a50   : > { %v2991_v6 = vsel %vm840_vm3, %v2986_v4, 0 }
0x1a52   : > { %v4926_v63 = vpop.eup %4925 }
0x1a53   : > { %v2883_v0 = vmul.f32 %v4926_v63, %v4922_v55 }
0x1a56   : > { %v4928_v1 = vpop.eup %4927 }
0x1a57   : > { %v2884_v3 = vmul.f32 %v4928_v1, %v4924_v57 }
0x1a59   : > { %v2885_v5 = vpack.c.bf16 %v2884_v3, %v2883_v0 }
0x1a5b   : > { %4648 = vmatmul.mubr.msk.bf16.vlgmr.msra.gmra.mrb[64].mxu1 %vm2521_vm10, %v2885_v5 }
0x1a5c   : > { %4658 = vmatpush3.bf16.xpose.msra.mxu1 %v2991_v6  ;;  %4659 = vmatprep.mubr.msk.bf16.mxu1 %vm4989_vm1, %v4988_v12 }
0x1a5d   : > { %4669 = vmatprep.subr.bf16.mxu1 %v4988_v12 }
0x1a63   : > { %4660 = vmatmul.mubr.msk.bf16.vlgmr.msra.gmra.mrb[68].mxu1 %vm840_vm3, %v2984_v7 }
0x1a64   : > { %4671 = vmatprep.mubr.msk.bf16.mxu1 %vm4989_vm1, %v4988_v12  ;;  %4670 = vmatpush3.bf16.msra.mxu1 %v3109_v52 }
0x1a65   : > { %4681 = vmatprep.subr.bf16.mxu1 %v4988_v12 }
0x1b2e   : > { %v2926_v10 = vpop.f32.mrb[64].mxu1 }
0x1b2f   : > { %v4649_v11 = vpop.f32.mrb[65].mxu1 }
0x1b30   : > { %v2929_v32 = vpop.f32.mrb[66].mxu1 }
0x1b31   : > { %v2933_v13 = vpack.c.bf16 %v2929_v32, %v2926_v10  ;;  %v4650_v14 = vpop.f32.mrb[67].mxu1 }
0x1b33   : > { %4654 = vmatmul.mubr.msk.bf16.vlgmr.msra.gmra.mrb[72].mxu0 %vm840_vm3, %v2933_v13 }
0x1b34   : > { %4665 = vmatprep.mubr.msk.bf16.mxu0 %vm4989_vm1, %v4988_v12 }
0x1b36   : > { %v3027_v62 = vpop.f32.mrb[68].mxu1 }
0x1b37   : > { %v4661_v15 = vpop.f32.mrb[69].mxu1  ;;  %v3034_v16 = vsel %vm2521_vm10, %v3027_v62, -inf }
0x1b38   : > { %3035 = vmax.xlane.f32.xlu1 %v3034_v16  ;;  %v3030_v17 = vpop.f32.mrb[70].mxu1 }
0x1b39   : > { %v4662_v18 = vpop.f32.mrb[71].mxu1  ;;  %v3037_v19 = vsel %vm2525_vm11, %v3030_v17, -inf }
0x1b3a   : > { %3038 = vmax.xlane.f32.xlu0 %v3037_v19 }
0x1bc5   : > { %v3036_v20 = vpop.xlane.xlu1 %3035 }
0x1bc6   : > { %v3040_v22 = vsub.f32 %v3027_v62, %v3036_v20 }
0x1bc7   : > { %v3039_v23 = vpop.xlane.xlu0 %3038 }
0x1bc8   : > { %v3042_v24 = vmul.f32 1.442695, %v3040_v22  ;;  %v3041_v30 = vsub.f32 %v3030_v17, %v3039_v23 }
0x1bca   : > { %4929 = vpow2.f32 %v3042_v24  ;;  %v3044_v25 = vmul.f32 1.442695, %v3041_v30 }
0x1bcc   : > { %4931 = vpow2.f32 %v3044_v25 }
0x1bd4   : > { %v4930_v26 = vpop.eup %4929 }
0x1bd5   : > { %v3046_v27 = vsel %vm2521_vm10, %v4930_v26, 0.0 }
0x1bd6   : > { %v4932_v28 = vpop.eup %4931  ;;  %3047 = vadd.xlane.f32.xlu0 %v3046_v27 }
0x1bd7   : > { %v3049_v29 = vsel %vm2525_vm11, %v4932_v28, 0.0 }
0x1bd8   : > { %3050 = vadd.xlane.f32.xlu1 %v3049_v29 }
0x1be9   : > { %3156 = vrot.lane.b32.xlu1 %v5536_v59, %s5930_s30 }
0x1bec   : > { %3057 = vrot.lane.b32.xlu0 %v5536_v59, %s5931_s24  ;;  %s5936_s24 = smov 16  }
0x1bed   : > { %3154 = vrot.lane.b32.xlu1 %v5546_v21, %s5930_s30 }
0x1c06   : > { %v2974_v33 = vpop.f32.mrb[72].mxu0 }
0x1c07   : > { %v5646_v34 = vadd.f32 %v2974_v33, %v5604_v37  ;;  %v4655_v35 = vpop.f32.mrb[73].mxu0 }
0x1c08   : > { %v2977_v36 = vpop.f32.mrb[74].mxu0 }
0x1c09   : > { %v5649_v38 = vadd.f32 %v2977_v36, %v5606_v40  ;;  %v4656_v39 = vpop.f32.mrb[75].mxu0 }
0x1c63   : > { %v3048_v42 = vpop.xlane.xlu0 %3047 }
0x1c64   : > { %4933 = vrcp.f32 %v3048_v42 }
0x1c65   : > { %v3051_v44 = vpop.xlane.xlu1 %3050 }
0x1c66   : > { %4935 = vrcp.f32 %v3051_v44 }
0x1c67   : > { %v3058_v45 = vpop.permute.xlu0 %3057 }
0x1c68   : > { %4664 = vmatpush3.bf16.msra.mxu0 %v3058_v45 }
0x1c69   : > { %4675 = vmatprep.subr.bf16.mxu0 %v4988_v12  ;;  %v3157_v37 = vpop.permute.xlu1 %3156 }
0x1c6a   : > { %v3162_v51 = vsel %vm840_vm3, %v3157_v37, 0 }
0x1c6d   : > { %v3155_v40 = vpop.permute.xlu1 %3154 }
0x1c6e   : > { %v4934_v46 = vpop.eup %4933 }
0x1c6f   : > { %v3054_v48 = vmul.f32 %v4934_v46, %v4930_v26 }
0x1c70   : > { %v4936_v47 = vpop.eup %4935 }
0x1c71   : > { %v3055_v49 = vmul.f32 %v4936_v47, %v4932_v28  ;;  %v2466_v28 = vld [vmem:[%s5874_s12 + $0x10] sm:$0xf] }
0x1c72   : > { %v3280_v29 = vsel %vm1095_vm8, %v2466_v28, 0 }
0x1c73   : > { %v3056_v50 = vpack.c.bf16 %v3055_v49, %v3054_v48 }
0x1c75   : > { %4666 = vmatmul.mubr.msk.bf16.vlgmr.msra.gmra.mrb[76].mxu0 %vm2521_vm10, %v3056_v50 }
0x1c76   : > { %4676 = vmatpush3.bf16.xpose.msra.mxu0 %v3162_v51  ;;  %4677 = vmatprep.mubr.msk.bf16.mxu0 %vm4989_vm1, %v4988_v12 }
0x1c77   : > { %4687 = vmatprep.subr.bf16.mxu0 %v4988_v12 }
0x1c7d   : > { %4678 = vmatmul.mubr.msk.bf16.vlgmr.msra.gmra.mrb[80].mxu0 %vm840_vm3, %v3155_v40 }
0x1c7e   : > { %4689 = vmatprep.mubr.msk.bf16.mxu0 %vm4989_vm1, %v4988_v12  ;;  %4688 = vmatpush3.bf16.msra.mxu0 %v3280_v29 }
0x1c7f   : > { %4699 = vmatprep.subr.bf16.mxu0 %v4988_v12 }
0x1d48   : > { %v3097_v53 = vpop.f32.mrb[76].mxu0 }
0x1d49   : > { %v4667_v54 = vpop.f32.mrb[77].mxu0 }
0x1d4a   : > { %v3100_v43 = vpop.f32.mrb[78].mxu0 }
0x1d4b   : > { %v3104_v55 = vpack.c.bf16 %v3100_v43, %v3097_v53  ;;  %v4668_v56 = vpop.f32.mrb[79].mxu0 }
0x1d4d   : > { %4672 = vmatmul.mubr.msk.bf16.vlgmr.msra.gmra.mrb[72].mxu1 %vm840_vm3, %v3104_v55 }
0x1d4e   : > { %4683 = vmatprep.mubr.msk.bf16.mxu1 %vm4989_vm1, %v4988_v12 }
0x1d50   : > { %v3198_v57 = vpop.f32.mrb[80].mxu0 }
0x1d51   : > { %v4679_v58 = vpop.f32.mrb[81].mxu0  ;;  %v3205_v60 = vsel %vm2521_vm10, %v3198_v57, -inf }
0x1d52   : > { %3206 = vmax.xlane.f32.xlu0 %v3205_v60  ;;  %v3201_v61 = vpop.f32.mrb[82].mxu0 }
0x1d53   : > { %v4680_v63 = vpop.f32.mrb[83].mxu0  ;;  %v3208_v1 = vsel %vm2525_vm11, %v3201_v61, -inf }
0x1d54   : > { %3209 = vmax.xlane.f32.xlu1 %v3208_v1 }
0x1d65   : > { %3228 = vrot.lane.b32.xlu1 %v5536_v59, %s5932_s25  ;;  %s703_s25 = scalar_lea.vmem %s5884_s22, %s5143_s2 }
0x1d69   : > { %3325 = vrot.lane.b32.xlu1 %v5546_v21, %s5933_s5 }
0x1ddf   : > { %v3207_v0 = vpop.xlane.xlu0 %3206 }
0x1de0   : > { %v3211_v3 = vsub.f32 %v3198_v57, %v3207_v0 }
0x1de1   : > { %v3210_v4 = vpop.xlane.xlu1 %3209 }
0x1de2   : > { %v3213_v5 = vmul.f32 1.442695, %v3211_v3  ;;  %v3212_v6 = vsub.f32 %v3201_v61, %v3210_v4 }
0x1de4   : > { %4937 = vpow2.f32 %v3213_v5  ;;  %v3215_v7 = vmul.f32 1.442695, %v3212_v6 }
0x1de5   : > { %v3229_v8 = vpop.permute.xlu1 %3228 }
0x1de6   : > { %4939 = vpow2.f32 %v3215_v7  ;;  %4682 = vmatpush3.bf16.msra.mxu1 %v3229_v8 }
0x1de7   : > { %4693 = vmatprep.subr.bf16.mxu1 %v4988_v12 }
0x1de9   : > { %v3326_v27 = vpop.permute.xlu1 %3325 }
0x1dee   : > { %v4938_v9 = vpop.eup %4937 }
0x1def   : > { %v3217_v10 = vsel %vm2521_vm10, %v4938_v9, 0.0 }
0x1df0   : > { %v4940_v11 = vpop.eup %4939  ;;  %3218 = vadd.xlane.f32.xlu0 %v3217_v10  ;;  %v2467_v10 = vld [vmem:[%s5874_s12 + $0x14] sm:$0xf] }
0x1df1   : > { %v3220_v32 = vsel %vm2525_vm11, %v4940_v11, 0.0 }
0x1df4   : > { %3221 = vadd.xlane.f32.xlu0 %v3220_v32 }
0x1e0a   : > { %3327 = vrot.lane.b32.xlu0 %v5536_v59, %s5933_s5  ;;  %s5938_s5 = smov 8  }
0x1e20   : > { %v3145_v13 = vpop.f32.mrb[72].mxu1 }
0x1e21   : > { %v3152_v14 = vadd.f32 %v3145_v13, %v5646_v34  ;;  %v4673_v62 = vpop.f32.mrb[73].mxu1 }
0x1e22   : > { %v3148_v15 = vpop.f32.mrb[74].mxu1 }
0x1e23   : > { %v3153_v16 = vadd.f32 %v3148_v15, %v5649_v38  ;;  %v4674_v17 = vpop.f32.mrb[75].mxu1 }
0x1e7d   : > { %v3219_v18 = vpop.xlane.xlu0 %3218 }
0x1e7e   : > { %4941 = vrcp.f32 %v3219_v18 }
0x1e81   : > { %v3222_v19 = vpop.xlane.xlu0 %3221 }
0x1e82   : > { %4943 = vrcp.f32 %v3222_v19 }
0x1e85   : > { %v3328_v30 = vpop.permute.xlu0 %3327 }
0x1e86   : > { %v3333_v26 = vsel %vm840_vm3, %v3328_v30, 0 }
0x1e88   : > { %v4942_v20 = vpop.eup %4941 }
0x1e89   : > { %v3225_v23 = vmul.f32 %v4942_v20, %v4938_v9 }
0x1e8c   : > { %v4944_v22 = vpop.eup %4943 }
0x1e8d   : > { %v3226_v24 = vmul.f32 %v4944_v22, %v4940_v11  ;;  %v3451_v11 = vsel %vm1095_vm8, %v2467_v10, 0 }
0x1e8f   : > { %v3227_v25 = vpack.c.bf16 %v3226_v24, %v3225_v23 }
0x1e91   : > { %4684 = vmatmul.mubr.msk.bf16.vlgmr.msra.gmra.mrb[76].mxu1 %vm2521_vm10, %v3227_v25 }
0x1e92   : > { %4694 = vmatpush3.bf16.xpose.msra.mxu1 %v3333_v26  ;;  %4695 = vmatprep.mubr.msk.bf16.mxu1 %vm4989_vm1, %v4988_v12 }
0x1e93   : > { %4705 = vmatprep.subr.bf16.mxu1 %v4988_v12 }
0x1e99   : > { %4696 = vmatmul.mubr.msk.bf16.vlgmr.msra.gmra.mrb[80].mxu1 %vm840_vm3, %v3326_v27 }
0x1e9a   : > { %4707 = vmatprep.mubr.msk.bf16.mxu1 %vm4989_vm1, %v4988_v12  ;;  %4706 = vmatpush3.bf16.msra.mxu1 %v3451_v11 }
0x1e9b   : > { %4717 = vmatprep.subr.bf16.mxu1 %v4988_v12 }
0x1f64   : > { %v3268_v33 = vpop.f32.mrb[76].mxu1 }
0x1f65   : > { %v4685_v34 = vpop.f32.mrb[77].mxu1 }
0x1f66   : > { %v3271_v35 = vpop.f32.mrb[78].mxu1 }
0x1f67   : > { %v3275_v36 = vpack.c.bf16 %v3271_v35, %v3268_v33  ;;  %v4686_v38 = vpop.f32.mrb[79].mxu1 }
0x1f69   : > { %4690 = vmatmul.mubr.msk.bf16.vlgmr.msra.gmra.mrb[84].mxu0 %vm840_vm3, %v3275_v36 }
0x1f6a   : > { %4701 = vmatprep.mubr.msk.bf16.mxu0 %vm4989_vm1, %v4988_v12 }
0x1f6c   : > { %v3369_v39 = vpop.f32.mrb[80].mxu1 }
0x1f6d   : > { %v4697_v42 = vpop.f32.mrb[81].mxu1  ;;  %v3376_v44 = vsel %vm2521_vm10, %v3369_v39, -inf }
0x1f6e   : > { %3377 = vmax.xlane.f32.xlu1 %v3376_v44  ;;  %v3372_v45 = vpop.f32.mrb[82].mxu1 }
0x1f6f   : > { %v4698_v46 = vpop.f32.mrb[83].mxu1  ;;  %v3379_v47 = vsel %vm2525_vm11, %v3372_v45, -inf }
0x1f70   : > { %3380 = vmax.xlane.f32.xlu0 %v3379_v47 }
0x1ffb   : > { %v3378_v48 = vpop.xlane.xlu1 %3377 }
0x1ffc   : > { %v3382_v49 = vsub.f32 %v3369_v39, %v3378_v48 }
0x1ffd   : > { %v3381_v37 = vpop.xlane.xlu0 %3380 }
0x1ffe   : > { %v3384_v50 = vmul.f32 1.442695, %v3382_v49  ;;  %v3383_v51 = vsub.f32 %v3372_v45, %v3381_v37 }
0x2000   : > { %4945 = vpow2.f32 %v3384_v50  ;;  %v3386_v40 = vmul.f32 1.442695, %v3383_v51 }
0x2002   : > { %4947 = vpow2.f32 %v3386_v40 }
0x200a   : > { %v4946_v41 = vpop.eup %4945 }
0x200b   : > { %v3388_v52 = vsel %vm2521_vm10, %v4946_v41, 0.0 }
0x200c   : > { %v4948_v53 = vpop.eup %4947  ;;  %3389 = vadd.xlane.f32.xlu0 %v3388_v52  ;;  %v2468_v52 = vld [vmem:[%s5874_s12 + $0x18] sm:$0xf] }
0x200d   : > { %v3391_v54 = vsel %vm2525_vm11, %v4948_v53, 0.0 }
0x200e   : > { %3392 = vadd.xlane.f32.xlu1 %v3391_v54 }
0x201f   : > { %3498 = vrot.lane.b32.xlu1 %v5536_v59, %s5934_s0 }
0x2022   : > { %3399 = vrot.lane.b32.xlu0 %v5536_v59, %s5935_s23 }
0x2023   : > { %3496 = vrot.lane.b32.xlu1 %v5546_v21, %s5934_s0 }
0x203c   : > { %v3316_v43 = vpop.f32.mrb[84].mxu0 }
0x203d   : > { %v5707_v55 = vadd.f32 %v3316_v43, %v3152_v14  ;;  %v4691_v56 = vpop.f32.mrb[85].mxu0 }
0x203e   : > { %v3319_v57 = vpop.f32.mrb[86].mxu0 }
0x203f   : > { %v5709_v58 = vadd.f32 %v3319_v57, %v3153_v16  ;;  %v4692_v60 = vpop.f32.mrb[87].mxu0 }
0x2099   : > { %v3390_v61 = vpop.xlane.xlu0 %3389 }
0x209a   : > { %4949 = vrcp.f32 %v3390_v61 }
0x209b   : > { %v3393_v63 = vpop.xlane.xlu1 %3392 }
0x209c   : > { %4951 = vrcp.f32 %v3393_v63 }
0x209d   : > { %v3400_v1 = vpop.permute.xlu0 %3399 }
0x209e   : > { %4700 = vmatpush3.bf16.msra.mxu0 %v3400_v1 }
0x209f   : > { %4711 = vmatprep.subr.bf16.mxu0 %v4988_v12  ;;  %v3499_v6 = vpop.permute.xlu1 %3498 }
0x20a0   : > { %v3504_v8 = vsel %vm840_vm3, %v3499_v6, 0 }
0x20a3   : > { %v3497_v9 = vpop.permute.xlu1 %3496 }
0x20a4   : > { %v4950_v0 = vpop.eup %4949 }
0x20a5   : > { %v3396_v4 = vmul.f32 %v4950_v0, %v4946_v41 }
0x20a6   : > { %v4952_v3 = vpop.eup %4951 }
0x20a7   : > { %v3397_v5 = vmul.f32 %v4952_v3, %v4948_v53  ;;  %v3622_v53 = vsel %vm1095_vm8, %v2468_v52, 0 }
0x20a9   : > { %v3398_v7 = vpack.c.bf16 %v3397_v5, %v3396_v4 }
0x20ab   : > { %4702 = vmatmul.mubr.msk.bf16.vlgmr.msra.gmra.mrb[88].mxu0 %vm2521_vm10, %v3398_v7 }
0x20ac   : > { %4712 = vmatpush3.bf16.xpose.msra.mxu0 %v3504_v8  ;;  %4713 = vmatprep.mubr.msk.bf16.mxu0 %vm4989_vm1, %v4988_v12 }
0x20ad   : > { %4723 = vmatprep.subr.bf16.mxu0 %v4988_v12 }
0x20b3   : > { %4714 = vmatmul.mubr.msk.bf16.vlgmr.msra.gmra.mrb[92].mxu0 %vm840_vm3, %v3497_v9 }
0x20b4   : > { %4725 = vmatprep.mubr.msk.bf16.mxu0 %vm4989_vm1, %v4988_v12  ;;  %4724 = vmatpush3.bf16.msra.mxu0 %v3622_v53 }
0x20b5   : > { %4735 = vmatprep.subr.bf16.mxu0 %v4988_v12 }
0x217e   : > { %v3439_v32 = vpop.f32.mrb[88].mxu0 }
0x217f   : > { %v4703_v13 = vpop.f32.mrb[89].mxu0 }
0x2180   : > { %v3442_v14 = vpop.f32.mrb[90].mxu0  ;;  %v2469_v13 = vld [vmem:[%s5874_s12 + $0x1c] sm:$0xf] }
0x2181   : > { %v3446_v62 = vpack.c.bf16 %v3442_v14, %v3439_v32  ;;  %v4704_v15 = vpop.f32.mrb[91].mxu0  ;;  %v3793_v14 = vsel %vm1095_vm8, %v2469_v13, 0 }
0x2183   : > { %4708 = vmatmul.mubr.msk.bf16.vlgmr.msra.gmra.mrb[84].mxu1 %vm840_vm3, %v3446_v62 }
0x2184   : > { %4719 = vmatprep.mubr.msk.bf16.mxu1 %vm4989_vm1, %v4988_v12 }
0x2186   : > { %v3540_v16 = vpop.f32.mrb[92].mxu0 }
0x2187   : > { %v4715_v17 = vpop.f32.mrb[93].mxu0  ;;  %v3547_v18 = vsel %vm2521_vm10, %v3540_v16, -inf }
0x2188   : > { %3548 = vmax.xlane.f32.xlu0 %v3547_v18  ;;  %v3543_v19 = vpop.f32.mrb[94].mxu0 }
0x2189   : > { %v4716_v20 = vpop.f32.mrb[95].mxu0  ;;  %v3550_v22 = vsel %vm2525_vm11, %v3543_v19, -inf }
0x218a   : > { %3551 = vmax.xlane.f32.xlu1 %v3550_v22 }
0x219b   : > { %3570 = vrot.lane.b32.xlu1 %v5536_v59, %s5936_s24 }
0x219f   : > { %3667 = vrot.lane.b32.xlu1 %v5546_v21, %s5937_s29 }
0x2215   : > { %v3549_v23 = vpop.xlane.xlu0 %3548 }
0x2216   : > { %v3553_v24 = vsub.f32 %v3540_v16, %v3549_v23 }
0x2217   : > { %v3552_v30 = vpop.xlane.xlu1 %3551 }
0x2218   : > { %v3555_v25 = vmul.f32 1.442695, %v3553_v24  ;;  %v3554_v26 = vsub.f32 %v3543_v19, %v3552_v30 }
0x221a   : > { %4953 = vpow2.f32 %v3555_v25  ;;  %v3557_v27 = vmul.f32 1.442695, %v3554_v26 }
0x221b   : > { %v3571_v28 = vpop.permute.xlu1 %3570 }
0x221c   : > { %4955 = vpow2.f32 %v3557_v27  ;;  %4718 = vmatpush3.bf16.msra.mxu1 %v3571_v28 }
0x221d   : > { %4729 = vmatprep.subr.bf16.mxu1 %v4988_v12 }
0x221f   : > { %v3668_v41 = vpop.permute.xlu1 %3667 }
0x2224   : > { %v4954_v29 = vpop.eup %4953 }
0x2225   : > { %v3559_v33 = vsel %vm2521_vm10, %v4954_v29, 0.0 }
0x2226   : > { %v4956_v34 = vpop.eup %4955  ;;  %3560 = vadd.xlane.f32.xlu0 %v3559_v33 }
0x2227   : > { %v3562_v35 = vsel %vm2525_vm11, %v4956_v34, 0.0 }
0x222a   : > { %3563 = vadd.xlane.f32.xlu0 %v3562_v35 }
0x2240   : > { %3669 = vrot.lane.b32.xlu0 %v5536_v59, %s5937_s29 }
0x2256   : > { %v3487_v21 = vpop.f32.mrb[84].mxu1 }
0x2257   : > { %v3494_v36 = vadd.f32 %v3487_v21, %v5707_v55  ;;  %v4709_v38 = vpop.f32.mrb[85].mxu1 }
0x2258   : > { %v3490_v39 = vpop.f32.mrb[86].mxu1 }
0x2259   : > { %v3495_v42 = vadd.f32 %v3490_v39, %v5709_v58  ;;  %v4710_v44 = vpop.f32.mrb[87].mxu1  ;;  %v4290_v39 = vld [vmem:[%s5875_s13] ss:$0 sm:$0xff] }
0x22b3   : > { %v3561_v45 = vpop.xlane.xlu0 %3560 }
0x22b4   : > { %4957 = vrcp.f32 %v3561_v45 }
0x22b7   : > { %v3564_v46 = vpop.xlane.xlu0 %3563 }
0x22b8   : > { %4959 = vrcp.f32 %v3564_v46 }
0x22bb   : > { %v3670_v50 = vpop.permute.xlu0 %3669 }
0x22bc   : > { %v3675_v40 = vsel %vm840_vm3, %v3670_v50, 0 }
0x22be   : > { %v4958_v47 = vpop.eup %4957 }
0x22bf   : > { %v3567_v49 = vmul.f32 %v4958_v47, %v4954_v29 }
0x22c2   : > { %v4960_v48 = vpop.eup %4959 }
0x22c3   : > { %v3568_v37 = vmul.f32 %v4960_v48, %v4956_v34 }
0x22c5   : > { %v3569_v51 = vpack.c.bf16 %v3568_v37, %v3567_v49 }
0x22c7   : > { %4720 = vmatmul.mubr.msk.bf16.vlgmr.msra.gmra.mrb[88].mxu1 %vm2521_vm10, %v3569_v51 }
0x22c8   : > { %4730 = vmatpush3.bf16.xpose.msra.mxu1 %v3675_v40  ;;  %4731 = vmatprep.mubr.msk.bf16.mxu1 %vm4989_vm1, %v4988_v12 }
0x22c9   : > { %4741 = vmatprep.subr.bf16.mxu1 %v4988_v12 }
0x22cf   : > { %4732 = vmatmul.mubr.msk.bf16.vlgmr.msra.gmra.mrb[92].mxu1 %vm840_vm3, %v3668_v41 }
0x22d0   : > { %4743 = vmatprep.mubr.msk.bf16.mxu1 %vm4989_vm1, %v4988_v12  ;;  %4742 = vmatpush3.bf16.msra.mxu1 %v3793_v14 }
0x22d1   : > { %4759 = vmatprep.subr.bf16.mxu1 %v4988_v12 }
0x239a   : > { %v3610_v54 = vpop.f32.mrb[88].mxu1 }
0x239b   : > { %v4721_v43 = vpop.f32.mrb[89].mxu1 }
0x239c   : > { %v3613_v55 = vpop.f32.mrb[90].mxu1 }
0x239d   : > { %v3617_v56 = vpack.c.bf16 %v3613_v55, %v3610_v54  ;;  %v4722_v57 = vpop.f32.mrb[91].mxu1  ;;  %v4825_v55 = vld [vmem:[%s5878_s16] sm:$0xff]  }
0x239e   : > { %v4827_v57 = vld [vmem:[%s5878_s16 + $0x10] sm:$0xff]  }
0x239f   : > { %4726 = vmatmul.mubr.msk.bf16.vlgmr.msra.gmra.mrb[96].mxu0 %vm840_vm3, %v3617_v56  ;;  %v4826_v56 = vld [vmem:[%s5878_s16 + $0x8] sm:$0xff]  }
0x23a0   : > { %4737 = vmatprep.mubr.msk.bf16.mxu0 %vm4989_vm1, %v4988_v12 }
0x23a2   : > { %v3711_v58 = vpop.f32.mrb[92].mxu1 }
0x23a3   : > { %v4733_v60 = vpop.f32.mrb[93].mxu1  ;;  %v3718_v61 = vsel %vm2521_vm10, %v3711_v58, -inf }
0x23a4   : > { %3719 = vmax.xlane.f32.xlu1 %v3718_v61  ;;  %v3714_v63 = vpop.f32.mrb[94].mxu1  ;;  %v4829_v60 = vld [vmem:[%s5880_s18] sm:$0xff]   ;;  %v4830_v61 = vld [vmem:[%s5880_s18 + $0x8] sm:$0xff]  }
0x23a5   : > { %v4734_v1 = vpop.f32.mrb[95].mxu1  ;;  %v3721_v0 = vsel %vm2525_vm11, %v3714_v63, -inf }
0x23a6   : > { %3722 = vmax.xlane.f32.xlu0 %v3721_v0  ;;  %v4832_v1 = vld [vmem:[%s5880_s18 + $0x18] sm:$0xff]   ;;  %v4833_v0 = vld [vmem:[%s5880_s18 + $0x20] sm:$0xff]  }
0x2431   : > { %v3720_v3 = vpop.xlane.xlu1 %3719 }
0x2432   : > { %v3724_v4 = vsub.f32 %v3711_v58, %v3720_v3  ;;  %v4828_v58 = vld [vmem:[%s5878_s16 + $0x18] sm:$0xff]   ;;  %v4834_v3 = vld [vmem:[%s5880_s18 + $0x28] sm:$0xff]  }
0x2433   : > { %v3723_v5 = vpop.xlane.xlu0 %3722 }
0x2434   : > { %v3726_v6 = vmul.f32 1.442695, %v3724_v4  ;;  %v3725_v7 = vsub.f32 %v3714_v63, %v3723_v5  ;;  %v4831_v63 = vld [vmem:[%s5880_s18 + $0x10] sm:$0xff]  }
0x2436   : > { %4961 = vpow2.f32 %v3726_v6  ;;  %v3728_v8 = vmul.f32 1.442695, %v3725_v7 }
0x2438   : > { %4963 = vpow2.f32 %v3728_v8 }
0x2440   : > { %v4962_v9 = vpop.eup %4961 }
0x2441   : > { %v3730_v10 = vsel %vm2521_vm10, %v4962_v9, 0.0 }
0x2442   : > { %v4964_v11 = vpop.eup %4963  ;;  %3731 = vadd.xlane.f32.xlu0 %v3730_v10 }
0x2443   : > { %v3733_v32 = vsel %vm2525_vm11, %v4964_v11, 0.0 }
0x2444   : > { %3734 = vadd.xlane.f32.xlu1 %v3733_v32  ;;  %v4291_v32 = vld [vmem:[%s5876_s14] ss:$0 sm:$0xff] }
0x2458   : > { %3741 = vrot.lane.b32.xlu0 %v5536_v59, %s5938_s5 }
0x2472   : > { %v3658_v62 = vpop.f32.mrb[96].mxu0 }
0x2473   : > { %v3665_v15 = vadd.f32 %v3658_v62, %v3494_v36  ;;  %v4727_v16 = vpop.f32.mrb[97].mxu0 }
0x2474   : > { %v3661_v17 = vpop.f32.mrb[98].mxu0 }
0x2475   : > { %v3666_v18 = vadd.f32 %v3661_v17, %v3495_v42  ;;  %v4728_v19 = vpop.f32.mrb[99].mxu0 }
0x24cf   : > { %v3732_v20 = vpop.xlane.xlu0 %3731 }
0x24d0   : > { %4965 = vrcp.f32 %v3732_v20  ;;  %v4835_v20 = vld [vmem:[%s5880_s18 + $0x30] sm:$0xff]  }
0x24d1   : > { %v3735_v22 = vpop.xlane.xlu1 %3734 }
0x24d2   : > { %4967 = vrcp.f32 %v3735_v22  ;;  %v4836_v22 = vld [vmem:[%s5880_s18 + $0x38] sm:$0xff]  }
0x24d3   : > { %v3742_v59 = vpop.permute.xlu0 %3741 }
0x24d4   : > { %4736 = vmatpush3.bf16.msra.mxu0 %v3742_v59  ;;  %v4293_v59 = vld [vmem:[%s5879_s17] ss:$0 sm:$0xff] }
0x24d5   : > { %4747 = vmatprep.subr.bf16.mxu0 %v4988_v12 }
0x24da   : > { %v4966_v23 = vpop.eup %4965 }
0x24db   : > { %v3738_v30 = vmul.f32 %v4966_v23, %v4962_v9 }
0x24dc   : > { %v4968_v24 = vpop.eup %4967 }
0x24dd   : > { %v3739_v25 = vmul.f32 %v4968_v24, %v4964_v11 }
0x24df   : > { %v3740_v26 = vpack.c.bf16 %v3739_v25, %v3738_v30 }
0x24e1   : > { %4738 = vmatmul.mubr.msk.bf16.vlgmr.msra.gmra.mrb[100].mxu0 %vm2521_vm10, %v3740_v26 }
0x24e2   : > { %4755 = vmatprep.mubr.msk.bf16.mxu0 %vm4989_vm1, %v4988_v12  ;;  %4748 = vmatpush3.bf16.msra.mxu0 %v4825_v55 }
0x24e3   : > { %4749 = vmatprep.subr.bf16.mxu0 %v4988_v12 }
0x24e6   : > { %4750 = vmatpush3.bf16.msra.mxu0 %v4826_v56 }
0x24e7   : > { %4751 = vmatprep.subr.bf16.mxu0 %v4988_v12 }
0x24ea   : > { %4752 = vmatpush3.bf16.msra.mxu0 %v4827_v57 }
0x24eb   : > { %4753 = vmatprep.subr.bf16.mxu0 %v4988_v12 }
0x24ee   : > { %4754 = vmatpush3.bf16.msra.mxu0 %v4828_v58  ;;  %v4308_v58 = vld [vmem:[%s5882_s20] ss:$0 sm:$0xff] }
0x25b4   : > { %v3781_v27 = vpop.f32.mrb[100].mxu0 }
0x25b5   : > { %v4739_v28 = vpop.f32.mrb[101].mxu0 }
0x25b6   : > { %v3784_v29 = vpop.f32.mrb[102].mxu0 }
0x25b7   : > { %v3788_v33 = vpack.c.bf16 %v3784_v29, %v3781_v27  ;;  %v4740_v34 = vpop.f32.mrb[103].mxu0 }
0x25b9   : > { %4744 = vmatmul.mubr.msk.bf16.vlgmr.msra.gmra.mrb[96].mxu1 %vm840_vm3, %v3788_v33 }
0x25ba   : > { %4775 = vmatprep.mubr.msk.bf16.mxu1 %vm4989_vm1, %v4988_v12  ;;  %4760 = vmatpush3.bf16.msra.mxu1 %v4829_v60 }
0x25bb   : > { %4761 = vmatprep.subr.bf16.mxu1 %v4988_v12 }
0x25be   : > { %4762 = vmatpush3.bf16.msra.mxu1 %v4830_v61  ;;  %v4309_v61 = vld [vmem:[%s5883_s21] ss:$0 sm:$0xff] }
0x25bf   : > { %4763 = vmatprep.subr.bf16.mxu1 %v4988_v12 }
0x25c2   : > { %4764 = vmatpush3.bf16.msra.mxu1 %v4831_v63 }
0x25c3   : > { %4765 = vmatprep.subr.bf16.mxu1 %v4988_v12 }
0x25c6   : > { %4766 = vmatpush3.bf16.msra.mxu1 %v4832_v1 }
0x25c7   : > { %4767 = vmatprep.subr.bf16.mxu1 %v4988_v12 }
0x25ca   : > { %4768 = vmatpush3.bf16.msra.mxu1 %v4833_v0 }
0x25cb   : > { %4769 = vmatprep.subr.bf16.mxu1 %v4988_v12 }
0x25ce   : > { %4770 = vmatpush3.bf16.msra.mxu1 %v4834_v3 }
0x25cf   : > { %4771 = vmatprep.subr.bf16.mxu1 %v4988_v12 }
0x25d2   : > { %4772 = vmatpush3.bf16.msra.mxu1 %v4835_v20 }
0x25d3   : > { %4773 = vmatprep.subr.bf16.mxu1 %v4988_v12  ;;  %v4299_v12 = vld [vmem:[%s5881_s19] ss:$0 sm:$0xff] }
0x25d6   : > { %4774 = vmatpush3.bf16.msra.mxu1 %v4836_v22 }
0x268c   : > { %v3829_v35 = vpop.f32.mrb[96].mxu1 }
0x268d   : > { %v3836_v21 = vadd.f32 %v3829_v35, %v3665_v15  ;;  %v4745_v36 = vpop.f32.mrb[97].mxu1  ;;  %v4292_v15 = vld [vmem:[%s5877_s15] ss:$0 sm:$0xff] }
0x268e   : > { %v3832_v38 = vpop.f32.mrb[98].mxu1 }
0x268f   : > { %v3838_v42 = vadd.f32 %v3836_v21, %v5524_v31  ;;  %v3837_v44 = vadd.f32 %v3832_v38, %v3666_v18  ;;  %v4746_v45 = vpop.f32.mrb[99].mxu1 }
0x2691   : > { %v3839_v46 = vadd.f32 %v3837_v44, %v5526_v2  ;;  %v3847_v47 = vadd.f32 %v4290_v39, %v3838_v42 }
0x2693   : > { %v3851_v48 = vsel %vm770_vm0, %v3847_v47, 0.0  ;;  %v3848_v49 = vadd.f32 %v4290_v39, %v3839_v46 }
0x2694   : > { %3852 = vadd.xlane.f32.xlu1 %v3851_v48 }
0x2695   : > { %v3854_v37 = vsel %vm2253_vm9, %v3848_v49, 0.0 }
0x2698   : > { %3855 = vadd.xlane.f32.xlu1 %v3854_v37 }
0x2721   : > { %v3853_v50 = vpop.xlane.xlu1 %3852 }
0x2722   : > { %v3857_v51 = vmul.f32 0.015625, %v3853_v50 }
0x2724   : > { %v3859_v40 = vsub.f32 %v3847_v47, %v3857_v51 }
0x2725   : > { %v3856_v41 = vpop.xlane.xlu1 %3855 }
0x2726   : > { %v3858_v52 = vmul.f32 0.015625, %v3856_v41  ;;  %v3861_v53 = vmul.f32 %v3859_v40, %v3859_v40 }
0x2728   : > { %v3860_v54 = vsub.f32 %v3848_v49, %v3858_v52  ;;  %v3863_v31 = vsel %vm770_vm0, %v3861_v53, 0.0 }
0x2729   : > { %3864 = vadd.xlane.f32.xlu1 %v3863_v31 }
0x272a   : > { %v3862_v43 = vmul.f32 %v3860_v54, %v3860_v54 }
0x272c   : > { %v3866_v2 = vsel %vm2253_vm9, %v3862_v43, 0.0 }
0x272d   : > { %3867 = vadd.xlane.f32.xlu1 %v3866_v2 }
0x27b6   : > { %v3865_v4 = vpop.xlane.xlu1 %3864 }
0x27b7   : > { %v3869_v5 = vmul.f32 0.015625, %v3865_v4 }
0x27b9   : > { %v3871_v6 = vadd.f32 1e-05, %v3869_v5 }
0x27ba   : > { %v3868_v7 = vpop.xlane.xlu1 %3867 }
0x27bb   : > { %4969 = vrsqrt.f32 %v3871_v6  ;;  %v3870_v8 = vmul.f32 0.015625, %v3868_v7 }
0x27bd   : > { %v3872_v9 = vadd.f32 1e-05, %v3870_v8 }
0x27bf   : > { %4971 = vrsqrt.f32 %v3872_v9 }
0x27c5   : > { %v4970_v10 = vpop.eup %4969 }
0x27c6   : > { %v3875_v11 = vmul.f32 %v4970_v10, %v3859_v40 }
0x27c8   : > { %v3883_v14 = vmul.f32 %v4291_v32, %v3875_v11 }
0x27c9   : > { %v4972_v13 = vpop.eup %4971 }
0x27ca   : > { %v3876_v62 = vmul.f32 %v4972_v13, %v3860_v54  ;;  %v3891_v17 = vadd.f32 %v4292_v15, %v3883_v14 }
0x27cc   : > { %v3884_v16 = vmul.f32 %v4291_v32, %v3876_v62 }
0x27ce   : > { %v3892_v18 = vadd.f32 %v4292_v15, %v3884_v16 }
0x27d0   : > { %v3893_v19 = vpack.c.bf16 %v3892_v18, %v3891_v17 }
0x27d2   : > { %4756 = vmatmul.mubr.msk.bf16.vlgmr.msra.gmra.mrb[104].mxu0 %vm770_vm0, %v3893_v19 }
0x28a5   : > { %v3970_v23 = vpop.f32.mrb[104].mxu0 }
0x28a6   : > { %v3971_v24 = vadd.f32 %v4293_v59, %v3970_v23  ;;  %v4757_v30 = vpop.f32.mrb[105].mxu0 }
0x28a7   : > { %v3973_v25 = vpop.f32.mrb[106].mxu0 }
0x28a8   : > { %v3974_v26 = vadd.f32 %v4293_v59, %v3973_v25  ;;  %v4758_v27 = vpop.f32.mrb[107].mxu0  ;;  %v3977_v28 = vmax.f32 %v3971_v24, 0.0 }
0x28aa   : > { %v3978_v29 = vmax.f32 %v3974_v26, 0.0 }
0x28ac   : > { %v3979_v33 = vpack.c.bf16 %v3978_v29, %v3977_v28 }
0x28ae   : > { %4776 = vmatmul.mubr.bf16.vlgmr.msra.gmra.mrb[100].mxu1 %v3979_v33 }
0x2981   : > { %v4085_v34 = vpop.f32.mrb[100].mxu1 }
0x2982   : > { %v4086_v35 = vadd.f32 %v4299_v12, %v4085_v34  ;;  %v4777_v21 = vpop.f32.mrb[101].mxu1 }
0x2983   : > { %v4088_v36 = vpop.f32.mrb[102].mxu1 }
0x2984   : > { %v4092_v38 = vadd.f32 %v4086_v35, %v3891_v17  ;;  %v4089_v39 = vadd.f32 %v4299_v12, %v4088_v36  ;;  %v4778_v42 = vpop.f32.mrb[103].mxu1 }
0x2986   : > { %v4093_v44 = vadd.f32 %v4089_v39, %v3892_v18  ;;  %v4096_v45 = vsel %vm770_vm0, %v4092_v38, 0.0 }
0x2987   : > { %4097 = vadd.xlane.f32.xlu1 %v4096_v45 }
0x2988   : > { %v4099_v46 = vsel %vm2253_vm9, %v4093_v44, 0.0 }
0x298b   : > { %4100 = vadd.xlane.f32.xlu1 %v4099_v46 }
0x2a14   : > { %v4098_v47 = vpop.xlane.xlu1 %4097 }
0x2a15   : > { %v4102_v48 = vmul.f32 0.015625, %v4098_v47 }
0x2a17   : > { %v4104_v49 = vsub.f32 %v4092_v38, %v4102_v48 }
0x2a18   : > { %v4101_v37 = vpop.xlane.xlu1 %4100 }
0x2a19   : > { %v4103_v50 = vmul.f32 0.015625, %v4101_v37  ;;  %v4106_v51 = vmul.f32 %v4104_v49, %v4104_v49 }
0x2a1b   : > { %v4105_v40 = vsub.f32 %v4093_v44, %v4103_v50  ;;  %v4108_v41 = vsel %vm770_vm0, %v4106_v51, 0.0 }
0x2a1c   : > { %4109 = vadd.xlane.f32.xlu0 %v4108_v41 }
0x2a1d   : > { %v4107_v52 = vmul.f32 %v4105_v40, %v4105_v40 }
0x2a1f   : > { %v4111_v53 = vsel %vm2253_vm9, %v4107_v52, 0.0 }
0x2a20   : > { %4112 = vadd.xlane.f32.xlu1 %v4111_v53 }
0x2aa9   : > { %v4110_v54 = vpop.xlane.xlu0 %4109 }
0x2aaa   : > { %v4114_v31 = vmul.f32 0.015625, %v4110_v54 }
0x2aac   : > { %v4116_v43 = vadd.f32 1e-05, %v4114_v31 }
0x2aad   : > { %v4113_v2 = vpop.xlane.xlu1 %4112 }
0x2aae   : > { %4973 = vrsqrt.f32 %v4116_v43  ;;  %v4115_v55 = vmul.f32 0.015625, %v4113_v2 }
0x2ab0   : > { %v4117_v56 = vadd.f32 1e-05, %v4115_v55 }
0x2ab2   : > { %4975 = vrsqrt.f32 %v4117_v56 }
0x2ab8   : > { %v4974_v57 = vpop.eup %4973 }
0x2ab9   : > { %v4120_v60 = vmul.f32 %v4974_v57, %v4104_v49 }
0x2abb   : > { %v4128_v63 = vmul.f32 %v4308_v58, %v4120_v60 }
0x2abc   : > { %v4976_v1 = vpop.eup %4975 }
0x2abd   : > { %v4136_v0 = vadd.f32 %v4309_v61, %v4128_v63  ;;  %v4121_v3 = vmul.f32 %v4976_v1, %v4105_v40 }
0x2abf   : > { %4138 = vst.msk [vmem:[%s703_s25] sm:$0xff] %vm770_vm0, %v4136_v0  ;;  %v4129_v4 = vmul.f32 %v4308_v58, %v4121_v3 }
0x2ac1   : > { %v4137_v5 = vadd.f32 %v4309_v61, %v4129_v4 }
0x2ac3   : > { %4139 = vst.msk [vmem:[%s703_s25 + $0x8] sm:$0xf] %vm2253_vm9, %v4137_v5 }
0x2ac4 PF: > { %s32_s3 = sadd.s32 1, %s4985_s3  }
0x2ac5   : > { %p29_p4 = scmp.ge.s32.totalorder %s32_s3, 4  }
0x2ac7   :  { %31 = sbr.rel (!%p29_p4) target bundleno = 8 (0x8), region = 141 }

</bundles_post_ra>
